<compile_context>
chip_gen: v7x
topology: tpu7x:2x2x1
jax: 0.10.0
libtpu: 0.0.40
codegen_flags: <defaults>
</compile_context>

<pallas_src>
import jax
import jax.numpy as jnp
from jax.experimental import pallas as pl
from jax.experimental.pallas import tpu as pltpu


def _odelstm_recurrence_kernel(gx_ref, ts_ref, whh_ref, w1_ref, b1_ref,
                               w21_ref, b2w1_ref, w2_ref, b2_ref, y_ref):
    """Single-invocation ODE-LSTM recurrence.

    gx_ref : (T, B, 4H)  precomputed x@W_ih + b (g-gate lanes pre-scaled by 2)
    ts_ref : (T, B, 1)   timespans
    y_ref  : (T, B, H)   ODE-evolved hidden state per step (projected outside)
    """
    T, B, _ = gx_ref.shape
    H = w1_ref.shape[0]

    # Weights stay resident in vregs/VMEM for the whole recurrence.
    w_hh = whh_ref[...]          # (H, 4H), g-gate columns pre-scaled by 2
    w1 = w1_ref[...]             # (H, H)
    b1 = b1_ref[...]             # (1, H)
    w21 = w21_ref[...]           # (H, H) = w2 @ w1
    b2w1 = b2w1_ref[...]         # (1, H) = b2 @ w1
    w2 = w2_ref[...]             # (H, H)
    b2_18 = 18.0 * b2_ref[...]   # (1, H), hoisted constant (3 unfolds * 6)

    def step(t, carry):
        h, c = carry
        # Only the h-dependent matmul remains on the serial chain.
        gates = gx_ref[t] + jnp.dot(h, w_hh, preferred_element_type=jnp.float32)

        # Single full-width sigmoid (one EUP pass); g recovered via
        # tanh(x) = 2*sigmoid(2x) - 1 (the *2 was folded into the weights).
        s = jax.nn.sigmoid(gates)
        i_g = s[:, 0 * H:1 * H]
        f_g = s[:, 1 * H:2 * H]
        g_g = 2.0 * s[:, 2 * H:3 * H] - 1.0
        o_g = s[:, 3 * H:4 * H]

        c_new = f_g * c + i_g * g_g
        h_new = o_g * jnp.tanh(c_new)

        # fixed_rk4: 3 unfolds of RK4 with delta_t = ts / 3.
        # Broadcasts hoisted out of the unrolled RK4 loop; division -> multiply.
        delta = jnp.broadcast_to(ts_ref[t] * (1.0 / 3.0), (B, H))
        hd = delta * 0.5
        d6 = delta * (1.0 / 6.0)

        # Fused RK4: carry u = y@w1 + b1 across stages and unfolds so each
        # stage has exactly ONE matmul (with w21) on the critical path.
        u = jnp.dot(h_new, w1, preferred_element_type=jnp.float32) + b1
        s_sum = jnp.zeros((B, H), jnp.float32)
        for m in range(3):                      # static unroll of the 3 unfolds
            z1 = jnp.tanh(u)
            p1 = jnp.dot(z1, w21, preferred_element_type=jnp.float32) + b2w1
            z2 = jnp.tanh(u + hd * p1)
            p2 = jnp.dot(z2, w21, preferred_element_type=jnp.float32) + b2w1
            z3 = jnp.tanh(u + hd * p2)
            p3 = jnp.dot(z3, w21, preferred_element_type=jnp.float32) + b2w1
            z4 = jnp.tanh(u + delta * p3)
            s_sum = s_sum + (z1 + 2.0 * (z2 + z3) + z4)
            if m < 2:
                # u(y_{m+1}) = u(y_m) + d/6 * (S_m @ w21 + 6*b2w1)
                #            = u(y_m) + d/6 * (p1 + 2p2 + 2p3 + p4)
                p4 = jnp.dot(z4, w21, preferred_element_type=jnp.float32) + b2w1
                u = u + d6 * (p1 + 2.0 * (p2 + p3) + p4)

        # y_3 = y_0 + d/6 * ((S1+S2+S3) @ w2 + 18*b2)   (d is per-timestep const)
        y = h_new + d6 * (jnp.dot(s_sum, w2, preferred_element_type=jnp.float32)
                          + b2_18)

        y_ref[t] = y
        return (y, c_new)

    h0 = jnp.zeros((B, H), jnp.float32)
    c0 = jnp.zeros((B, H), jnp.float32)
    # Full unroll for short sequences (LLO scheduling visibility); partial
    # unroll for long ones to bound compile time / instruction footprint.
    unroll = True if T <= 32 else 8
    jax.lax.fori_loop(0, T, step, (h0, c0), unroll=unroll)


def walker_kinematic_forward(params, x, t):
    """x: (B, T, D_in), t: (B, T)  ->  (B, T, D_in)."""
    B, T, D = x.shape
    H = params["w_hh"].shape[0]

    x_tm = jnp.transpose(x, (1, 0, 2)).astype(jnp.float32)            # (T, B, D)
    ts_tm = jnp.transpose(t, (1, 0)).astype(jnp.float32)[..., None]   # (T, B, 1)

    # Pre-scale the g-gate columns by 2 (constant weight transform) so the
    # kernel needs a single sigmoid pass per step (tanh(g) = 2*sigmoid(2g)-1).
    g_scale = jnp.concatenate([jnp.ones((2 * H,), jnp.float32),
                               jnp.full((H,), 2.0, jnp.float32),
                               jnp.ones((H,), jnp.float32)])[None, :]  # (1, 4H)
    w_hh_s = params["w_hh"] * g_scale

    # Hoist the h-independent input projection out of the recurrence:
    # one batched (T*B, D) @ (D, 4H) matmul instead of T serial tiny ones.
    gates_x = (jnp.einsum("tbd,dg->tbg", x_tm, params["w_ih"] * g_scale)
               + params["b_lstm"] * g_scale)

    # RK4 algebraic fusion constants (exact): k@w1 = z@(w2@w1) + b2@w1.
    w21 = params["w2"] @ params["w1"]      # (H, H)
    b2w1 = params["b2"] @ params["w1"]     # (1, H)

    vmem = pl.BlockSpec(memory_space=pltpu.MemorySpace.VMEM)

    y_all = pl.pallas_call(
        _odelstm_recurrence_kernel,
        out_shape=jax.ShapeDtypeStruct((T, B, H), jnp.float32),
        in_specs=[vmem] * 9,
        out_specs=vmem,
    )(gates_x, ts_tm, w_hh_s, params["w1"], params["b1"],
      w21, b2w1, params["w2"], params["b2"])

    # Fold the two output linears (no nonlinearity in between) and apply them
    # once to the whole sequence instead of twice per timestep.
    w_out = params["w_fi"] @ params["w_fo"]                    # (H, D)
    b_out = params["b_fi"] @ params["w_fo"] + params["b_fo"]   # (1, D)
    out_tm = jnp.einsum("tbh,hd->tbd", y_all, w_out) + b_out
    return jnp.transpose(out_tm, (1, 0, 2))                    # (B, T, D)


def init_params(key, input_size, hidden_size):
    """Deterministic synthetic init matching the PyTorch parameter shapes."""
    D, H = input_size, hidden_size
    ks = jax.random.split(key, 12)

    def u(k, shape, fan_in):
        bound = 1.0 / float(fan_in) ** 0.5
        return jax.random.uniform(k, shape, jnp.float32, -bound, bound)

    w_ih = u(ks[0], (4 * H, D), H)      # nn.LSTMCell weight_ih
    w_hh = u(ks[1], (4 * H, H), H)      # nn.LSTMCell weight_hh
    b_ih = u(ks[2], (4 * H,), H)
    b_hh = u(ks[3], (4 * H,), H)
    w1 = u(ks[4], (H, H), H); b1 = u(ks[5], (H,), H)        # f_node layer 1
    w2 = u(ks[6], (H, H), H); b2 = u(ks[7], (H,), H)        # f_node layer 2
    w_fi = u(ks[8], (H, H), H); b_fi = u(ks[9], (H,), H)    # ODELSTM.fc (H -> H)
    w_fo = u(ks[10], (D, H), H); b_fo = u(ks[11], (D,), H)  # model.fc (H -> D)

    return {
        "w_ih": w_ih.T,                      # (D, 4H)  stored pre-transposed for x @ W
        "w_hh": w_hh.T,                      # (H, 4H)
        "b_lstm": (b_ih + b_hh)[None, :],    # (1, 4H)
        "w1": w1.T, "b1": b1[None, :],
        "w2": w2.T, "b2": b2[None, :],
        "w_fi": w_fi.T, "b_fi": b_fi[None, :],
        "w_fo": w_fo.T, "b_fo": b_fo[None, :],
    }


def reference_forward(params, x, t):
    """Pure-JAX reference of the same forward (unfused, for correctness check)."""
    B, T, D = x.shape
    H = params["w_hh"].shape[0]

    def f_node(y):
        z = jnp.tanh(y @ params["w1"] + params["b1"])
        return z @ params["w2"] + params["b2"]

    def step(carry, inp):
        h, c = carry
        x_t, ts = inp
        gates = x_t @ params["w_ih"] + h @ params["w_hh"] + params["b_lstm"]
        i_g = jax.nn.sigmoid(gates[:, :H])
        f_g = jax.nn.sigmoid(gates[:, H:2 * H])
        g_g = jnp.tanh(gates[:, 2 * H:3 * H])
        o_g = jax.nn.sigmoid(gates[:, 3 * H:])
        c_new = f_g * c + i_g * g_g
        h_new = o_g * jnp.tanh(c_new)
        delta = ts[:, None] / 3.0
        y = h_new
        for _ in range(3):
            k1 = f_node(y)
            k2 = f_node(y + k1 * delta * 0.5)
            k3 = f_node(y + k2 * delta * 0.5)
            k4 = f_node(y + k3 * delta)
            y = y + delta * (k1 + 2.0 * k2 + 2.0 * k3 + k4) / 6.0
        out = (y @ params["w_fi"] + params["b_fi"]) @ params["w_fo"] + params["b_fo"]
        return (y, c_new), out

    h0 = jnp.zeros((B, H), jnp.float32)
    c0 = jnp.zeros((B, H), jnp.float32)
    xs = (jnp.transpose(x, (1, 0, 2)), jnp.transpose(t, (1, 0)))
    _, outs = jax.lax.scan(step, (h0, c0), xs)
    return jnp.transpose(outs, (1, 0, 2))


if __name__ == "__main__":
    B, T, D, H = 4, 8, 16, 32           # batch, seq, input_size, hidden_size
    key = jax.random.PRNGKey(0)
    kp, kx, kt = jax.random.split(key, 3)
    params = init_params(kp, D, H)
    x = jax.random.normal(kx, (B, T, D), jnp.float32)
    t = jax.random.uniform(kt, (B, T), jnp.float32, 0.1, 1.0)

    out = jax.block_until_ready(walker_kinematic_forward(params, x, t))
    ref = jax.block_until_ready(reference_forward(params, x, t))

    assert out.shape == (B, T, D)
    assert bool(jnp.all(jnp.isfinite(out)))
    max_err = float(jnp.max(jnp.abs(out - ref)))
    assert bool(jnp.allclose(out, ref, atol=1e-3, rtol=1e-3)), max_err
    print("KERNEL_OK")
</pallas_src>

<mosaic_0001>
module attributes {stable_mosaic.version = 11 : i64} {
  func.func @_odelstm_recurrence_kernel(%arg0: memref<8x4x128xf32, #tpu.memory_space<vmem>>, %arg1: memref<8x4x1xf32, #tpu.memory_space<vmem>>, %arg2: memref<32x128xf32, #tpu.memory_space<vmem>>, %arg3: memref<32x32xf32, #tpu.memory_space<vmem>>, %arg4: memref<1x32xf32, #tpu.memory_space<vmem>>, %arg5: memref<32x32xf32, #tpu.memory_space<vmem>>, %arg6: memref<1x32xf32, #tpu.memory_space<vmem>>, %arg7: memref<32x32xf32, #tpu.memory_space<vmem>>, %arg8: memref<1x32xf32, #tpu.memory_space<vmem>>, %arg9: memref<8x4x32xf32, #tpu.memory_space<vmem>>) attributes {dimension_semantics = [], scalar_prefetch = 0 : i64, scratch_operands = 0 : i64, tpu.core_type = #tpu.core_type<tc>} {
    %c0 = arith.constant 0 : index
    %c0_0 = arith.constant 0 : index
    %0 = vector.load %arg2[%c0, %c0_0] : memref<32x128xf32, #tpu.memory_space<vmem>>, vector<32x128xf32>
    %c0_1 = arith.constant 0 : index
    %c0_2 = arith.constant 0 : index
    %1 = vector.load %arg3[%c0_1, %c0_2] : memref<32x32xf32, #tpu.memory_space<vmem>>, vector<32x32xf32>
    %c0_3 = arith.constant 0 : index
    %c0_4 = arith.constant 0 : index
    %2 = vector.load %arg4[%c0_3, %c0_4] : memref<1x32xf32, #tpu.memory_space<vmem>>, vector<1x32xf32>
    %c0_5 = arith.constant 0 : index
    %c0_6 = arith.constant 0 : index
    %3 = vector.load %arg5[%c0_5, %c0_6] : memref<32x32xf32, #tpu.memory_space<vmem>>, vector<32x32xf32>
    %c0_7 = arith.constant 0 : index
    %c0_8 = arith.constant 0 : index
    %4 = vector.load %arg6[%c0_7, %c0_8] : memref<1x32xf32, #tpu.memory_space<vmem>>, vector<1x32xf32>
    %c0_9 = arith.constant 0 : index
    %c0_10 = arith.constant 0 : index
    %5 = vector.load %arg7[%c0_9, %c0_10] : memref<32x32xf32, #tpu.memory_space<vmem>>, vector<32x32xf32>
    %c0_11 = arith.constant 0 : index
    %c0_12 = arith.constant 0 : index
    %6 = vector.load %arg8[%c0_11, %c0_12] : memref<1x32xf32, #tpu.memory_space<vmem>>, vector<1x32xf32>
    %cst = arith.constant 1.800000e+01 : f32
    %7 = vector.broadcast %cst : f32 to vector<1x32xf32>
    %8 = arith.mulf %7, %6 : vector<1x32xf32>
    %cst_13 = arith.constant 0.000000e+00 : f32
    %9 = vector.broadcast %cst_13 : f32 to vector<4x32xf32>
    %cst_14 = arith.constant 0.000000e+00 : f32
    %10 = vector.broadcast %cst_14 : f32 to vector<4x32xf32>
    %c0_i32 = arith.constant 0 : i32
    %11 = arith.index_cast %c0_i32 : i32 to index
    %c0_15 = arith.constant 0 : index
    %c0_16 = arith.constant 0 : index
    %12 = vector.load %arg0[%11, %c0_15, %c0_16] : memref<8x4x128xf32, #tpu.memory_space<vmem>>, vector<1x4x128xf32>
    %13 = vector.shape_cast %12 : vector<1x4x128xf32> to vector<4x128xf32>
    %cst_17 = arith.constant dense<0.000000e+00> : vector<4x128xf32>
    %14 = tpu.matmul %9, %0, %cst_17 {dimension_numbers = #tpu.dot_dimension_numbers<[1], [0], [0], [1], [0, 0, 1, 1], [], []>} : vector<4x32xf32>, vector<32x128xf32>, vector<4x128xf32> -> vector<4x128xf32>
    %15 = arith.addf %13, %14 : vector<4x128xf32>
    %16 = arith.negf %15 : vector<4x128xf32>
    %17 = math.exp %16 : vector<4x128xf32>
    %cst_18 = arith.constant 1.000000e+00 : f32
    %18 = vector.broadcast %cst_18 : f32 to vector<4x128xf32>
    %19 = arith.addf %18, %17 : vector<4x128xf32>
    %20 = arith.divf %18, %19 : vector<4x128xf32>
    %21 = vector.extract_strided_slice %20 {offsets = [0, 0], sizes = [4, 32], strides = [1, 1]} : vector<4x128xf32> to vector<4x32xf32>
    %22 = vector.extract_strided_slice %20 {offsets = [0, 32], sizes = [4, 32], strides = [1, 1]} : vector<4x128xf32> to vector<4x32xf32>
    %23 = vector.extract_strided_slice %20 {offsets = [0, 64], sizes = [4, 32], strides = [1, 1]} : vector<4x128xf32> to vector<4x32xf32>
    %cst_19 = arith.constant 2.000000e+00 : f32
    %24 = vector.broadcast %cst_19 : f32 to vector<4x32xf32>
    %25 = arith.mulf %24, %23 : vector<4x32xf32>
    %cst_20 = arith.constant 1.000000e+00 : f32
    %26 = vector.broadcast %cst_20 : f32 to vector<4x32xf32>
    %27 = arith.subf %25, %26 : vector<4x32xf32>
    %28 = vector.extract_strided_slice %20 {offsets = [0, 96], sizes = [4, 32], strides = [1, 1]} : vector<4x128xf32> to vector<4x32xf32>
    %29 = arith.mulf %22, %10 : vector<4x32xf32>
    %30 = arith.mulf %21, %27 : vector<4x32xf32>
    %31 = arith.addf %29, %30 : vector<4x32xf32>
    %32 = math.tanh %31 : vector<4x32xf32>
    %33 = arith.mulf %28, %32 : vector<4x32xf32>
    %34 = arith.index_cast %c0_i32 : i32 to index
    %c0_21 = arith.constant 0 : index
    %c0_22 = arith.constant 0 : index
    %35 = vector.load %arg1[%34, %c0_21, %c0_22] : memref<8x4x1xf32, #tpu.memory_space<vmem>>, vector<1x4x1xf32>
    %36 = vector.shape_cast %35 : vector<1x4x1xf32> to vector<4x1xf32>
    %cst_23 = arith.constant 0.333333343 : f32
    %37 = vector.broadcast %cst_23 : f32 to vector<4x1xf32>
    %38 = arith.mulf %36, %37 : vector<4x1xf32>
    %39 = vector.shape_cast %38 : vector<4x1xf32> to vector<4x1xf32>
    %40 = vector.broadcast %39 : vector<4x1xf32> to vector<4x32xf32>
    %cst_24 = arith.constant 5.000000e-01 : f32
    %41 = vector.broadcast %cst_24 : f32 to vector<4x32xf32>
    %42 = arith.mulf %40, %41 : vector<4x32xf32>
    %cst_25 = arith.constant 0.166666672 : f32
    %43 = vector.broadcast %cst_25 : f32 to vector<4x32xf32>
    %44 = arith.mulf %40, %43 : vector<4x32xf32>
    %cst_26 = arith.constant dense<0.000000e+00> : vector<4x32xf32>
    %45 = tpu.matmul %33, %1, %cst_26 {dimension_numbers = #tpu.dot_dimension_numbers<[1], [0], [0], [1], [0, 0, 1, 1], [], []>} : vector<4x32xf32>, vector<32x32xf32>, vector<4x32xf32> -> vector<4x32xf32>
    %46 = vector.broadcast %2 : vector<1x32xf32> to vector<4x32xf32>
    %47 = arith.addf %45, %46 : vector<4x32xf32>
    %cst_27 = arith.constant 0.000000e+00 : f32
    %48 = vector.broadcast %cst_27 : f32 to vector<4x32xf32>
    %49 = math.tanh %47 : vector<4x32xf32>
    %cst_28 = arith.constant dense<0.000000e+00> : vector<4x32xf32>
    %50 = tpu.matmul %49, %3, %cst_28 {dimension_numbers = #tpu.dot_dimension_numbers<[1], [0], [0], [1], [0, 0, 1, 1], [], []>} : vector<4x32xf32>, vector<32x32xf32>, vector<4x32xf32> -> vector<4x32xf32>
    %51 = vector.broadcast %4 : vector<1x32xf32> to vector<4x32xf32>
    %52 = arith.addf %50, %51 : vector<4x32xf32>
    %53 = arith.mulf %42, %52 : vector<4x32xf32>
    %54 = arith.addf %47, %53 : vector<4x32xf32>
    %55 = math.tanh %54 : vector<4x32xf32>
    %cst_29 = arith.constant dense<0.000000e+00> : vector<4x32xf32>
    %56 = tpu.matmul %55, %3, %cst_29 {dimension_numbers = #tpu.dot_dimension_numbers<[1], [0], [0], [1], [0, 0, 1, 1], [], []>} : vector<4x32xf32>, vector<32x32xf32>, vector<4x32xf32> -> vector<4x32xf32>
    %57 = vector.broadcast %4 : vector<1x32xf32> to vector<4x32xf32>
    %58 = arith.addf %56, %57 : vector<4x32xf32>
    %59 = arith.mulf %42, %58 : vector<4x32xf32>
    %60 = arith.addf %47, %59 : vector<4x32xf32>
    %61 = math.tanh %60 : vector<4x32xf32>
    %cst_30 = arith.constant dense<0.000000e+00> : vector<4x32xf32>
    %62 = tpu.matmul %61, %3, %cst_30 {dimension_numbers = #tpu.dot_dimension_numbers<[1], [0], [0], [1], [0, 0, 1, 1], [], []>} : vector<4x32xf32>, vector<32x32xf32>, vector<4x32xf32> -> vector<4x32xf32>
    %63 = vector.broadcast %4 : vector<1x32xf32> to vector<4x32xf32>
    %64 = arith.addf %62, %63 : vector<4x32xf32>
    %65 = arith.mulf %40, %64 : vector<4x32xf32>
    %66 = arith.addf %47, %65 : vector<4x32xf32>
    %67 = math.tanh %66 : vector<4x32xf32>
    %68 = arith.addf %55, %61 : vector<4x32xf32>
    %cst_31 = arith.constant 2.000000e+00 : f32
    %69 = vector.broadcast %cst_31 : f32 to vector<4x32xf32>
    %70 = arith.mulf %69, %68 : vector<4x32xf32>
    %71 = arith.addf %49, %70 : vector<4x32xf32>
    %72 = arith.addf %71, %67 : vector<4x32xf32>
    %73 = arith.addf %48, %72 : vector<4x32xf32>
    %cst_32 = arith.constant dense<0.000000e+00> : vector<4x32xf32>
    %74 = tpu.matmul %67, %3, %cst_32 {dimension_numbers = #tpu.dot_dimension_numbers<[1], [0], [0], [1], [0, 0, 1, 1], [], []>} : vector<4x32xf32>, vector<32x32xf32>, vector<4x32xf32> -> vector<4x32xf32>
    %75 = vector.broadcast %4 : vector<1x32xf32> to vector<4x32xf32>
    %76 = arith.addf %74, %75 : vector<4x32xf32>
    %77 = arith.addf %58, %64 : vector<4x32xf32>
    %cst_33 = arith.constant 2.000000e+00 : f32
    %78 = vector.broadcast %cst_33 : f32 to vector<4x32xf32>
    %79 = arith.mulf %78, %77 : vector<4x32xf32>
    %80 = arith.addf %52, %79 : vector<4x32xf32>
    %81 = arith.addf %80, %76 : vector<4x32xf32>
    %82 = arith.mulf %44, %81 : vector<4x32xf32>
    %83 = arith.addf %47, %82 : vector<4x32xf32>
    %84 = math.tanh %83 : vector<4x32xf32>
    %cst_34 = arith.constant dense<0.000000e+00> : vector<4x32xf32>
    %85 = tpu.matmul %84, %3, %cst_34 {dimension_numbers = #tpu.dot_dimension_numbers<[1], [0], [0], [1], [0, 0, 1, 1], [], []>} : vector<4x32xf32>, vector<32x32xf32>, vector<4x32xf32> -> vector<4x32xf32>
    %86 = vector.broadcast %4 : vector<1x32xf32> to vector<4x32xf32>
    %87 = arith.addf %85, %86 : vector<4x32xf32>
    %88 = arith.mulf %42, %87 : vector<4x32xf32>
    %89 = arith.addf %83, %88 : vector<4x32xf32>
    %90 = math.tanh %89 : vector<4x32xf32>
    %cst_35 = arith.constant dense<0.000000e+00> : vector<4x32xf32>
    %91 = tpu.matmul %90, %3, %cst_35 {dimension_numbers = #tpu.dot_dimension_numbers<[1], [0], [0], [1], [0, 0, 1, 1], [], []>} : vector<4x32xf32>, vector<32x32xf32>, vector<4x32xf32> -> vector<4x32xf32>
    %92 = vector.broadcast %4 : vector<1x32xf32> to vector<4x32xf32>
    %93 = arith.addf %91, %92 : vector<4x32xf32>
    %94 = arith.mulf %42, %93 : vector<4x32xf32>
    %95 = arith.addf %83, %94 : vector<4x32xf32>
    %96 = math.tanh %95 : vector<4x32xf32>
    %cst_36 = arith.constant dense<0.000000e+00> : vector<4x32xf32>
    %97 = tpu.matmul %96, %3, %cst_36 {dimension_numbers = #tpu.dot_dimension_numbers<[1], [0], [0], [1], [0, 0, 1, 1], [], []>} : vector<4x32xf32>, vector<32x32xf32>, vector<4x32xf32> -> vector<4x32xf32>
    %98 = vector.broadcast %4 : vector<1x32xf32> to vector<4x32xf32>
    %99 = arith.addf %97, %98 : vector<4x32xf32>
    %100 = arith.mulf %40, %99 : vector<4x32xf32>
    %101 = arith.addf %83, %100 : vector<4x32xf32>
    %102 = math.tanh %101 : vector<4x32xf32>
    %103 = arith.addf %90, %96 : vector<4x32xf32>
    %cst_37 = arith.constant 2.000000e+00 : f32
    %104 = vector.broadcast %cst_37 : f32 to vector<4x32xf32>
    %105 = arith.mulf %104, %103 : vector<4x32xf32>
    %106 = arith.addf %84, %105 : vector<4x32xf32>
    %107 = arith.addf %106, %102 : vector<4x32xf32>
    %108 = arith.addf %73, %107 : vector<4x32xf32>
    %cst_38 = arith.constant dense<0.000000e+00> : vector<4x32xf32>
    %109 = tpu.matmul %102, %3, %cst_38 {dimension_numbers = #tpu.dot_dimension_numbers<[1], [0], [0], [1], [0, 0, 1, 1], [], []>} : vector<4x32xf32>, vector<32x32xf32>, vector<4x32xf32> -> vector<4x32xf32>
    %110 = vector.broadcast %4 : vector<1x32xf32> to vector<4x32xf32>
    %111 = arith.addf %109, %110 : vector<4x32xf32>
    %112 = arith.addf %93, %99 : vector<4x32xf32>
    %cst_39 = arith.constant 2.000000e+00 : f32
    %113 = vector.broadcast %cst_39 : f32 to vector<4x32xf32>
    %114 = arith.mulf %113, %112 : vector<4x32xf32>
    %115 = arith.addf %87, %114 : vector<4x32xf32>
    %116 = arith.addf %115, %111 : vector<4x32xf32>
    %117 = arith.mulf %44, %116 : vector<4x32xf32>
    %118 = arith.addf %83, %117 : vector<4x32xf32>
    %119 = math.tanh %118 : vector<4x32xf32>
    %cst_40 = arith.constant dense<0.000000e+00> : vector<4x32xf32>
    %120 = tpu.matmul %119, %3, %cst_40 {dimension_numbers = #tpu.dot_dimension_numbers<[1], [0], [0], [1], [0, 0, 1, 1], [], []>} : vector<4x32xf32>, vector<32x32xf32>, vector<4x32xf32> -> vector<4x32xf32>
    %121 = vector.broadcast %4 : vector<1x32xf32> to vector<4x32xf32>
    %122 = arith.addf %120, %121 : vector<4x32xf32>
    %123 = arith.mulf %42, %122 : vector<4x32xf32>
    %124 = arith.addf %118, %123 : vector<4x32xf32>
    %125 = math.tanh %124 : vector<4x32xf32>
    %cst_41 = arith.constant dense<0.000000e+00> : vector<4x32xf32>
    %126 = tpu.matmul %125, %3, %cst_41 {dimension_numbers = #tpu.dot_dimension_numbers<[1], [0], [0], [1], [0, 0, 1, 1], [], []>} : vector<4x32xf32>, vector<32x32xf32>, vector<4x32xf32> -> vector<4x32xf32>
    %127 = vector.broadcast %4 : vector<1x32xf32> to vector<4x32xf32>
    %128 = arith.addf %126, %127 : vector<4x32xf32>
    %129 = arith.mulf %42, %128 : vector<4x32xf32>
    %130 = arith.addf %118, %129 : vector<4x32xf32>
    %131 = math.tanh %130 : vector<4x32xf32>
    %cst_42 = arith.constant dense<0.000000e+00> : vector<4x32xf32>
    %132 = tpu.matmul %131, %3, %cst_42 {dimension_numbers = #tpu.dot_dimension_numbers<[1], [0], [0], [1], [0, 0, 1, 1], [], []>} : vector<4x32xf32>, vector<32x32xf32>, vector<4x32xf32> -> vector<4x32xf32>
    %133 = vector.broadcast %4 : vector<1x32xf32> to vector<4x32xf32>
    %134 = arith.addf %132, %133 : vector<4x32xf32>
    %135 = arith.mulf %40, %134 : vector<4x32xf32>
    %136 = arith.addf %118, %135 : vector<4x32xf32>
    %137 = math.tanh %136 : vector<4x32xf32>
    %138 = arith.addf %125, %131 : vector<4x32xf32>
    %cst_43 = arith.constant 2.000000e+00 : f32
    %139 = vector.broadcast %cst_43 : f32 to vector<4x32xf32>
    %140 = arith.mulf %139, %138 : vector<4x32xf32>
    %141 = arith.addf %119, %140 : vector<4x32xf32>
    %142 = arith.addf %141, %137 : vector<4x32xf32>
    %143 = arith.addf %108, %142 : vector<4x32xf32>
    %cst_44 = arith.constant dense<0.000000e+00> : vector<4x32xf32>
    %144 = tpu.matmul %143, %5, %cst_44 {dimension_numbers = #tpu.dot_dimension_numbers<[1], [0], [0], [1], [0, 0, 1, 1], [], []>} : vector<4x32xf32>, vector<32x32xf32>, vector<4x32xf32> -> vector<4x32xf32>
    %145 = vector.broadcast %8 : vector<1x32xf32> to vector<4x32xf32>
    %146 = arith.addf %144, %145 : vector<4x32xf32>
    %147 = arith.mulf %44, %146 : vector<4x32xf32>
    %148 = arith.addf %33, %147 : vector<4x32xf32>
    %149 = arith.index_cast %c0_i32 : i32 to index
    %c0_45 = arith.constant 0 : index
    %c0_46 = arith.constant 0 : index
    %150 = vector.load %arg9[%149, %c0_45, %c0_46] : memref<8x4x32xf32, #tpu.memory_space<vmem>>, vector<1x4x32xf32>
    %151 = vector.shape_cast %150 : vector<1x4x32xf32> to vector<4x32xf32>
    %152 = vector.shape_cast %148 : vector<4x32xf32> to vector<1x4x32xf32>
    tpu.vector_store %arg9[%149, %c0_45, %c0_46], %152 {strides = array<i32>} : memref<8x4x32xf32, #tpu.memory_space<vmem>>, vector<1x4x32xf32>,
    %c1_i32 = arith.constant 1 : i32
    %153 = arith.index_cast %c1_i32 : i32 to index
    %c0_47 = arith.constant 0 : index
    %c0_48 = arith.constant 0 : index
    %154 = vector.load %arg0[%153, %c0_47, %c0_48] : memref<8x4x128xf32, #tpu.memory_space<vmem>>, vector<1x4x128xf32>
    %155 = vector.shape_cast %154 : vector<1x4x128xf32> to vector<4x128xf32>
    %cst_49 = arith.constant dense<0.000000e+00> : vector<4x128xf32>
    %156 = tpu.matmul %148, %0, %cst_49 {dimension_numbers = #tpu.dot_dimension_numbers<[1], [0], [0], [1], [0, 0, 1, 1], [], []>} : vector<4x32xf32>, vector<32x128xf32>, vector<4x128xf32> -> vector<4x128xf32>
    %157 = arith.addf %155, %156 : vector<4x128xf32>
    %158 = arith.negf %157 : vector<4x128xf32>
    %159 = math.exp %158 : vector<4x128xf32>
    %cst_50 = arith.constant 1.000000e+00 : f32
    %160 = vector.broadcast %cst_50 : f32 to vector<4x128xf32>
    %161 = arith.addf %160, %159 : vector<4x128xf32>
    %162 = arith.divf %160, %161 : vector<4x128xf32>
    %163 = vector.extract_strided_slice %162 {offsets = [0, 0], sizes = [4, 32], strides = [1, 1]} : vector<4x128xf32> to vector<4x32xf32>
    %164 = vector.extract_strided_slice %162 {offsets = [0, 32], sizes = [4, 32], strides = [1, 1]} : vector<4x128xf32> to vector<4x32xf32>
    %165 = vector.extract_strided_slice %162 {offsets = [0, 64], sizes = [4, 32], strides = [1, 1]} : vector<4x128xf32> to vector<4x32xf32>
    %cst_51 = arith.constant 2.000000e+00 : f32
    %166 = vector.broadcast %cst_51 : f32 to vector<4x32xf32>
    %167 = arith.mulf %166, %165 : vector<4x32xf32>
    %cst_52 = arith.constant 1.000000e+00 : f32
    %168 = vector.broadcast %cst_52 : f32 to vector<4x32xf32>
    %169 = arith.subf %167, %168 : vector<4x32xf32>
    %170 = vector.extract_strided_slice %162 {offsets = [0, 96], sizes = [4, 32], strides = [1, 1]} : vector<4x128xf32> to vector<4x32xf32>
    %171 = arith.mulf %164, %31 : vector<4x32xf32>
    %172 = arith.mulf %163, %169 : vector<4x32xf32>
    %173 = arith.addf %171, %172 : vector<4x32xf32>
    %174 = math.tanh %173 : vector<4x32xf32>
    %175 = arith.mulf %170, %174 : vector<4x32xf32>
    %176 = arith.index_cast %c1_i32 : i32 to index
    %c0_53 = arith.constant 0 : index
    %c0_54 = arith.constant 0 : index
    %177 = vector.load %arg1[%176, %c0_53, %c0_54] : memref<8x4x1xf32, #tpu.memory_space<vmem>>, vector<1x4x1xf32>
    %178 = vector.shape_cast %177 : vector<1x4x1xf32> to vector<4x1xf32>
    %cst_55 = arith.constant 0.333333343 : f32
    %179 = vector.broadcast %cst_55 : f32 to vector<4x1xf32>
    %180 = arith.mulf %178, %179 : vector<4x1xf32>
    %181 = vector.shape_cast %180 : vector<4x1xf32> to vector<4x1xf32>
    %182 = vector.broadcast %181 : vector<4x1xf32> to vector<4x32xf32>
    %cst_56 = arith.constant 5.000000e-01 : f32
    %183 = vector.broadcast %cst_56 : f32 to vector<4x32xf32>
    %184 = arith.mulf %182, %183 : vector<4x32xf32>
    %cst_57 = arith.constant 0.166666672 : f32
    %185 = vector.broadcast %cst_57 : f32 to vector<4x32xf32>
    %186 = arith.mulf %182, %185 : vector<4x32xf32>
    %cst_58 = arith.constant dense<0.000000e+00> : vector<4x32xf32>
    %187 = tpu.matmul %175, %1, %cst_58 {dimension_numbers = #tpu.dot_dimension_numbers<[1], [0], [0], [1], [0, 0, 1, 1], [], []>} : vector<4x32xf32>, vector<32x32xf32>, vector<4x32xf32> -> vector<4x32xf32>
    %188 = vector.broadcast %2 : vector<1x32xf32> to vector<4x32xf32>
    %189 = arith.addf %187, %188 : vector<4x32xf32>
    %cst_59 = arith.constant 0.000000e+00 : f32
    %190 = vector.broadcast %cst_59 : f32 to vector<4x32xf32>
    %191 = math.tanh %189 : vector<4x32xf32>
    %cst_60 = arith.constant dense<0.000000e+00> : vector<4x32xf32>
    %192 = tpu.matmul %191, %3, %cst_60 {dimension_numbers = #tpu.dot_dimension_numbers<[1], [0], [0], [1], [0, 0, 1, 1], [], []>} : vector<4x32xf32>, vector<32x32xf32>, vector<4x32xf32> -> vector<4x32xf32>
    %193 = vector.broadcast %4 : vector<1x32xf32> to vector<4x32xf32>
    %194 = arith.addf %192, %193 : vector<4x32xf32>
    %195 = arith.mulf %184, %194 : vector<4x32xf32>
    %196 = arith.addf %189, %195 : vector<4x32xf32>
    %197 = math.tanh %196 : vector<4x32xf32>
    %cst_61 = arith.constant dense<0.000000e+00> : vector<4x32xf32>
    %198 = tpu.matmul %197, %3, %cst_61 {dimension_numbers = #tpu.dot_dimension_numbers<[1], [0], [0], [1], [0, 0, 1, 1], [], []>} : vector<4x32xf32>, vector<32x32xf32>, vector<4x32xf32> -> vector<4x32xf32>
    %199 = vector.broadcast %4 : vector<1x32xf32> to vector<4x32xf32>
    %200 = arith.addf %198, %199 : vector<4x32xf32>
    %201 = arith.mulf %184, %200 : vector<4x32xf32>
    %202 = arith.addf %189, %201 : vector<4x32xf32>
    %203 = math.tanh %202 : vector<4x32xf32>
    %cst_62 = arith.constant dense<0.000000e+00> : vector<4x32xf32>
    %204 = tpu.matmul %203, %3, %cst_62 {dimension_numbers = #tpu.dot_dimension_numbers<[1], [0], [0], [1], [0, 0, 1, 1], [], []>} : vector<4x32xf32>, vector<32x32xf32>, vector<4x32xf32> -> vector<4x32xf32>
    %205 = vector.broadcast %4 : vector<1x32xf32> to vector<4x32xf32>
    %206 = arith.addf %204, %205 : vector<4x32xf32>
    %207 = arith.mulf %182, %206 : vector<4x32xf32>
    %208 = arith.addf %189, %207 : vector<4x32xf32>
    %209 = math.tanh %208 : vector<4x32xf32>
    %210 = arith.addf %197, %203 : vector<4x32xf32>
    %cst_63 = arith.constant 2.000000e+00 : f32
    %211 = vector.broadcast %cst_63 : f32 to vector<4x32xf32>
    %212 = arith.mulf %211, %210 : vector<4x32xf32>
    %213 = arith.addf %191, %212 : vector<4x32xf32>
    %214 = arith.addf %213, %209 : vector<4x32xf32>
    %215 = arith.addf %190, %214 : vector<4x32xf32>
    %cst_64 = arith.constant dense<0.000000e+00> : vector<4x32xf32>
    %216 = tpu.matmul %209, %3, %cst_64 {dimension_numbers = #tpu.dot_dimension_numbers<[1], [0], [0], [1], [0, 0, 1, 1], [], []>} : vector<4x32xf32>, vector<32x32xf32>, vector<4x32xf32> -> vector<4x32xf32>
    %217 = vector.broadcast %4 : vector<1x32xf32> to vector<4x32xf32>
    %218 = arith.addf %216, %217 : vector<4x32xf32>
    %219 = arith.addf %200, %206 : vector<4x32xf32>
    %cst_65 = arith.constant 2.000000e+00 : f32
    %220 = vector.broadcast %cst_65 : f32 to vector<4x32xf32>
    %221 = arith.mulf %220, %219 : vector<4x32xf32>
    %222 = arith.addf %194, %221 : vector<4x32xf32>
    %223 = arith.addf %222, %218 : vector<4x32xf32>
    %224 = arith.mulf %186, %223 : vector<4x32xf32>
    %225 = arith.addf %189, %224 : vector<4x32xf32>
    %226 = math.tanh %225 : vector<4x32xf32>
    %cst_66 = arith.constant dense<0.000000e+00> : vector<4x32xf32>
    %227 = tpu.matmul %226, %3, %cst_66 {dimension_numbers = #tpu.dot_dimension_numbers<[1], [0], [0], [1], [0, 0, 1, 1], [], []>} : vector<4x32xf32>, vector<32x32xf32>, vector<4x32xf32> -> vector<4x32xf32>
    %228 = vector.broadcast %4 : vector<1x32xf32> to vector<4x32xf32>
    %229 = arith.addf %227, %228 : vector<4x32xf32>
    %230 = arith.mulf %184, %229 : vector<4x32xf32>
    %231 = arith.addf %225, %230 : vector<4x32xf32>
    %232 = math.tanh %231 : vector<4x32xf32>
    %cst_67 = arith.constant dense<0.000000e+00> : vector<4x32xf32>
    %233 = tpu.matmul %232, %3, %cst_67 {dimension_numbers = #tpu.dot_dimension_numbers<[1], [0], [0], [1], [0, 0, 1, 1], [], []>} : vector<4x32xf32>, vector<32x32xf32>, vector<4x32xf32> -> vector<4x32xf32>
    %234 = vector.broadcast %4 : vector<1x32xf32> to vector<4x32xf32>
    %235 = arith.addf %233, %234 : vector<4x32xf32>
    %236 = arith.mulf %184, %235 : vector<4x32xf32>
    %237 = arith.addf %225, %236 : vector<4x32xf32>
    %238 = math.tanh %237 : vector<4x32xf32>
    %cst_68 = arith.constant dense<0.000000e+00> : vector<4x32xf32>
    %239 = tpu.matmul %238, %3, %cst_68 {dimension_numbers = #tpu.dot_dimension_numbers<[1], [0], [0], [1], [0, 0, 1, 1], [], []>} : vector<4x32xf32>, vector<32x32xf32>, vector<4x32xf32> -> vector<4x32xf32>
    %240 = vector.broadcast %4 : vector<1x32xf32> to vector<4x32xf32>
    %241 = arith.addf %239, %240 : vector<4x32xf32>
    %242 = arith.mulf %182, %241 : vector<4x32xf32>
    %243 = arith.addf %225, %242 : vector<4x32xf32>
    %244 = math.tanh %243 : vector<4x32xf32>
    %245 = arith.addf %232, %238 : vector<4x32xf32>
    %cst_69 = arith.constant 2.000000e+00 : f32
    %246 = vector.broadcast %cst_69 : f32 to vector<4x32xf32>
    %247 = arith.mulf %246, %245 : vector<4x32xf32>
    %248 = arith.addf %226, %247 : vector<4x32xf32>
    %249 = arith.addf %248, %244 : vector<4x32xf32>
    %250 = arith.addf %215, %249 : vector<4x32xf32>
    %cst_70 = arith.constant dense<0.000000e+00> : vector<4x32xf32>
    %251 = tpu.matmul %244, %3, %cst_70 {dimension_numbers = #tpu.dot_dimension_numbers<[1], [0], [0], [1], [0, 0, 1, 1], [], []>} : vector<4x32xf32>, vector<32x32xf32>, vector<4x32xf32> -> vector<4x32xf32>
    %252 = vector.broadcast %4 : vector<1x32xf32> to vector<4x32xf32>
    %253 = arith.addf %251, %252 : vector<4x32xf32>
    %254 = arith.addf %235, %241 : vector<4x32xf32>
    %cst_71 = arith.constant 2.000000e+00 : f32
    %255 = vector.broadcast %cst_71 : f32 to vector<4x32xf32>
    %256 = arith.mulf %255, %254 : vector<4x32xf32>
    %257 = arith.addf %229, %256 : vector<4x32xf32>
    %258 = arith.addf %257, %253 : vector<4x32xf32>
    %259 = arith.mulf %186, %258 : vector<4x32xf32>
    %260 = arith.addf %225, %259 : vector<4x32xf32>
    %261 = math.tanh %260 : vector<4x32xf32>
    %cst_72 = arith.constant dense<0.000000e+00> : vector<4x32xf32>
    %262 = tpu.matmul %261, %3, %cst_72 {dimension_numbers = #tpu.dot_dimension_numbers<[1], [0], [0], [1], [0, 0, 1, 1], [], []>} : vector<4x32xf32>, vector<32x32xf32>, vector<4x32xf32> -> vector<4x32xf32>
    %263 = vector.broadcast %4 : vector<1x32xf32> to vector<4x32xf32>
    %264 = arith.addf %262, %263 : vector<4x32xf32>
    %265 = arith.mulf %184, %264 : vector<4x32xf32>
    %266 = arith.addf %260, %265 : vector<4x32xf32>
    %267 = math.tanh %266 : vector<4x32xf32>
    %cst_73 = arith.constant dense<0.000000e+00> : vector<4x32xf32>
    %268 = tpu.matmul %267, %3, %cst_73 {dimension_numbers = #tpu.dot_dimension_numbers<[1], [0], [0], [1], [0, 0, 1, 1], [], []>} : vector<4x32xf32>, vector<32x32xf32>, vector<4x32xf32> -> vector<4x32xf32>
    %269 = vector.broadcast %4 : vector<1x32xf32> to vector<4x32xf32>
    %270 = arith.addf %268, %269 : vector<4x32xf32>
    %271 = arith.mulf %184, %270 : vector<4x32xf32>
    %272 = arith.addf %260, %271 : vector<4x32xf32>
    %273 = math.tanh %272 : vector<4x32xf32>
    %cst_74 = arith.constant dense<0.000000e+00> : vector<4x32xf32>
    %274 = tpu.matmul %273, %3, %cst_74 {dimension_numbers = #tpu.dot_dimension_numbers<[1], [0], [0], [1], [0, 0, 1, 1], [], []>} : vector<4x32xf32>, vector<32x32xf32>, vector<4x32xf32> -> vector<4x32xf32>
    %275 = vector.broadcast %4 : vector<1x32xf32> to vector<4x32xf32>
    %276 = arith.addf %274, %275 : vector<4x32xf32>
    %277 = arith.mulf %182, %276 : vector<4x32xf32>
    %278 = arith.addf %260, %277 : vector<4x32xf32>
    %279 = math.tanh %278 : vector<4x32xf32>
    %280 = arith.addf %267, %273 : vector<4x32xf32>
    %cst_75 = arith.constant 2.000000e+00 : f32
    %281 = vector.broadcast %cst_75 : f32 to vector<4x32xf32>
    %282 = arith.mulf %281, %280 : vector<4x32xf32>
    %283 = arith.addf %261, %282 : vector<4x32xf32>
    %284 = arith.addf %283, %279 : vector<4x32xf32>
    %285 = arith.addf %250, %284 : vector<4x32xf32>
    %cst_76 = arith.constant dense<0.000000e+00> : vector<4x32xf32>
    %286 = tpu.matmul %285, %5, %cst_76 {dimension_numbers = #tpu.dot_dimension_numbers<[1], [0], [0], [1], [0, 0, 1, 1], [], []>} : vector<4x32xf32>, vector<32x32xf32>, vector<4x32xf32> -> vector<4x32xf32>
    %287 = vector.broadcast %8 : vector<1x32xf32> to vector<4x32xf32>
    %288 = arith.addf %286, %287 : vector<4x32xf32>
    %289 = arith.mulf %186, %288 : vector<4x32xf32>
    %290 = arith.addf %175, %289 : vector<4x32xf32>
    %291 = arith.index_cast %c1_i32 : i32 to index
    %c0_77 = arith.constant 0 : index
    %c0_78 = arith.constant 0 : index
    %292 = vector.load %arg9[%291, %c0_77, %c0_78] : memref<8x4x32xf32, #tpu.memory_space<vmem>>, vector<1x4x32xf32>
    %293 = vector.shape_cast %292 : vector<1x4x32xf32> to vector<4x32xf32>
    %294 = vector.shape_cast %290 : vector<4x32xf32> to vector<1x4x32xf32>
    tpu.vector_store %arg9[%291, %c0_77, %c0_78], %294 {strides = array<i32>} : memref<8x4x32xf32, #tpu.memory_space<vmem>>, vector<1x4x32xf32>,
    %c2_i32 = arith.constant 2 : i32
    %295 = arith.index_cast %c2_i32 : i32 to index
    %c0_79 = arith.constant 0 : index
    %c0_80 = arith.constant 0 : index
    %296 = vector.load %arg0[%295, %c0_79, %c0_80] : memref<8x4x128xf32, #tpu.memory_space<vmem>>, vector<1x4x128xf32>
    %297 = vector.shape_cast %296 : vector<1x4x128xf32> to vector<4x128xf32>
    %cst_81 = arith.constant dense<0.000000e+00> : vector<4x128xf32>
    %298 = tpu.matmul %290, %0, %cst_81 {dimension_numbers = #tpu.dot_dimension_numbers<[1], [0], [0], [1], [0, 0, 1, 1], [], []>} : vector<4x32xf32>, vector<32x128xf32>, vector<4x128xf32> -> vector<4x128xf32>
    %299 = arith.addf %297, %298 : vector<4x128xf32>
    %300 = arith.negf %299 : vector<4x128xf32>
    %301 = math.exp %300 : vector<4x128xf32>
    %cst_82 = arith.constant 1.000000e+00 : f32
    %302 = vector.broadcast %cst_82 : f32 to vector<4x128xf32>
    %303 = arith.addf %302, %301 : vector<4x128xf32>
    %304 = arith.divf %302, %303 : vector<4x128xf32>
    %305 = vector.extract_strided_slice %304 {offsets = [0, 0], sizes = [4, 32], strides = [1, 1]} : vector<4x128xf32> to vector<4x32xf32>
    %306 = vector.extract_strided_slice %304 {offsets = [0, 32], sizes = [4, 32], strides = [1, 1]} : vector<4x128xf32> to vector<4x32xf32>
    %307 = vector.extract_strided_slice %304 {offsets = [0, 64], sizes = [4, 32], strides = [1, 1]} : vector<4x128xf32> to vector<4x32xf32>
    %cst_83 = arith.constant 2.000000e+00 : f32
    %308 = vector.broadcast %cst_83 : f32 to vector<4x32xf32>
    %309 = arith.mulf %308, %307 : vector<4x32xf32>
    %cst_84 = arith.constant 1.000000e+00 : f32
    %310 = vector.broadcast %cst_84 : f32 to vector<4x32xf32>
    %311 = arith.subf %309, %310 : vector<4x32xf32>
    %312 = vector.extract_strided_slice %304 {offsets = [0, 96], sizes = [4, 32], strides = [1, 1]} : vector<4x128xf32> to vector<4x32xf32>
    %313 = arith.mulf %306, %173 : vector<4x32xf32>
    %314 = arith.mulf %305, %311 : vector<4x32xf32>
    %315 = arith.addf %313, %314 : vector<4x32xf32>
    %316 = math.tanh %315 : vector<4x32xf32>
    %317 = arith.mulf %312, %316 : vector<4x32xf32>
    %318 = arith.index_cast %c2_i32 : i32 to index
    %c0_85 = arith.constant 0 : index
    %c0_86 = arith.constant 0 : index
    %319 = vector.load %arg1[%318, %c0_85, %c0_86] : memref<8x4x1xf32, #tpu.memory_space<vmem>>, vector<1x4x1xf32>
    %320 = vector.shape_cast %319 : vector<1x4x1xf32> to vector<4x1xf32>
    %cst_87 = arith.constant 0.333333343 : f32
    %321 = vector.broadcast %cst_87 : f32 to vector<4x1xf32>
    %322 = arith.mulf %320, %321 : vector<4x1xf32>
    %323 = vector.shape_cast %322 : vector<4x1xf32> to vector<4x1xf32>
    %324 = vector.broadcast %323 : vector<4x1xf32> to vector<4x32xf32>
    %cst_88 = arith.constant 5.000000e-01 : f32
    %325 = vector.broadcast %cst_88 : f32 to vector<4x32xf32>
    %326 = arith.mulf %324, %325 : vector<4x32xf32>
    %cst_89 = arith.constant 0.166666672 : f32
    %327 = vector.broadcast %cst_89 : f32 to vector<4x32xf32>
    %328 = arith.mulf %324, %327 : vector<4x32xf32>
    %cst_90 = arith.constant dense<0.000000e+00> : vector<4x32xf32>
    %329 = tpu.matmul %317, %1, %cst_90 {dimension_numbers = #tpu.dot_dimension_numbers<[1], [0], [0], [1], [0, 0, 1, 1], [], []>} : vector<4x32xf32>, vector<32x32xf32>, vector<4x32xf32> -> vector<4x32xf32>
    %330 = vector.broadcast %2 : vector<1x32xf32> to vector<4x32xf32>
    %331 = arith.addf %329, %330 : vector<4x32xf32>
    %cst_91 = arith.constant 0.000000e+00 : f32
    %332 = vector.broadcast %cst_91 : f32 to vector<4x32xf32>
    %333 = math.tanh %331 : vector<4x32xf32>
    %cst_92 = arith.constant dense<0.000000e+00> : vector<4x32xf32>
    %334 = tpu.matmul %333, %3, %cst_92 {dimension_numbers = #tpu.dot_dimension_numbers<[1], [0], [0], [1], [0, 0, 1, 1], [], []>} : vector<4x32xf32>, vector<32x32xf32>, vector<4x32xf32> -> vector<4x32xf32>
    %335 = vector.broadcast %4 : vector<1x32xf32> to vector<4x32xf32>
    %336 = arith.addf %334, %335 : vector<4x32xf32>
    %337 = arith.mulf %326, %336 : vector<4x32xf32>
    %338 = arith.addf %331, %337 : vector<4x32xf32>
    %339 = math.tanh %338 : vector<4x32xf32>
    %cst_93 = arith.constant dense<0.000000e+00> : vector<4x32xf32>
    %340 = tpu.matmul %339, %3, %cst_93 {dimension_numbers = #tpu.dot_dimension_numbers<[1], [0], [0], [1], [0, 0, 1, 1], [], []>} : vector<4x32xf32>, vector<32x32xf32>, vector<4x32xf32> -> vector<4x32xf32>
    %341 = vector.broadcast %4 : vector<1x32xf32> to vector<4x32xf32>
    %342 = arith.addf %340, %341 : vector<4x32xf32>
    %343 = arith.mulf %326, %342 : vector<4x32xf32>
    %344 = arith.addf %331, %343 : vector<4x32xf32>
    %345 = math.tanh %344 : vector<4x32xf32>
    %cst_94 = arith.constant dense<0.000000e+00> : vector<4x32xf32>
    %346 = tpu.matmul %345, %3, %cst_94 {dimension_numbers = #tpu.dot_dimension_numbers<[1], [0], [0], [1], [0, 0, 1, 1], [], []>} : vector<4x32xf32>, vector<32x32xf32>, vector<4x32xf32> -> vector<4x32xf32>
    %347 = vector.broadcast %4 : vector<1x32xf32> to vector<4x32xf32>
    %348 = arith.addf %346, %347 : vector<4x32xf32>
    %349 = arith.mulf %324, %348 : vector<4x32xf32>
    %350 = arith.addf %331, %349 : vector<4x32xf32>
    %351 = math.tanh %350 : vector<4x32xf32>
    %352 = arith.addf %339, %345 : vector<4x32xf32>
    %cst_95 = arith.constant 2.000000e+00 : f32
    %353 = vector.broadcast %cst_95 : f32 to vector<4x32xf32>
    %354 = arith.mulf %353, %352 : vector<4x32xf32>
    %355 = arith.addf %333, %354 : vector<4x32xf32>
    %356 = arith.addf %355, %351 : vector<4x32xf32>
    %357 = arith.addf %332, %356 : vector<4x32xf32>
    %cst_96 = arith.constant dense<0.000000e+00> : vector<4x32xf32>
    %358 = tpu.matmul %351, %3, %cst_96 {dimension_numbers = #tpu.dot_dimension_numbers<[1], [0], [0], [1], [0, 0, 1, 1], [], []>} : vector<4x32xf32>, vector<32x32xf32>, vector<4x32xf32> -> vector<4x32xf32>
    %359 = vector.broadcast %4 : vector<1x32xf32> to vector<4x32xf32>
    %360 = arith.addf %358, %359 : vector<4x32xf32>
    %361 = arith.addf %342, %348 : vector<4x32xf32>
    %cst_97 = arith.constant 2.000000e+00 : f32
    %362 = vector.broadcast %cst_97 : f32 to vector<4x32xf32>
    %363 = arith.mulf %362, %361 : vector<4x32xf32>
    %364 = arith.addf %336, %363 : vector<4x32xf32>
    %365 = arith.addf %364, %360 : vector<4x32xf32>
    %366 = arith.mulf %328, %365 : vector<4x32xf32>
    %367 = arith.addf %331, %366 : vector<4x32xf32>
    %368 = math.tanh %367 : vector<4x32xf32>
    %cst_98 = arith.constant dense<0.000000e+00> : vector<4x32xf32>
    %369 = tpu.matmul %368, %3, %cst_98 {dimension_numbers = #tpu.dot_dimension_numbers<[1], [0], [0], [1], [0, 0, 1, 1], [], []>} : vector<4x32xf32>, vector<32x32xf32>, vector<4x32xf32> -> vector<4x32xf32>
    %370 = vector.broadcast %4 : vector<1x32xf32> to vector<4x32xf32>
    %371 = arith.addf %369, %370 : vector<4x32xf32>
    %372 = arith.mulf %326, %371 : vector<4x32xf32>
    %373 = arith.addf %367, %372 : vector<4x32xf32>
    %374 = math.tanh %373 : vector<4x32xf32>
    %cst_99 = arith.constant dense<0.000000e+00> : vector<4x32xf32>
    %375 = tpu.matmul %374, %3, %cst_99 {dimension_numbers = #tpu.dot_dimension_numbers<[1], [0], [0], [1], [0, 0, 1, 1], [], []>} : vector<4x32xf32>, vector<32x32xf32>, vector<4x32xf32> -> vector<4x32xf32>
    %376 = vector.broadcast %4 : vector<1x32xf32> to vector<4x32xf32>
    %377 = arith.addf %375, %376 : vector<4x32xf32>
    %378 = arith.mulf %326, %377 : vector<4x32xf32>
    %379 = arith.addf %367, %378 : vector<4x32xf32>
    %380 = math.tanh %379 : vector<4x32xf32>
    %cst_100 = arith.constant dense<0.000000e+00> : vector<4x32xf32>
    %381 = tpu.matmul %380, %3, %cst_100 {dimension_numbers = #tpu.dot_dimension_numbers<[1], [0], [0], [1], [0, 0, 1, 1], [], []>} : vector<4x32xf32>, vector<32x32xf32>, vector<4x32xf32> -> vector<4x32xf32>
    %382 = vector.broadcast %4 : vector<1x32xf32> to vector<4x32xf32>
    %383 = arith.addf %381, %382 : vector<4x32xf32>
    %384 = arith.mulf %324, %383 : vector<4x32xf32>
    %385 = arith.addf %367, %384 : vector<4x32xf32>
    %386 = math.tanh %385 : vector<4x32xf32>
    %387 = arith.addf %374, %380 : vector<4x32xf32>
    %cst_101 = arith.constant 2.000000e+00 : f32
    %388 = vector.broadcast %cst_101 : f32 to vector<4x32xf32>
    %389 = arith.mulf %388, %387 : vector<4x32xf32>
    %390 = arith.addf %368, %389 : vector<4x32xf32>
    %391 = arith.addf %390, %386 : vector<4x32xf32>
    %392 = arith.addf %357, %391 : vector<4x32xf32>
    %cst_102 = arith.constant dense<0.000000e+00> : vector<4x32xf32>
    %393 = tpu.matmul %386, %3, %cst_102 {dimension_numbers = #tpu.dot_dimension_numbers<[1], [0], [0], [1], [0, 0, 1, 1], [], []>} : vector<4x32xf32>, vector<32x32xf32>, vector<4x32xf32> -> vector<4x32xf32>
    %394 = vector.broadcast %4 : vector<1x32xf32> to vector<4x32xf32>
    %395 = arith.addf %393, %394 : vector<4x32xf32>
    %396 = arith.addf %377, %383 : vector<4x32xf32>
    %cst_103 = arith.constant 2.000000e+00 : f32
    %397 = vector.broadcast %cst_103 : f32 to vector<4x32xf32>
    %398 = arith.mulf %397, %396 : vector<4x32xf32>
    %399 = arith.addf %371, %398 : vector<4x32xf32>
    %400 = arith.addf %399, %395 : vector<4x32xf32>
    %401 = arith.mulf %328, %400 : vector<4x32xf32>
    %402 = arith.addf %367, %401 : vector<4x32xf32>
    %403 = math.tanh %402 : vector<4x32xf32>
    %cst_104 = arith.constant dense<0.000000e+00> : vector<4x32xf32>
    %404 = tpu.matmul %403, %3, %cst_104 {dimension_numbers = #tpu.dot_dimension_numbers<[1], [0], [0], [1], [0, 0, 1, 1], [], []>} : vector<4x32xf32>, vector<32x32xf32>, vector<4x32xf32> -> vector<4x32xf32>
    %405 = vector.broadcast %4 : vector<1x32xf32> to vector<4x32xf32>
    %406 = arith.addf %404, %405 : vector<4x32xf32>
    %407 = arith.mulf %326, %406 : vector<4x32xf32>
    %408 = arith.addf %402, %407 : vector<4x32xf32>
    %409 = math.tanh %408 : vector<4x32xf32>
    %cst_105 = arith.constant dense<0.000000e+00> : vector<4x32xf32>
    %410 = tpu.matmul %409, %3, %cst_105 {dimension_numbers = #tpu.dot_dimension_numbers<[1], [0], [0], [1], [0, 0, 1, 1], [], []>} : vector<4x32xf32>, vector<32x32xf32>, vector<4x32xf32> -> vector<4x32xf32>
    %411 = vector.broadcast %4 : vector<1x32xf32> to vector<4x32xf32>
    %412 = arith.addf %410, %411 : vector<4x32xf32>
    %413 = arith.mulf %326, %412 : vector<4x32xf32>
    %414 = arith.addf %402, %413 : vector<4x32xf32>
    %415 = math.tanh %414 : vector<4x32xf32>
    %cst_106 = arith.constant dense<0.000000e+00> : vector<4x32xf32>
    %416 = tpu.matmul %415, %3, %cst_106 {dimension_numbers = #tpu.dot_dimension_numbers<[1], [0], [0], [1], [0, 0, 1, 1], [], []>} : vector<4x32xf32>, vector<32x32xf32>, vector<4x32xf32> -> vector<4x32xf32>
    %417 = vector.broadcast %4 : vector<1x32xf32> to vector<4x32xf32>
    %418 = arith.addf %416, %417 : vector<4x32xf32>
    %419 = arith.mulf %324, %418 : vector<4x32xf32>
    %420 = arith.addf %402, %419 : vector<4x32xf32>
    %421 = math.tanh %420 : vector<4x32xf32>
    %422 = arith.addf %409, %415 : vector<4x32xf32>
    %cst_107 = arith.constant 2.000000e+00 : f32
    %423 = vector.broadcast %cst_107 : f32 to vector<4x32xf32>
    %424 = arith.mulf %423, %422 : vector<4x32xf32>
    %425 = arith.addf %403, %424 : vector<4x32xf32>
    %426 = arith.addf %425, %421 : vector<4x32xf32>
    %427 = arith.addf %392, %426 : vector<4x32xf32>
    %cst_108 = arith.constant dense<0.000000e+00> : vector<4x32xf32>
    %428 = tpu.matmul %427, %5, %cst_108 {dimension_numbers = #tpu.dot_dimension_numbers<[1], [0], [0], [1], [0, 0, 1, 1], [], []>} : vector<4x32xf32>, vector<32x32xf32>, vector<4x32xf32> -> vector<4x32xf32>
    %429 = vector.broadcast %8 : vector<1x32xf32> to vector<4x32xf32>
    %430 = arith.addf %428, %429 : vector<4x32xf32>
    %431 = arith.mulf %328, %430 : vector<4x32xf32>
    %432 = arith.addf %317, %431 : vector<4x32xf32>
    %433 = arith.index_cast %c2_i32 : i32 to index
    %c0_109 = arith.constant 0 : index
    %c0_110 = arith.constant 0 : index
    %434 = vector.load %arg9[%433, %c0_109, %c0_110] : memref<8x4x32xf32, #tpu.memory_space<vmem>>, vector<1x4x32xf32>
    %435 = vector.shape_cast %434 : vector<1x4x32xf32> to vector<4x32xf32>
    %436 = vector.shape_cast %432 : vector<4x32xf32> to vector<1x4x32xf32>
    tpu.vector_store %arg9[%433, %c0_109, %c0_110], %436 {strides = array<i32>} : memref<8x4x32xf32, #tpu.memory_space<vmem>>, vector<1x4x32xf32>,
    %c3_i32 = arith.constant 3 : i32
    %437 = arith.index_cast %c3_i32 : i32 to index
    %c0_111 = arith.constant 0 : index
    %c0_112 = arith.constant 0 : index
    %438 = vector.load %arg0[%437, %c0_111, %c0_112] : memref<8x4x128xf32, #tpu.memory_space<vmem>>, vector<1x4x128xf32>
    %439 = vector.shape_cast %438 : vector<1x4x128xf32> to vector<4x128xf32>
    %cst_113 = arith.constant dense<0.000000e+00> : vector<4x128xf32>
    %440 = tpu.matmul %432, %0, %cst_113 {dimension_numbers = #tpu.dot_dimension_numbers<[1], [0], [0], [1], [0, 0, 1, 1], [], []>} : vector<4x32xf32>, vector<32x128xf32>, vector<4x128xf32> -> vector<4x128xf32>
    %441 = arith.addf %439, %440 : vector<4x128xf32>
    %442 = arith.negf %441 : vector<4x128xf32>
    %443 = math.exp %442 : vector<4x128xf32>
    %cst_114 = arith.constant 1.000000e+00 : f32
    %444 = vector.broadcast %cst_114 : f32 to vector<4x128xf32>
    %445 = arith.addf %444, %443 : vector<4x128xf32>
    %446 = arith.divf %444, %445 : vector<4x128xf32>
    %447 = vector.extract_strided_slice %446 {offsets = [0, 0], sizes = [4, 32], strides = [1, 1]} : vector<4x128xf32> to vector<4x32xf32>
    %448 = vector.extract_strided_slice %446 {offsets = [0, 32], sizes = [4, 32], strides = [1, 1]} : vector<4x128xf32> to vector<4x32xf32>
    %449 = vector.extract_strided_slice %446 {offsets = [0, 64], sizes = [4, 32], strides = [1, 1]} : vector<4x128xf32> to vector<4x32xf32>
    %cst_115 = arith.constant 2.000000e+00 : f32
    %450 = vector.broadcast %cst_115 : f32 to vector<4x32xf32>
    %451 = arith.mulf %450, %449 : vector<4x32xf32>
    %cst_116 = arith.constant 1.000000e+00 : f32
    %452 = vector.broadcast %cst_116 : f32 to vector<4x32xf32>
    %453 = arith.subf %451, %452 : vector<4x32xf32>
    %454 = vector.extract_strided_slice %446 {offsets = [0, 96], sizes = [4, 32], strides = [1, 1]} : vector<4x128xf32> to vector<4x32xf32>
    %455 = arith.mulf %448, %315 : vector<4x32xf32>
    %456 = arith.mulf %447, %453 : vector<4x32xf32>
    %457 = arith.addf %455, %456 : vector<4x32xf32>
    %458 = math.tanh %457 : vector<4x32xf32>
    %459 = arith.mulf %454, %458 : vector<4x32xf32>
    %460 = arith.index_cast %c3_i32 : i32 to index
    %c0_117 = arith.constant 0 : index
    %c0_118 = arith.constant 0 : index
    %461 = vector.load %arg1[%460, %c0_117, %c0_118] : memref<8x4x1xf32, #tpu.memory_space<vmem>>, vector<1x4x1xf32>
    %462 = vector.shape_cast %461 : vector<1x4x1xf32> to vector<4x1xf32>
    %cst_119 = arith.constant 0.333333343 : f32
    %463 = vector.broadcast %cst_119 : f32 to vector<4x1xf32>
    %464 = arith.mulf %462, %463 : vector<4x1xf32>
    %465 = vector.shape_cast %464 : vector<4x1xf32> to vector<4x1xf32>
    %466 = vector.broadcast %465 : vector<4x1xf32> to vector<4x32xf32>
    %cst_120 = arith.constant 5.000000e-01 : f32
    %467 = vector.broadcast %cst_120 : f32 to vector<4x32xf32>
    %468 = arith.mulf %466, %467 : vector<4x32xf32>
    %cst_121 = arith.constant 0.166666672 : f32
    %469 = vector.broadcast %cst_121 : f32 to vector<4x32xf32>
    %470 = arith.mulf %466, %469 : vector<4x32xf32>
    %cst_122 = arith.constant dense<0.000000e+00> : vector<4x32xf32>
    %471 = tpu.matmul %459, %1, %cst_122 {dimension_numbers = #tpu.dot_dimension_numbers<[1], [0], [0], [1], [0, 0, 1, 1], [], []>} : vector<4x32xf32>, vector<32x32xf32>, vector<4x32xf32> -> vector<4x32xf32>
    %472 = vector.broadcast %2 : vector<1x32xf32> to vector<4x32xf32>
    %473 = arith.addf %471, %472 : vector<4x32xf32>
    %cst_123 = arith.constant 0.000000e+00 : f32
    %474 = vector.broadcast %cst_123 : f32 to vector<4x32xf32>
    %475 = math.tanh %473 : vector<4x32xf32>
    %cst_124 = arith.constant dense<0.000000e+00> : vector<4x32xf32>
    %476 = tpu.matmul %475, %3, %cst_124 {dimension_numbers = #tpu.dot_dimension_numbers<[1], [0], [0], [1], [0, 0, 1, 1], [], []>} : vector<4x32xf32>, vector<32x32xf32>, vector<4x32xf32> -> vector<4x32xf32>
    %477 = vector.broadcast %4 : vector<1x32xf32> to vector<4x32xf32>
    %478 = arith.addf %476, %477 : vector<4x32xf32>
    %479 = arith.mulf %468, %478 : vector<4x32xf32>
    %480 = arith.addf %473, %479 : vector<4x32xf32>
    %481 = math.tanh %480 : vector<4x32xf32>
    %cst_125 = arith.constant dense<0.000000e+00> : vector<4x32xf32>
    %482 = tpu.matmul %481, %3, %cst_125 {dimension_numbers = #tpu.dot_dimension_numbers<[1], [0], [0], [1], [0, 0, 1, 1], [], []>} : vector<4x32xf32>, vector<32x32xf32>, vector<4x32xf32> -> vector<4x32xf32>
    %483 = vector.broadcast %4 : vector<1x32xf32> to vector<4x32xf32>
    %484 = arith.addf %482, %483 : vector<4x32xf32>
    %485 = arith.mulf %468, %484 : vector<4x32xf32>
    %486 = arith.addf %473, %485 : vector<4x32xf32>
    %487 = math.tanh %486 : vector<4x32xf32>
    %cst_126 = arith.constant dense<0.000000e+00> : vector<4x32xf32>
    %488 = tpu.matmul %487, %3, %cst_126 {dimension_numbers = #tpu.dot_dimension_numbers<[1], [0], [0], [1], [0, 0, 1, 1], [], []>} : vector<4x32xf32>, vector<32x32xf32>, vector<4x32xf32> -> vector<4x32xf32>
    %489 = vector.broadcast %4 : vector<1x32xf32> to vector<4x32xf32>
    %490 = arith.addf %488, %489 : vector<4x32xf32>
    %491 = arith.mulf %466, %490 : vector<4x32xf32>
    %492 = arith.addf %473, %491 : vector<4x32xf32>
    %493 = math.tanh %492 : vector<4x32xf32>
    %494 = arith.addf %481, %487 : vector<4x32xf32>
    %cst_127 = arith.constant 2.000000e+00 : f32
    %495 = vector.broadcast %cst_127 : f32 to vector<4x32xf32>
    %496 = arith.mulf %495, %494 : vector<4x32xf32>
    %497 = arith.addf %475, %496 : vector<4x32xf32>
    %498 = arith.addf %497, %493 : vector<4x32xf32>
    %499 = arith.addf %474, %498 : vector<4x32xf32>
    %cst_128 = arith.constant dense<0.000000e+00> : vector<4x32xf32>
    %500 = tpu.matmul %493, %3, %cst_128 {dimension_numbers = #tpu.dot_dimension_numbers<[1], [0], [0], [1], [0, 0, 1, 1], [], []>} : vector<4x32xf32>, vector<32x32xf32>, vector<4x32xf32> -> vector<4x32xf32>
    %501 = vector.broadcast %4 : vector<1x32xf32> to vector<4x32xf32>
    %502 = arith.addf %500, %501 : vector<4x32xf32>
    %503 = arith.addf %484, %490 : vector<4x32xf32>
    %cst_129 = arith.constant 2.000000e+00 : f32
    %504 = vector.broadcast %cst_129 : f32 to vector<4x32xf32>
    %505 = arith.mulf %504, %503 : vector<4x32xf32>
    %506 = arith.addf %478, %505 : vector<4x32xf32>
    %507 = arith.addf %506, %502 : vector<4x32xf32>
    %508 = arith.mulf %470, %507 : vector<4x32xf32>
    %509 = arith.addf %473, %508 : vector<4x32xf32>
    %510 = math.tanh %509 : vector<4x32xf32>
    %cst_130 = arith.constant dense<0.000000e+00> : vector<4x32xf32>
    %511 = tpu.matmul %510, %3, %cst_130 {dimension_numbers = #tpu.dot_dimension_numbers<[1], [0], [0], [1], [0, 0, 1, 1], [], []>} : vector<4x32xf32>, vector<32x32xf32>, vector<4x32xf32> -> vector<4x32xf32>
    %512 = vector.broadcast %4 : vector<1x32xf32> to vector<4x32xf32>
    %513 = arith.addf %511, %512 : vector<4x32xf32>
    %514 = arith.mulf %468, %513 : vector<4x32xf32>
    %515 = arith.addf %509, %514 : vector<4x32xf32>
    %516 = math.tanh %515 : vector<4x32xf32>
    %cst_131 = arith.constant dense<0.000000e+00> : vector<4x32xf32>
    %517 = tpu.matmul %516, %3, %cst_131 {dimension_numbers = #tpu.dot_dimension_numbers<[1], [0], [0], [1], [0, 0, 1, 1], [], []>} : vector<4x32xf32>, vector<32x32xf32>, vector<4x32xf32> -> vector<4x32xf32>
    %518 = vector.broadcast %4 : vector<1x32xf32> to vector<4x32xf32>
    %519 = arith.addf %517, %518 : vector<4x32xf32>
    %520 = arith.mulf %468, %519 : vector<4x32xf32>
    %521 = arith.addf %509, %520 : vector<4x32xf32>
    %522 = math.tanh %521 : vector<4x32xf32>
    %cst_132 = arith.constant dense<0.000000e+00> : vector<4x32xf32>
    %523 = tpu.matmul %522, %3, %cst_132 {dimension_numbers = #tpu.dot_dimension_numbers<[1], [0], [0], [1], [0, 0, 1, 1], [], []>} : vector<4x32xf32>, vector<32x32xf32>, vector<4x32xf32> -> vector<4x32xf32>
    %524 = vector.broadcast %4 : vector<1x32xf32> to vector<4x32xf32>
    %525 = arith.addf %523, %524 : vector<4x32xf32>
    %526 = arith.mulf %466, %525 : vector<4x32xf32>
    %527 = arith.addf %509, %526 : vector<4x32xf32>
    %528 = math.tanh %527 : vector<4x32xf32>
    %529 = arith.addf %516, %522 : vector<4x32xf32>
    %cst_133 = arith.constant 2.000000e+00 : f32
    %530 = vector.broadcast %cst_133 : f32 to vector<4x32xf32>
    %531 = arith.mulf %530, %529 : vector<4x32xf32>
    %532 = arith.addf %510, %531 : vector<4x32xf32>
    %533 = arith.addf %532, %528 : vector<4x32xf32>
    %534 = arith.addf %499, %533 : vector<4x32xf32>
    %cst_134 = arith.constant dense<0.000000e+00> : vector<4x32xf32>
    %535 = tpu.matmul %528, %3, %cst_134 {dimension_numbers = #tpu.dot_dimension_numbers<[1], [0], [0], [1], [0, 0, 1, 1], [], []>} : vector<4x32xf32>, vector<32x32xf32>, vector<4x32xf32> -> vector<4x32xf32>
    %536 = vector.broadcast %4 : vector<1x32xf32> to vector<4x32xf32>
    %537 = arith.addf %535, %536 : vector<4x32xf32>
    %538 = arith.addf %519, %525 : vector<4x32xf32>
    %cst_135 = arith.constant 2.000000e+00 : f32
    %539 = vector.broadcast %cst_135 : f32 to vector<4x32xf32>
    %540 = arith.mulf %539, %538 : vector<4x32xf32>
    %541 = arith.addf %513, %540 : vector<4x32xf32>
    %542 = arith.addf %541, %537 : vector<4x32xf32>
    %543 = arith.mulf %470, %542 : vector<4x32xf32>
    %544 = arith.addf %509, %543 : vector<4x32xf32>
    %545 = math.tanh %544 : vector<4x32xf32>
    %cst_136 = arith.constant dense<0.000000e+00> : vector<4x32xf32>
    %546 = tpu.matmul %545, %3, %cst_136 {dimension_numbers = #tpu.dot_dimension_numbers<[1], [0], [0], [1], [0, 0, 1, 1], [], []>} : vector<4x32xf32>, vector<32x32xf32>, vector<4x32xf32> -> vector<4x32xf32>
    %547 = vector.broadcast %4 : vector<1x32xf32> to vector<4x32xf32>
    %548 = arith.addf %546, %547 : vector<4x32xf32>
    %549 = arith.mulf %468, %548 : vector<4x32xf32>
    %550 = arith.addf %544, %549 : vector<4x32xf32>
    %551 = math.tanh %550 : vector<4x32xf32>
    %cst_137 = arith.constant dense<0.000000e+00> : vector<4x32xf32>
    %552 = tpu.matmul %551, %3, %cst_137 {dimension_numbers = #tpu.dot_dimension_numbers<[1], [0], [0], [1], [0, 0, 1, 1], [], []>} : vector<4x32xf32>, vector<32x32xf32>, vector<4x32xf32> -> vector<4x32xf32>
    %553 = vector.broadcast %4 : vector<1x32xf32> to vector<4x32xf32>
    %554 = arith.addf %552, %553 : vector<4x32xf32>
    %555 = arith.mulf %468, %554 : vector<4x32xf32>
    %556 = arith.addf %544, %555 : vector<4x32xf32>
    %557 = math.tanh %556 : vector<4x32xf32>
    %cst_138 = arith.constant dense<0.000000e+00> : vector<4x32xf32>
    %558 = tpu.matmul %557, %3, %cst_138 {dimension_numbers = #tpu.dot_dimension_numbers<[1], [0], [0], [1], [0, 0, 1, 1], [], []>} : vector<4x32xf32>, vector<32x32xf32>, vector<4x32xf32> -> vector<4x32xf32>
    %559 = vector.broadcast %4 : vector<1x32xf32> to vector<4x32xf32>
    %560 = arith.addf %558, %559 : vector<4x32xf32>
    %561 = arith.mulf %466, %560 : vector<4x32xf32>
    %562 = arith.addf %544, %561 : vector<4x32xf32>
    %563 = math.tanh %562 : vector<4x32xf32>
    %564 = arith.addf %551, %557 : vector<4x32xf32>
    %cst_139 = arith.constant 2.000000e+00 : f32
    %565 = vector.broadcast %cst_139 : f32 to vector<4x32xf32>
    %566 = arith.mulf %565, %564 : vector<4x32xf32>
    %567 = arith.addf %545, %566 : vector<4x32xf32>
    %568 = arith.addf %567, %563 : vector<4x32xf32>
    %569 = arith.addf %534, %568 : vector<4x32xf32>
    %cst_140 = arith.constant dense<0.000000e+00> : vector<4x32xf32>
    %570 = tpu.matmul %569, %5, %cst_140 {dimension_numbers = #tpu.dot_dimension_numbers<[1], [0], [0], [1], [0, 0, 1, 1], [], []>} : vector<4x32xf32>, vector<32x32xf32>, vector<4x32xf32> -> vector<4x32xf32>
    %571 = vector.broadcast %8 : vector<1x32xf32> to vector<4x32xf32>
    %572 = arith.addf %570, %571 : vector<4x32xf32>
    %573 = arith.mulf %470, %572 : vector<4x32xf32>
    %574 = arith.addf %459, %573 : vector<4x32xf32>
    %575 = arith.index_cast %c3_i32 : i32 to index
    %c0_141 = arith.constant 0 : index
    %c0_142 = arith.constant 0 : index
    %576 = vector.load %arg9[%575, %c0_141, %c0_142] : memref<8x4x32xf32, #tpu.memory_space<vmem>>, vector<1x4x32xf32>
    %577 = vector.shape_cast %576 : vector<1x4x32xf32> to vector<4x32xf32>
    %578 = vector.shape_cast %574 : vector<4x32xf32> to vector<1x4x32xf32>
    tpu.vector_store %arg9[%575, %c0_141, %c0_142], %578 {strides = array<i32>} : memref<8x4x32xf32, #tpu.memory_space<vmem>>, vector<1x4x32xf32>,
    %c4_i32 = arith.constant 4 : i32
    %579 = arith.index_cast %c4_i32 : i32 to index
    %c0_143 = arith.constant 0 : index
    %c0_144 = arith.constant 0 : index
    %580 = vector.load %arg0[%579, %c0_143, %c0_144] : memref<8x4x128xf32, #tpu.memory_space<vmem>>, vector<1x4x128xf32>
    %581 = vector.shape_cast %580 : vector<1x4x128xf32> to vector<4x128xf32>
    %cst_145 = arith.constant dense<0.000000e+00> : vector<4x128xf32>
    %582 = tpu.matmul %574, %0, %cst_145 {dimension_numbers = #tpu.dot_dimension_numbers<[1], [0], [0], [1], [0, 0, 1, 1], [], []>} : vector<4x32xf32>, vector<32x128xf32>, vector<4x128xf32> -> vector<4x128xf32>
    %583 = arith.addf %581, %582 : vector<4x128xf32>
    %584 = arith.negf %583 : vector<4x128xf32>
    %585 = math.exp %584 : vector<4x128xf32>
    %cst_146 = arith.constant 1.000000e+00 : f32
    %586 = vector.broadcast %cst_146 : f32 to vector<4x128xf32>
    %587 = arith.addf %586, %585 : vector<4x128xf32>
    %588 = arith.divf %586, %587 : vector<4x128xf32>
    %589 = vector.extract_strided_slice %588 {offsets = [0, 0], sizes = [4, 32], strides = [1, 1]} : vector<4x128xf32> to vector<4x32xf32>
    %590 = vector.extract_strided_slice %588 {offsets = [0, 32], sizes = [4, 32], strides = [1, 1]} : vector<4x128xf32> to vector<4x32xf32>
    %591 = vector.extract_strided_slice %588 {offsets = [0, 64], sizes = [4, 32], strides = [1, 1]} : vector<4x128xf32> to vector<4x32xf32>
    %cst_147 = arith.constant 2.000000e+00 : f32
    %592 = vector.broadcast %cst_147 : f32 to vector<4x32xf32>
    %593 = arith.mulf %592, %591 : vector<4x32xf32>
    %cst_148 = arith.constant 1.000000e+00 : f32
    %594 = vector.broadcast %cst_148 : f32 to vector<4x32xf32>
    %595 = arith.subf %593, %594 : vector<4x32xf32>
    %596 = vector.extract_strided_slice %588 {offsets = [0, 96], sizes = [4, 32], strides = [1, 1]} : vector<4x128xf32> to vector<4x32xf32>
    %597 = arith.mulf %590, %457 : vector<4x32xf32>
    %598 = arith.mulf %589, %595 : vector<4x32xf32>
    %599 = arith.addf %597, %598 : vector<4x32xf32>
    %600 = math.tanh %599 : vector<4x32xf32>
    %601 = arith.mulf %596, %600 : vector<4x32xf32>
    %602 = arith.index_cast %c4_i32 : i32 to index
    %c0_149 = arith.constant 0 : index
    %c0_150 = arith.constant 0 : index
    %603 = vector.load %arg1[%602, %c0_149, %c0_150] : memref<8x4x1xf32, #tpu.memory_space<vmem>>, vector<1x4x1xf32>
    %604 = vector.shape_cast %603 : vector<1x4x1xf32> to vector<4x1xf32>
    %cst_151 = arith.constant 0.333333343 : f32
    %605 = vector.broadcast %cst_151 : f32 to vector<4x1xf32>
    %606 = arith.mulf %604, %605 : vector<4x1xf32>
    %607 = vector.shape_cast %606 : vector<4x1xf32> to vector<4x1xf32>
    %608 = vector.broadcast %607 : vector<4x1xf32> to vector<4x32xf32>
    %cst_152 = arith.constant 5.000000e-01 : f32
    %609 = vector.broadcast %cst_152 : f32 to vector<4x32xf32>
    %610 = arith.mulf %608, %609 : vector<4x32xf32>
    %cst_153 = arith.constant 0.166666672 : f32
    %611 = vector.broadcast %cst_153 : f32 to vector<4x32xf32>
    %612 = arith.mulf %608, %611 : vector<4x32xf32>
    %cst_154 = arith.constant dense<0.000000e+00> : vector<4x32xf32>
    %613 = tpu.matmul %601, %1, %cst_154 {dimension_numbers = #tpu.dot_dimension_numbers<[1], [0], [0], [1], [0, 0, 1, 1], [], []>} : vector<4x32xf32>, vector<32x32xf32>, vector<4x32xf32> -> vector<4x32xf32>
    %614 = vector.broadcast %2 : vector<1x32xf32> to vector<4x32xf32>
    %615 = arith.addf %613, %614 : vector<4x32xf32>
    %cst_155 = arith.constant 0.000000e+00 : f32
    %616 = vector.broadcast %cst_155 : f32 to vector<4x32xf32>
    %617 = math.tanh %615 : vector<4x32xf32>
    %cst_156 = arith.constant dense<0.000000e+00> : vector<4x32xf32>
    %618 = tpu.matmul %617, %3, %cst_156 {dimension_numbers = #tpu.dot_dimension_numbers<[1], [0], [0], [1], [0, 0, 1, 1], [], []>} : vector<4x32xf32>, vector<32x32xf32>, vector<4x32xf32> -> vector<4x32xf32>
    %619 = vector.broadcast %4 : vector<1x32xf32> to vector<4x32xf32>
    %620 = arith.addf %618, %619 : vector<4x32xf32>
    %621 = arith.mulf %610, %620 : vector<4x32xf32>
    %622 = arith.addf %615, %621 : vector<4x32xf32>
    %623 = math.tanh %622 : vector<4x32xf32>
    %cst_157 = arith.constant dense<0.000000e+00> : vector<4x32xf32>
    %624 = tpu.matmul %623, %3, %cst_157 {dimension_numbers = #tpu.dot_dimension_numbers<[1], [0], [0], [1], [0, 0, 1, 1], [], []>} : vector<4x32xf32>, vector<32x32xf32>, vector<4x32xf32> -> vector<4x32xf32>
    %625 = vector.broadcast %4 : vector<1x32xf32> to vector<4x32xf32>
    %626 = arith.addf %624, %625 : vector<4x32xf32>
    %627 = arith.mulf %610, %626 : vector<4x32xf32>
    %628 = arith.addf %615, %627 : vector<4x32xf32>
    %629 = math.tanh %628 : vector<4x32xf32>
    %cst_158 = arith.constant dense<0.000000e+00> : vector<4x32xf32>
    %630 = tpu.matmul %629, %3, %cst_158 {dimension_numbers = #tpu.dot_dimension_numbers<[1], [0], [0], [1], [0, 0, 1, 1], [], []>} : vector<4x32xf32>, vector<32x32xf32>, vector<4x32xf32> -> vector<4x32xf32>
    %631 = vector.broadcast %4 : vector<1x32xf32> to vector<4x32xf32>
    %632 = arith.addf %630, %631 : vector<4x32xf32>
    %633 = arith.mulf %608, %632 : vector<4x32xf32>
    %634 = arith.addf %615, %633 : vector<4x32xf32>
    %635 = math.tanh %634 : vector<4x32xf32>
    %636 = arith.addf %623, %629 : vector<4x32xf32>
    %cst_159 = arith.constant 2.000000e+00 : f32
    %637 = vector.broadcast %cst_159 : f32 to vector<4x32xf32>
    %638 = arith.mulf %637, %636 : vector<4x32xf32>
    %639 = arith.addf %617, %638 : vector<4x32xf32>
    %640 = arith.addf %639, %635 : vector<4x32xf32>
    %641 = arith.addf %616, %640 : vector<4x32xf32>
    %cst_160 = arith.constant dense<0.000000e+00> : vector<4x32xf32>
    %642 = tpu.matmul %635, %3, %cst_160 {dimension_numbers = #tpu.dot_dimension_numbers<[1], [0], [0], [1], [0, 0, 1, 1], [], []>} : vector<4x32xf32>, vector<32x32xf32>, vector<4x32xf32> -> vector<4x32xf32>
    %643 = vector.broadcast %4 : vector<1x32xf32> to vector<4x32xf32>
    %644 = arith.addf %642, %643 : vector<4x32xf32>
    %645 = arith.addf %626, %632 : vector<4x32xf32>
    %cst_161 = arith.constant 2.000000e+00 : f32
    %646 = vector.broadcast %cst_161 : f32 to vector<4x32xf32>
    %647 = arith.mulf %646, %645 : vector<4x32xf32>
    %648 = arith.addf %620, %647 : vector<4x32xf32>
    %649 = arith.addf %648, %644 : vector<4x32xf32>
    %650 = arith.mulf %612, %649 : vector<4x32xf32>
    %651 = arith.addf %615, %650 : vector<4x32xf32>
    %652 = math.tanh %651 : vector<4x32xf32>
    %cst_162 = arith.constant dense<0.000000e+00> : vector<4x32xf32>
    %653 = tpu.matmul %652, %3, %cst_162 {dimension_numbers = #tpu.dot_dimension_numbers<[1], [0], [0], [1], [0, 0, 1, 1], [], []>} : vector<4x32xf32>, vector<32x32xf32>, vector<4x32xf32> -> vector<4x32xf32>
    %654 = vector.broadcast %4 : vector<1x32xf32> to vector<4x32xf32>
    %655 = arith.addf %653, %654 : vector<4x32xf32>
    %656 = arith.mulf %610, %655 : vector<4x32xf32>
    %657 = arith.addf %651, %656 : vector<4x32xf32>
    %658 = math.tanh %657 : vector<4x32xf32>
    %cst_163 = arith.constant dense<0.000000e+00> : vector<4x32xf32>
    %659 = tpu.matmul %658, %3, %cst_163 {dimension_numbers = #tpu.dot_dimension_numbers<[1], [0], [0], [1], [0, 0, 1, 1], [], []>} : vector<4x32xf32>, vector<32x32xf32>, vector<4x32xf32> -> vector<4x32xf32>
    %660 = vector.broadcast %4 : vector<1x32xf32> to vector<4x32xf32>
    %661 = arith.addf %659, %660 : vector<4x32xf32>
    %662 = arith.mulf %610, %661 : vector<4x32xf32>
    %663 = arith.addf %651, %662 : vector<4x32xf32>
    %664 = math.tanh %663 : vector<4x32xf32>
    %cst_164 = arith.constant dense<0.000000e+00> : vector<4x32xf32>
    %665 = tpu.matmul %664, %3, %cst_164 {dimension_numbers = #tpu.dot_dimension_numbers<[1], [0], [0], [1], [0, 0, 1, 1], [], []>} : vector<4x32xf32>, vector<32x32xf32>, vector<4x32xf32> -> vector<4x32xf32>
    %666 = vector.broadcast %4 : vector<1x32xf32> to vector<4x32xf32>
    %667 = arith.addf %665, %666 : vector<4x32xf32>
    %668 = arith.mulf %608, %667 : vector<4x32xf32>
    %669 = arith.addf %651, %668 : vector<4x32xf32>
    %670 = math.tanh %669 : vector<4x32xf32>
    %671 = arith.addf %658, %664 : vector<4x32xf32>
    %cst_165 = arith.constant 2.000000e+00 : f32
    %672 = vector.broadcast %cst_165 : f32 to vector<4x32xf32>
    %673 = arith.mulf %672, %671 : vector<4x32xf32>
    %674 = arith.addf %652, %673 : vector<4x32xf32>
    %675 = arith.addf %674, %670 : vector<4x32xf32>
    %676 = arith.addf %641, %675 : vector<4x32xf32>
    %cst_166 = arith.constant dense<0.000000e+00> : vector<4x32xf32>
    %677 = tpu.matmul %670, %3, %cst_166 {dimension_numbers = #tpu.dot_dimension_numbers<[1], [0], [0], [1], [0, 0, 1, 1], [], []>} : vector<4x32xf32>, vector<32x32xf32>, vector<4x32xf32> -> vector<4x32xf32>
    %678 = vector.broadcast %4 : vector<1x32xf32> to vector<4x32xf32>
    %679 = arith.addf %677, %678 : vector<4x32xf32>
    %680 = arith.addf %661, %667 : vector<4x32xf32>
    %cst_167 = arith.constant 2.000000e+00 : f32
    %681 = vector.broadcast %cst_167 : f32 to vector<4x32xf32>
    %682 = arith.mulf %681, %680 : vector<4x32xf32>
    %683 = arith.addf %655, %682 : vector<4x32xf32>
    %684 = arith.addf %683, %679 : vector<4x32xf32>
    %685 = arith.mulf %612, %684 : vector<4x32xf32>
    %686 = arith.addf %651, %685 : vector<4x32xf32>
    %687 = math.tanh %686 : vector<4x32xf32>
    %cst_168 = arith.constant dense<0.000000e+00> : vector<4x32xf32>
    %688 = tpu.matmul %687, %3, %cst_168 {dimension_numbers = #tpu.dot_dimension_numbers<[1], [0], [0], [1], [0, 0, 1, 1], [], []>} : vector<4x32xf32>, vector<32x32xf32>, vector<4x32xf32> -> vector<4x32xf32>
    %689 = vector.broadcast %4 : vector<1x32xf32> to vector<4x32xf32>
    %690 = arith.addf %688, %689 : vector<4x32xf32>
    %691 = arith.mulf %610, %690 : vector<4x32xf32>
    %692 = arith.addf %686, %691 : vector<4x32xf32>
    %693 = math.tanh %692 : vector<4x32xf32>
    %cst_169 = arith.constant dense<0.000000e+00> : vector<4x32xf32>
    %694 = tpu.matmul %693, %3, %cst_169 {dimension_numbers = #tpu.dot_dimension_numbers<[1], [0], [0], [1], [0, 0, 1, 1], [], []>} : vector<4x32xf32>, vector<32x32xf32>, vector<4x32xf32> -> vector<4x32xf32>
    %695 = vector.broadcast %4 : vector<1x32xf32> to vector<4x32xf32>
    %696 = arith.addf %694, %695 : vector<4x32xf32>
    %697 = arith.mulf %610, %696 : vector<4x32xf32>
    %698 = arith.addf %686, %697 : vector<4x32xf32>
    %699 = math.tanh %698 : vector<4x32xf32>
    %cst_170 = arith.constant dense<0.000000e+00> : vector<4x32xf32>
    %700 = tpu.matmul %699, %3, %cst_170 {dimension_numbers = #tpu.dot_dimension_numbers<[1], [0], [0], [1], [0, 0, 1, 1], [], []>} : vector<4x32xf32>, vector<32x32xf32>, vector<4x32xf32> -> vector<4x32xf32>
    %701 = vector.broadcast %4 : vector<1x32xf32> to vector<4x32xf32>
    %702 = arith.addf %700, %701 : vector<4x32xf32>
    %703 = arith.mulf %608, %702 : vector<4x32xf32>
    %704 = arith.addf %686, %703 : vector<4x32xf32>
    %705 = math.tanh %704 : vector<4x32xf32>
    %706 = arith.addf %693, %699 : vector<4x32xf32>
    %cst_171 = arith.constant 2.000000e+00 : f32
    %707 = vector.broadcast %cst_171 : f32 to vector<4x32xf32>
    %708 = arith.mulf %707, %706 : vector<4x32xf32>
    %709 = arith.addf %687, %708 : vector<4x32xf32>
    %710 = arith.addf %709, %705 : vector<4x32xf32>
    %711 = arith.addf %676, %710 : vector<4x32xf32>
    %cst_172 = arith.constant dense<0.000000e+00> : vector<4x32xf32>
    %712 = tpu.matmul %711, %5, %cst_172 {dimension_numbers = #tpu.dot_dimension_numbers<[1], [0], [0], [1], [0, 0, 1, 1], [], []>} : vector<4x32xf32>, vector<32x32xf32>, vector<4x32xf32> -> vector<4x32xf32>
    %713 = vector.broadcast %8 : vector<1x32xf32> to vector<4x32xf32>
    %714 = arith.addf %712, %713 : vector<4x32xf32>
    %715 = arith.mulf %612, %714 : vector<4x32xf32>
    %716 = arith.addf %601, %715 : vector<4x32xf32>
    %717 = arith.index_cast %c4_i32 : i32 to index
    %c0_173 = arith.constant 0 : index
    %c0_174 = arith.constant 0 : index
    %718 = vector.load %arg9[%717, %c0_173, %c0_174] : memref<8x4x32xf32, #tpu.memory_space<vmem>>, vector<1x4x32xf32>
    %719 = vector.shape_cast %718 : vector<1x4x32xf32> to vector<4x32xf32>
    %720 = vector.shape_cast %716 : vector<4x32xf32> to vector<1x4x32xf32>
    tpu.vector_store %arg9[%717, %c0_173, %c0_174], %720 {strides = array<i32>} : memref<8x4x32xf32, #tpu.memory_space<vmem>>, vector<1x4x32xf32>,
    %c5_i32 = arith.constant 5 : i32
    %721 = arith.index_cast %c5_i32 : i32 to index
    %c0_175 = arith.constant 0 : index
    %c0_176 = arith.constant 0 : index
    %722 = vector.load %arg0[%721, %c0_175, %c0_176] : memref<8x4x128xf32, #tpu.memory_space<vmem>>, vector<1x4x128xf32>
    %723 = vector.shape_cast %722 : vector<1x4x128xf32> to vector<4x128xf32>
    %cst_177 = arith.constant dense<0.000000e+00> : vector<4x128xf32>
    %724 = tpu.matmul %716, %0, %cst_177 {dimension_numbers = #tpu.dot_dimension_numbers<[1], [0], [0], [1], [0, 0, 1, 1], [], []>} : vector<4x32xf32>, vector<32x128xf32>, vector<4x128xf32> -> vector<4x128xf32>
    %725 = arith.addf %723, %724 : vector<4x128xf32>
    %726 = arith.negf %725 : vector<4x128xf32>
    %727 = math.exp %726 : vector<4x128xf32>
    %cst_178 = arith.constant 1.000000e+00 : f32
    %728 = vector.broadcast %cst_178 : f32 to vector<4x128xf32>
    %729 = arith.addf %728, %727 : vector<4x128xf32>
    %730 = arith.divf %728, %729 : vector<4x128xf32>
    %731 = vector.extract_strided_slice %730 {offsets = [0, 0], sizes = [4, 32], strides = [1, 1]} : vector<4x128xf32> to vector<4x32xf32>
    %732 = vector.extract_strided_slice %730 {offsets = [0, 32], sizes = [4, 32], strides = [1, 1]} : vector<4x128xf32> to vector<4x32xf32>
    %733 = vector.extract_strided_slice %730 {offsets = [0, 64], sizes = [4, 32], strides = [1, 1]} : vector<4x128xf32> to vector<4x32xf32>
    %cst_179 = arith.constant 2.000000e+00 : f32
    %734 = vector.broadcast %cst_179 : f32 to vector<4x32xf32>
    %735 = arith.mulf %734, %733 : vector<4x32xf32>
    %cst_180 = arith.constant 1.000000e+00 : f32
    %736 = vector.broadcast %cst_180 : f32 to vector<4x32xf32>
    %737 = arith.subf %735, %736 : vector<4x32xf32>
    %738 = vector.extract_strided_slice %730 {offsets = [0, 96], sizes = [4, 32], strides = [1, 1]} : vector<4x128xf32> to vector<4x32xf32>
    %739 = arith.mulf %732, %599 : vector<4x32xf32>
    %740 = arith.mulf %731, %737 : vector<4x32xf32>
    %741 = arith.addf %739, %740 : vector<4x32xf32>
    %742 = math.tanh %741 : vector<4x32xf32>
    %743 = arith.mulf %738, %742 : vector<4x32xf32>
    %744 = arith.index_cast %c5_i32 : i32 to index
    %c0_181 = arith.constant 0 : index
    %c0_182 = arith.constant 0 : index
    %745 = vector.load %arg1[%744, %c0_181, %c0_182] : memref<8x4x1xf32, #tpu.memory_space<vmem>>, vector<1x4x1xf32>
    %746 = vector.shape_cast %745 : vector<1x4x1xf32> to vector<4x1xf32>
    %cst_183 = arith.constant 0.333333343 : f32
    %747 = vector.broadcast %cst_183 : f32 to vector<4x1xf32>
    %748 = arith.mulf %746, %747 : vector<4x1xf32>
    %749 = vector.shape_cast %748 : vector<4x1xf32> to vector<4x1xf32>
    %750 = vector.broadcast %749 : vector<4x1xf32> to vector<4x32xf32>
    %cst_184 = arith.constant 5.000000e-01 : f32
    %751 = vector.broadcast %cst_184 : f32 to vector<4x32xf32>
    %752 = arith.mulf %750, %751 : vector<4x32xf32>
    %cst_185 = arith.constant 0.166666672 : f32
    %753 = vector.broadcast %cst_185 : f32 to vector<4x32xf32>
    %754 = arith.mulf %750, %753 : vector<4x32xf32>
    %cst_186 = arith.constant dense<0.000000e+00> : vector<4x32xf32>
    %755 = tpu.matmul %743, %1, %cst_186 {dimension_numbers = #tpu.dot_dimension_numbers<[1], [0], [0], [1], [0, 0, 1, 1], [], []>} : vector<4x32xf32>, vector<32x32xf32>, vector<4x32xf32> -> vector<4x32xf32>
    %756 = vector.broadcast %2 : vector<1x32xf32> to vector<4x32xf32>
    %757 = arith.addf %755, %756 : vector<4x32xf32>
    %cst_187 = arith.constant 0.000000e+00 : f32
    %758 = vector.broadcast %cst_187 : f32 to vector<4x32xf32>
    %759 = math.tanh %757 : vector<4x32xf32>
    %cst_188 = arith.constant dense<0.000000e+00> : vector<4x32xf32>
    %760 = tpu.matmul %759, %3, %cst_188 {dimension_numbers = #tpu.dot_dimension_numbers<[1], [0], [0], [1], [0, 0, 1, 1], [], []>} : vector<4x32xf32>, vector<32x32xf32>, vector<4x32xf32> -> vector<4x32xf32>
    %761 = vector.broadcast %4 : vector<1x32xf32> to vector<4x32xf32>
    %762 = arith.addf %760, %761 : vector<4x32xf32>
    %763 = arith.mulf %752, %762 : vector<4x32xf32>
    %764 = arith.addf %757, %763 : vector<4x32xf32>
    %765 = math.tanh %764 : vector<4x32xf32>
    %cst_189 = arith.constant dense<0.000000e+00> : vector<4x32xf32>
    %766 = tpu.matmul %765, %3, %cst_189 {dimension_numbers = #tpu.dot_dimension_numbers<[1], [0], [0], [1], [0, 0, 1, 1], [], []>} : vector<4x32xf32>, vector<32x32xf32>, vector<4x32xf32> -> vector<4x32xf32>
    %767 = vector.broadcast %4 : vector<1x32xf32> to vector<4x32xf32>
    %768 = arith.addf %766, %767 : vector<4x32xf32>
    %769 = arith.mulf %752, %768 : vector<4x32xf32>
    %770 = arith.addf %757, %769 : vector<4x32xf32>
    %771 = math.tanh %770 : vector<4x32xf32>
    %cst_190 = arith.constant dense<0.000000e+00> : vector<4x32xf32>
    %772 = tpu.matmul %771, %3, %cst_190 {dimension_numbers = #tpu.dot_dimension_numbers<[1], [0], [0], [1], [0, 0, 1, 1], [], []>} : vector<4x32xf32>, vector<32x32xf32>, vector<4x32xf32> -> vector<4x32xf32>
    %773 = vector.broadcast %4 : vector<1x32xf32> to vector<4x32xf32>
    %774 = arith.addf %772, %773 : vector<4x32xf32>
    %775 = arith.mulf %750, %774 : vector<4x32xf32>
    %776 = arith.addf %757, %775 : vector<4x32xf32>
    %777 = math.tanh %776 : vector<4x32xf32>
    %778 = arith.addf %765, %771 : vector<4x32xf32>
    %cst_191 = arith.constant 2.000000e+00 : f32
    %779 = vector.broadcast %cst_191 : f32 to vector<4x32xf32>
    %780 = arith.mulf %779, %778 : vector<4x32xf32>
    %781 = arith.addf %759, %780 : vector<4x32xf32>
    %782 = arith.addf %781, %777 : vector<4x32xf32>
    %783 = arith.addf %758, %782 : vector<4x32xf32>
    %cst_192 = arith.constant dense<0.000000e+00> : vector<4x32xf32>
    %784 = tpu.matmul %777, %3, %cst_192 {dimension_numbers = #tpu.dot_dimension_numbers<[1], [0], [0], [1], [0, 0, 1, 1], [], []>} : vector<4x32xf32>, vector<32x32xf32>, vector<4x32xf32> -> vector<4x32xf32>
    %785 = vector.broadcast %4 : vector<1x32xf32> to vector<4x32xf32>
    %786 = arith.addf %784, %785 : vector<4x32xf32>
    %787 = arith.addf %768, %774 : vector<4x32xf32>
    %cst_193 = arith.constant 2.000000e+00 : f32
    %788 = vector.broadcast %cst_193 : f32 to vector<4x32xf32>
    %789 = arith.mulf %788, %787 : vector<4x32xf32>
    %790 = arith.addf %762, %789 : vector<4x32xf32>
    %791 = arith.addf %790, %786 : vector<4x32xf32>
    %792 = arith.mulf %754, %791 : vector<4x32xf32>
    %793 = arith.addf %757, %792 : vector<4x32xf32>
    %794 = math.tanh %793 : vector<4x32xf32>
    %cst_194 = arith.constant dense<0.000000e+00> : vector<4x32xf32>
    %795 = tpu.matmul %794, %3, %cst_194 {dimension_numbers = #tpu.dot_dimension_numbers<[1], [0], [0], [1], [0, 0, 1, 1], [], []>} : vector<4x32xf32>, vector<32x32xf32>, vector<4x32xf32> -> vector<4x32xf32>
    %796 = vector.broadcast %4 : vector<1x32xf32> to vector<4x32xf32>
    %797 = arith.addf %795, %796 : vector<4x32xf32>
    %798 = arith.mulf %752, %797 : vector<4x32xf32>
    %799 = arith.addf %793, %798 : vector<4x32xf32>
    %800 = math.tanh %799 : vector<4x32xf32>
    %cst_195 = arith.constant dense<0.000000e+00> : vector<4x32xf32>
    %801 = tpu.matmul %800, %3, %cst_195 {dimension_numbers = #tpu.dot_dimension_numbers<[1], [0], [0], [1], [0, 0, 1, 1], [], []>} : vector<4x32xf32>, vector<32x32xf32>, vector<4x32xf32> -> vector<4x32xf32>
    %802 = vector.broadcast %4 : vector<1x32xf32> to vector<4x32xf32>
    %803 = arith.addf %801, %802 : vector<4x32xf32>
    %804 = arith.mulf %752, %803 : vector<4x32xf32>
    %805 = arith.addf %793, %804 : vector<4x32xf32>
    %806 = math.tanh %805 : vector<4x32xf32>
    %cst_196 = arith.constant dense<0.000000e+00> : vector<4x32xf32>
    %807 = tpu.matmul %806, %3, %cst_196 {dimension_numbers = #tpu.dot_dimension_numbers<[1], [0], [0], [1], [0, 0, 1, 1], [], []>} : vector<4x32xf32>, vector<32x32xf32>, vector<4x32xf32> -> vector<4x32xf32>
    %808 = vector.broadcast %4 : vector<1x32xf32> to vector<4x32xf32>
    %809 = arith.addf %807, %808 : vector<4x32xf32>
    %810 = arith.mulf %750, %809 : vector<4x32xf32>
    %811 = arith.addf %793, %810 : vector<4x32xf32>
    %812 = math.tanh %811 : vector<4x32xf32>
    %813 = arith.addf %800, %806 : vector<4x32xf32>
    %cst_197 = arith.constant 2.000000e+00 : f32
    %814 = vector.broadcast %cst_197 : f32 to vector<4x32xf32>
    %815 = arith.mulf %814, %813 : vector<4x32xf32>
    %816 = arith.addf %794, %815 : vector<4x32xf32>
    %817 = arith.addf %816, %812 : vector<4x32xf32>
    %818 = arith.addf %783, %817 : vector<4x32xf32>
    %cst_198 = arith.constant dense<0.000000e+00> : vector<4x32xf32>
    %819 = tpu.matmul %812, %3, %cst_198 {dimension_numbers = #tpu.dot_dimension_numbers<[1], [0], [0], [1], [0, 0, 1, 1], [], []>} : vector<4x32xf32>, vector<32x32xf32>, vector<4x32xf32> -> vector<4x32xf32>
    %820 = vector.broadcast %4 : vector<1x32xf32> to vector<4x32xf32>
    %821 = arith.addf %819, %820 : vector<4x32xf32>
    %822 = arith.addf %803, %809 : vector<4x32xf32>
    %cst_199 = arith.constant 2.000000e+00 : f32
    %823 = vector.broadcast %cst_199 : f32 to vector<4x32xf32>
    %824 = arith.mulf %823, %822 : vector<4x32xf32>
    %825 = arith.addf %797, %824 : vector<4x32xf32>
    %826 = arith.addf %825, %821 : vector<4x32xf32>
    %827 = arith.mulf %754, %826 : vector<4x32xf32>
    %828 = arith.addf %793, %827 : vector<4x32xf32>
    %829 = math.tanh %828 : vector<4x32xf32>
    %cst_200 = arith.constant dense<0.000000e+00> : vector<4x32xf32>
    %830 = tpu.matmul %829, %3, %cst_200 {dimension_numbers = #tpu.dot_dimension_numbers<[1], [0], [0], [1], [0, 0, 1, 1], [], []>} : vector<4x32xf32>, vector<32x32xf32>, vector<4x32xf32> -> vector<4x32xf32>
    %831 = vector.broadcast %4 : vector<1x32xf32> to vector<4x32xf32>
    %832 = arith.addf %830, %831 : vector<4x32xf32>
    %833 = arith.mulf %752, %832 : vector<4x32xf32>
    %834 = arith.addf %828, %833 : vector<4x32xf32>
    %835 = math.tanh %834 : vector<4x32xf32>
    %cst_201 = arith.constant dense<0.000000e+00> : vector<4x32xf32>
    %836 = tpu.matmul %835, %3, %cst_201 {dimension_numbers = #tpu.dot_dimension_numbers<[1], [0], [0], [1], [0, 0, 1, 1], [], []>} : vector<4x32xf32>, vector<32x32xf32>, vector<4x32xf32> -> vector<4x32xf32>
    %837 = vector.broadcast %4 : vector<1x32xf32> to vector<4x32xf32>
    %838 = arith.addf %836, %837 : vector<4x32xf32>
    %839 = arith.mulf %752, %838 : vector<4x32xf32>
    %840 = arith.addf %828, %839 : vector<4x32xf32>
    %841 = math.tanh %840 : vector<4x32xf32>
    %cst_202 = arith.constant dense<0.000000e+00> : vector<4x32xf32>
    %842 = tpu.matmul %841, %3, %cst_202 {dimension_numbers = #tpu.dot_dimension_numbers<[1], [0], [0], [1], [0, 0, 1, 1], [], []>} : vector<4x32xf32>, vector<32x32xf32>, vector<4x32xf32> -> vector<4x32xf32>
    %843 = vector.broadcast %4 : vector<1x32xf32> to vector<4x32xf32>
    %844 = arith.addf %842, %843 : vector<4x32xf32>
    %845 = arith.mulf %750, %844 : vector<4x32xf32>
    %846 = arith.addf %828, %845 : vector<4x32xf32>
    %847 = math.tanh %846 : vector<4x32xf32>
    %848 = arith.addf %835, %841 : vector<4x32xf32>
    %cst_203 = arith.constant 2.000000e+00 : f32
    %849 = vector.broadcast %cst_203 : f32 to vector<4x32xf32>
    %850 = arith.mulf %849, %848 : vector<4x32xf32>
    %851 = arith.addf %829, %850 : vector<4x32xf32>
    %852 = arith.addf %851, %847 : vector<4x32xf32>
    %853 = arith.addf %818, %852 : vector<4x32xf32>
    %cst_204 = arith.constant dense<0.000000e+00> : vector<4x32xf32>
    %854 = tpu.matmul %853, %5, %cst_204 {dimension_numbers = #tpu.dot_dimension_numbers<[1], [0], [0], [1], [0, 0, 1, 1], [], []>} : vector<4x32xf32>, vector<32x32xf32>, vector<4x32xf32> -> vector<4x32xf32>
    %855 = vector.broadcast %8 : vector<1x32xf32> to vector<4x32xf32>
    %856 = arith.addf %854, %855 : vector<4x32xf32>
    %857 = arith.mulf %754, %856 : vector<4x32xf32>
    %858 = arith.addf %743, %857 : vector<4x32xf32>
    %859 = arith.index_cast %c5_i32 : i32 to index
    %c0_205 = arith.constant 0 : index
    %c0_206 = arith.constant 0 : index
    %860 = vector.load %arg9[%859, %c0_205, %c0_206] : memref<8x4x32xf32, #tpu.memory_space<vmem>>, vector<1x4x32xf32>
    %861 = vector.shape_cast %860 : vector<1x4x32xf32> to vector<4x32xf32>
    %862 = vector.shape_cast %858 : vector<4x32xf32> to vector<1x4x32xf32>
    tpu.vector_store %arg9[%859, %c0_205, %c0_206], %862 {strides = array<i32>} : memref<8x4x32xf32, #tpu.memory_space<vmem>>, vector<1x4x32xf32>,
    %c6_i32 = arith.constant 6 : i32
    %863 = arith.index_cast %c6_i32 : i32 to index
    %c0_207 = arith.constant 0 : index
    %c0_208 = arith.constant 0 : index
    %864 = vector.load %arg0[%863, %c0_207, %c0_208] : memref<8x4x128xf32, #tpu.memory_space<vmem>>, vector<1x4x128xf32>
    %865 = vector.shape_cast %864 : vector<1x4x128xf32> to vector<4x128xf32>
    %cst_209 = arith.constant dense<0.000000e+00> : vector<4x128xf32>
    %866 = tpu.matmul %858, %0, %cst_209 {dimension_numbers = #tpu.dot_dimension_numbers<[1], [0], [0], [1], [0, 0, 1, 1], [], []>} : vector<4x32xf32>, vector<32x128xf32>, vector<4x128xf32> -> vector<4x128xf32>
    %867 = arith.addf %865, %866 : vector<4x128xf32>
    %868 = arith.negf %867 : vector<4x128xf32>
    %869 = math.exp %868 : vector<4x128xf32>
    %cst_210 = arith.constant 1.000000e+00 : f32
    %870 = vector.broadcast %cst_210 : f32 to vector<4x128xf32>
    %871 = arith.addf %870, %869 : vector<4x128xf32>
    %872 = arith.divf %870, %871 : vector<4x128xf32>
    %873 = vector.extract_strided_slice %872 {offsets = [0, 0], sizes = [4, 32], strides = [1, 1]} : vector<4x128xf32> to vector<4x32xf32>
    %874 = vector.extract_strided_slice %872 {offsets = [0, 32], sizes = [4, 32], strides = [1, 1]} : vector<4x128xf32> to vector<4x32xf32>
    %875 = vector.extract_strided_slice %872 {offsets = [0, 64], sizes = [4, 32], strides = [1, 1]} : vector<4x128xf32> to vector<4x32xf32>
    %cst_211 = arith.constant 2.000000e+00 : f32
    %876 = vector.broadcast %cst_211 : f32 to vector<4x32xf32>
    %877 = arith.mulf %876, %875 : vector<4x32xf32>
    %cst_212 = arith.constant 1.000000e+00 : f32
    %878 = vector.broadcast %cst_212 : f32 to vector<4x32xf32>
    %879 = arith.subf %877, %878 : vector<4x32xf32>
    %880 = vector.extract_strided_slice %872 {offsets = [0, 96], sizes = [4, 32], strides = [1, 1]} : vector<4x128xf32> to vector<4x32xf32>
    %881 = arith.mulf %874, %741 : vector<4x32xf32>
    %882 = arith.mulf %873, %879 : vector<4x32xf32>
    %883 = arith.addf %881, %882 : vector<4x32xf32>
    %884 = math.tanh %883 : vector<4x32xf32>
    %885 = arith.mulf %880, %884 : vector<4x32xf32>
    %886 = arith.index_cast %c6_i32 : i32 to index
    %c0_213 = arith.constant 0 : index
    %c0_214 = arith.constant 0 : index
    %887 = vector.load %arg1[%886, %c0_213, %c0_214] : memref<8x4x1xf32, #tpu.memory_space<vmem>>, vector<1x4x1xf32>
    %888 = vector.shape_cast %887 : vector<1x4x1xf32> to vector<4x1xf32>
    %cst_215 = arith.constant 0.333333343 : f32
    %889 = vector.broadcast %cst_215 : f32 to vector<4x1xf32>
    %890 = arith.mulf %888, %889 : vector<4x1xf32>
    %891 = vector.shape_cast %890 : vector<4x1xf32> to vector<4x1xf32>
    %892 = vector.broadcast %891 : vector<4x1xf32> to vector<4x32xf32>
    %cst_216 = arith.constant 5.000000e-01 : f32
    %893 = vector.broadcast %cst_216 : f32 to vector<4x32xf32>
    %894 = arith.mulf %892, %893 : vector<4x32xf32>
    %cst_217 = arith.constant 0.166666672 : f32
    %895 = vector.broadcast %cst_217 : f32 to vector<4x32xf32>
    %896 = arith.mulf %892, %895 : vector<4x32xf32>
    %cst_218 = arith.constant dense<0.000000e+00> : vector<4x32xf32>
    %897 = tpu.matmul %885, %1, %cst_218 {dimension_numbers = #tpu.dot_dimension_numbers<[1], [0], [0], [1], [0, 0, 1, 1], [], []>} : vector<4x32xf32>, vector<32x32xf32>, vector<4x32xf32> -> vector<4x32xf32>
    %898 = vector.broadcast %2 : vector<1x32xf32> to vector<4x32xf32>
    %899 = arith.addf %897, %898 : vector<4x32xf32>
    %cst_219 = arith.constant 0.000000e+00 : f32
    %900 = vector.broadcast %cst_219 : f32 to vector<4x32xf32>
    %901 = math.tanh %899 : vector<4x32xf32>
    %cst_220 = arith.constant dense<0.000000e+00> : vector<4x32xf32>
    %902 = tpu.matmul %901, %3, %cst_220 {dimension_numbers = #tpu.dot_dimension_numbers<[1], [0], [0], [1], [0, 0, 1, 1], [], []>} : vector<4x32xf32>, vector<32x32xf32>, vector<4x32xf32> -> vector<4x32xf32>
    %903 = vector.broadcast %4 : vector<1x32xf32> to vector<4x32xf32>
    %904 = arith.addf %902, %903 : vector<4x32xf32>
    %905 = arith.mulf %894, %904 : vector<4x32xf32>
    %906 = arith.addf %899, %905 : vector<4x32xf32>
    %907 = math.tanh %906 : vector<4x32xf32>
    %cst_221 = arith.constant dense<0.000000e+00> : vector<4x32xf32>
    %908 = tpu.matmul %907, %3, %cst_221 {dimension_numbers = #tpu.dot_dimension_numbers<[1], [0], [0], [1], [0, 0, 1, 1], [], []>} : vector<4x32xf32>, vector<32x32xf32>, vector<4x32xf32> -> vector<4x32xf32>
    %909 = vector.broadcast %4 : vector<1x32xf32> to vector<4x32xf32>
    %910 = arith.addf %908, %909 : vector<4x32xf32>
    %911 = arith.mulf %894, %910 : vector<4x32xf32>
    %912 = arith.addf %899, %911 : vector<4x32xf32>
    %913 = math.tanh %912 : vector<4x32xf32>
    %cst_222 = arith.constant dense<0.000000e+00> : vector<4x32xf32>
    %914 = tpu.matmul %913, %3, %cst_222 {dimension_numbers = #tpu.dot_dimension_numbers<[1], [0], [0], [1], [0, 0, 1, 1], [], []>} : vector<4x32xf32>, vector<32x32xf32>, vector<4x32xf32> -> vector<4x32xf32>
    %915 = vector.broadcast %4 : vector<1x32xf32> to vector<4x32xf32>
    %916 = arith.addf %914, %915 : vector<4x32xf32>
    %917 = arith.mulf %892, %916 : vector<4x32xf32>
    %918 = arith.addf %899, %917 : vector<4x32xf32>
    %919 = math.tanh %918 : vector<4x32xf32>
    %920 = arith.addf %907, %913 : vector<4x32xf32>
    %cst_223 = arith.constant 2.000000e+00 : f32
    %921 = vector.broadcast %cst_223 : f32 to vector<4x32xf32>
    %922 = arith.mulf %921, %920 : vector<4x32xf32>
    %923 = arith.addf %901, %922 : vector<4x32xf32>
    %924 = arith.addf %923, %919 : vector<4x32xf32>
    %925 = arith.addf %900, %924 : vector<4x32xf32>
    %cst_224 = arith.constant dense<0.000000e+00> : vector<4x32xf32>
    %926 = tpu.matmul %919, %3, %cst_224 {dimension_numbers = #tpu.dot_dimension_numbers<[1], [0], [0], [1], [0, 0, 1, 1], [], []>} : vector<4x32xf32>, vector<32x32xf32>, vector<4x32xf32> -> vector<4x32xf32>
    %927 = vector.broadcast %4 : vector<1x32xf32> to vector<4x32xf32>
    %928 = arith.addf %926, %927 : vector<4x32xf32>
    %929 = arith.addf %910, %916 : vector<4x32xf32>
    %cst_225 = arith.constant 2.000000e+00 : f32
    %930 = vector.broadcast %cst_225 : f32 to vector<4x32xf32>
    %931 = arith.mulf %930, %929 : vector<4x32xf32>
    %932 = arith.addf %904, %931 : vector<4x32xf32>
    %933 = arith.addf %932, %928 : vector<4x32xf32>
    %934 = arith.mulf %896, %933 : vector<4x32xf32>
    %935 = arith.addf %899, %934 : vector<4x32xf32>
    %936 = math.tanh %935 : vector<4x32xf32>
    %cst_226 = arith.constant dense<0.000000e+00> : vector<4x32xf32>
    %937 = tpu.matmul %936, %3, %cst_226 {dimension_numbers = #tpu.dot_dimension_numbers<[1], [0], [0], [1], [0, 0, 1, 1], [], []>} : vector<4x32xf32>, vector<32x32xf32>, vector<4x32xf32> -> vector<4x32xf32>
    %938 = vector.broadcast %4 : vector<1x32xf32> to vector<4x32xf32>
    %939 = arith.addf %937, %938 : vector<4x32xf32>
    %940 = arith.mulf %894, %939 : vector<4x32xf32>
    %941 = arith.addf %935, %940 : vector<4x32xf32>
    %942 = math.tanh %941 : vector<4x32xf32>
    %cst_227 = arith.constant dense<0.000000e+00> : vector<4x32xf32>
    %943 = tpu.matmul %942, %3, %cst_227 {dimension_numbers = #tpu.dot_dimension_numbers<[1], [0], [0], [1], [0, 0, 1, 1], [], []>} : vector<4x32xf32>, vector<32x32xf32>, vector<4x32xf32> -> vector<4x32xf32>
    %944 = vector.broadcast %4 : vector<1x32xf32> to vector<4x32xf32>
    %945 = arith.addf %943, %944 : vector<4x32xf32>
    %946 = arith.mulf %894, %945 : vector<4x32xf32>
    %947 = arith.addf %935, %946 : vector<4x32xf32>
    %948 = math.tanh %947 : vector<4x32xf32>
    %cst_228 = arith.constant dense<0.000000e+00> : vector<4x32xf32>
    %949 = tpu.matmul %948, %3, %cst_228 {dimension_numbers = #tpu.dot_dimension_numbers<[1], [0], [0], [1], [0, 0, 1, 1], [], []>} : vector<4x32xf32>, vector<32x32xf32>, vector<4x32xf32> -> vector<4x32xf32>
    %950 = vector.broadcast %4 : vector<1x32xf32> to vector<4x32xf32>
    %951 = arith.addf %949, %950 : vector<4x32xf32>
    %952 = arith.mulf %892, %951 : vector<4x32xf32>
    %953 = arith.addf %935, %952 : vector<4x32xf32>
    %954 = math.tanh %953 : vector<4x32xf32>
    %955 = arith.addf %942, %948 : vector<4x32xf32>
    %cst_229 = arith.constant 2.000000e+00 : f32
    %956 = vector.broadcast %cst_229 : f32 to vector<4x32xf32>
    %957 = arith.mulf %956, %955 : vector<4x32xf32>
    %958 = arith.addf %936, %957 : vector<4x32xf32>
    %959 = arith.addf %958, %954 : vector<4x32xf32>
    %960 = arith.addf %925, %959 : vector<4x32xf32>
    %cst_230 = arith.constant dense<0.000000e+00> : vector<4x32xf32>
    %961 = tpu.matmul %954, %3, %cst_230 {dimension_numbers = #tpu.dot_dimension_numbers<[1], [0], [0], [1], [0, 0, 1, 1], [], []>} : vector<4x32xf32>, vector<32x32xf32>, vector<4x32xf32> -> vector<4x32xf32>
    %962 = vector.broadcast %4 : vector<1x32xf32> to vector<4x32xf32>
    %963 = arith.addf %961, %962 : vector<4x32xf32>
    %964 = arith.addf %945, %951 : vector<4x32xf32>
    %cst_231 = arith.constant 2.000000e+00 : f32
    %965 = vector.broadcast %cst_231 : f32 to vector<4x32xf32>
    %966 = arith.mulf %965, %964 : vector<4x32xf32>
    %967 = arith.addf %939, %966 : vector<4x32xf32>
    %968 = arith.addf %967, %963 : vector<4x32xf32>
    %969 = arith.mulf %896, %968 : vector<4x32xf32>
    %970 = arith.addf %935, %969 : vector<4x32xf32>
    %971 = math.tanh %970 : vector<4x32xf32>
    %cst_232 = arith.constant dense<0.000000e+00> : vector<4x32xf32>
    %972 = tpu.matmul %971, %3, %cst_232 {dimension_numbers = #tpu.dot_dimension_numbers<[1], [0], [0], [1], [0, 0, 1, 1], [], []>} : vector<4x32xf32>, vector<32x32xf32>, vector<4x32xf32> -> vector<4x32xf32>
    %973 = vector.broadcast %4 : vector<1x32xf32> to vector<4x32xf32>
    %974 = arith.addf %972, %973 : vector<4x32xf32>
    %975 = arith.mulf %894, %974 : vector<4x32xf32>
    %976 = arith.addf %970, %975 : vector<4x32xf32>
    %977 = math.tanh %976 : vector<4x32xf32>
    %cst_233 = arith.constant dense<0.000000e+00> : vector<4x32xf32>
    %978 = tpu.matmul %977, %3, %cst_233 {dimension_numbers = #tpu.dot_dimension_numbers<[1], [0], [0], [1], [0, 0, 1, 1], [], []>} : vector<4x32xf32>, vector<32x32xf32>, vector<4x32xf32> -> vector<4x32xf32>
    %979 = vector.broadcast %4 : vector<1x32xf32> to vector<4x32xf32>
    %980 = arith.addf %978, %979 : vector<4x32xf32>
    %981 = arith.mulf %894, %980 : vector<4x32xf32>
    %982 = arith.addf %970, %981 : vector<4x32xf32>
    %983 = math.tanh %982 : vector<4x32xf32>
    %cst_234 = arith.constant dense<0.000000e+00> : vector<4x32xf32>
    %984 = tpu.matmul %983, %3, %cst_234 {dimension_numbers = #tpu.dot_dimension_numbers<[1], [0], [0], [1], [0, 0, 1, 1], [], []>} : vector<4x32xf32>, vector<32x32xf32>, vector<4x32xf32> -> vector<4x32xf32>
    %985 = vector.broadcast %4 : vector<1x32xf32> to vector<4x32xf32>
    %986 = arith.addf %984, %985 : vector<4x32xf32>
    %987 = arith.mulf %892, %986 : vector<4x32xf32>
    %988 = arith.addf %970, %987 : vector<4x32xf32>
    %989 = math.tanh %988 : vector<4x32xf32>
    %990 = arith.addf %977, %983 : vector<4x32xf32>
    %cst_235 = arith.constant 2.000000e+00 : f32
    %991 = vector.broadcast %cst_235 : f32 to vector<4x32xf32>
    %992 = arith.mulf %991, %990 : vector<4x32xf32>
    %993 = arith.addf %971, %992 : vector<4x32xf32>
    %994 = arith.addf %993, %989 : vector<4x32xf32>
    %995 = arith.addf %960, %994 : vector<4x32xf32>
    %cst_236 = arith.constant dense<0.000000e+00> : vector<4x32xf32>
    %996 = tpu.matmul %995, %5, %cst_236 {dimension_numbers = #tpu.dot_dimension_numbers<[1], [0], [0], [1], [0, 0, 1, 1], [], []>} : vector<4x32xf32>, vector<32x32xf32>, vector<4x32xf32> -> vector<4x32xf32>
    %997 = vector.broadcast %8 : vector<1x32xf32> to vector<4x32xf32>
    %998 = arith.addf %996, %997 : vector<4x32xf32>
    %999 = arith.mulf %896, %998 : vector<4x32xf32>
    %1000 = arith.addf %885, %999 : vector<4x32xf32>
    %1001 = arith.index_cast %c6_i32 : i32 to index
    %c0_237 = arith.constant 0 : index
    %c0_238 = arith.constant 0 : index
    %1002 = vector.load %arg9[%1001, %c0_237, %c0_238] : memref<8x4x32xf32, #tpu.memory_space<vmem>>, vector<1x4x32xf32>
    %1003 = vector.shape_cast %1002 : vector<1x4x32xf32> to vector<4x32xf32>
    %1004 = vector.shape_cast %1000 : vector<4x32xf32> to vector<1x4x32xf32>
    tpu.vector_store %arg9[%1001, %c0_237, %c0_238], %1004 {strides = array<i32>} : memref<8x4x32xf32, #tpu.memory_space<vmem>>, vector<1x4x32xf32>,
    %c7_i32 = arith.constant 7 : i32
    %1005 = arith.index_cast %c7_i32 : i32 to index
    %c0_239 = arith.constant 0 : index
    %c0_240 = arith.constant 0 : index
    %1006 = vector.load %arg0[%1005, %c0_239, %c0_240] : memref<8x4x128xf32, #tpu.memory_space<vmem>>, vector<1x4x128xf32>
    %1007 = vector.shape_cast %1006 : vector<1x4x128xf32> to vector<4x128xf32>
    %cst_241 = arith.constant dense<0.000000e+00> : vector<4x128xf32>
    %1008 = tpu.matmul %1000, %0, %cst_241 {dimension_numbers = #tpu.dot_dimension_numbers<[1], [0], [0], [1], [0, 0, 1, 1], [], []>} : vector<4x32xf32>, vector<32x128xf32>, vector<4x128xf32> -> vector<4x128xf32>
    %1009 = arith.addf %1007, %1008 : vector<4x128xf32>
    %1010 = arith.negf %1009 : vector<4x128xf32>
    %1011 = math.exp %1010 : vector<4x128xf32>
    %cst_242 = arith.constant 1.000000e+00 : f32
    %1012 = vector.broadcast %cst_242 : f32 to vector<4x128xf32>
    %1013 = arith.addf %1012, %1011 : vector<4x128xf32>
    %1014 = arith.divf %1012, %1013 : vector<4x128xf32>
    %1015 = vector.extract_strided_slice %1014 {offsets = [0, 0], sizes = [4, 32], strides = [1, 1]} : vector<4x128xf32> to vector<4x32xf32>
    %1016 = vector.extract_strided_slice %1014 {offsets = [0, 32], sizes = [4, 32], strides = [1, 1]} : vector<4x128xf32> to vector<4x32xf32>
    %1017 = vector.extract_strided_slice %1014 {offsets = [0, 64], sizes = [4, 32], strides = [1, 1]} : vector<4x128xf32> to vector<4x32xf32>
    %cst_243 = arith.constant 2.000000e+00 : f32
    %1018 = vector.broadcast %cst_243 : f32 to vector<4x32xf32>
    %1019 = arith.mulf %1018, %1017 : vector<4x32xf32>
    %cst_244 = arith.constant 1.000000e+00 : f32
    %1020 = vector.broadcast %cst_244 : f32 to vector<4x32xf32>
    %1021 = arith.subf %1019, %1020 : vector<4x32xf32>
    %1022 = vector.extract_strided_slice %1014 {offsets = [0, 96], sizes = [4, 32], strides = [1, 1]} : vector<4x128xf32> to vector<4x32xf32>
    %1023 = arith.mulf %1016, %883 : vector<4x32xf32>
    %1024 = arith.mulf %1015, %1021 : vector<4x32xf32>
    %1025 = arith.addf %1023, %1024 : vector<4x32xf32>
    %1026 = math.tanh %1025 : vector<4x32xf32>
    %1027 = arith.mulf %1022, %1026 : vector<4x32xf32>
    %1028 = arith.index_cast %c7_i32 : i32 to index
    %c0_245 = arith.constant 0 : index
    %c0_246 = arith.constant 0 : index
    %1029 = vector.load %arg1[%1028, %c0_245, %c0_246] : memref<8x4x1xf32, #tpu.memory_space<vmem>>, vector<1x4x1xf32>
    %1030 = vector.shape_cast %1029 : vector<1x4x1xf32> to vector<4x1xf32>
    %cst_247 = arith.constant 0.333333343 : f32
    %1031 = vector.broadcast %cst_247 : f32 to vector<4x1xf32>
    %1032 = arith.mulf %1030, %1031 : vector<4x1xf32>
    %1033 = vector.shape_cast %1032 : vector<4x1xf32> to vector<4x1xf32>
    %1034 = vector.broadcast %1033 : vector<4x1xf32> to vector<4x32xf32>
    %cst_248 = arith.constant 5.000000e-01 : f32
    %1035 = vector.broadcast %cst_248 : f32 to vector<4x32xf32>
    %1036 = arith.mulf %1034, %1035 : vector<4x32xf32>
    %cst_249 = arith.constant 0.166666672 : f32
    %1037 = vector.broadcast %cst_249 : f32 to vector<4x32xf32>
    %1038 = arith.mulf %1034, %1037 : vector<4x32xf32>
    %cst_250 = arith.constant dense<0.000000e+00> : vector<4x32xf32>
    %1039 = tpu.matmul %1027, %1, %cst_250 {dimension_numbers = #tpu.dot_dimension_numbers<[1], [0], [0], [1], [0, 0, 1, 1], [], []>} : vector<4x32xf32>, vector<32x32xf32>, vector<4x32xf32> -> vector<4x32xf32>
    %1040 = vector.broadcast %2 : vector<1x32xf32> to vector<4x32xf32>
    %1041 = arith.addf %1039, %1040 : vector<4x32xf32>
    %cst_251 = arith.constant 0.000000e+00 : f32
    %1042 = vector.broadcast %cst_251 : f32 to vector<4x32xf32>
    %1043 = math.tanh %1041 : vector<4x32xf32>
    %cst_252 = arith.constant dense<0.000000e+00> : vector<4x32xf32>
    %1044 = tpu.matmul %1043, %3, %cst_252 {dimension_numbers = #tpu.dot_dimension_numbers<[1], [0], [0], [1], [0, 0, 1, 1], [], []>} : vector<4x32xf32>, vector<32x32xf32>, vector<4x32xf32> -> vector<4x32xf32>
    %1045 = vector.broadcast %4 : vector<1x32xf32> to vector<4x32xf32>
    %1046 = arith.addf %1044, %1045 : vector<4x32xf32>
    %1047 = arith.mulf %1036, %1046 : vector<4x32xf32>
    %1048 = arith.addf %1041, %1047 : vector<4x32xf32>
    %1049 = math.tanh %1048 : vector<4x32xf32>
    %cst_253 = arith.constant dense<0.000000e+00> : vector<4x32xf32>
    %1050 = tpu.matmul %1049, %3, %cst_253 {dimension_numbers = #tpu.dot_dimension_numbers<[1], [0], [0], [1], [0, 0, 1, 1], [], []>} : vector<4x32xf32>, vector<32x32xf32>, vector<4x32xf32> -> vector<4x32xf32>
    %1051 = vector.broadcast %4 : vector<1x32xf32> to vector<4x32xf32>
    %1052 = arith.addf %1050, %1051 : vector<4x32xf32>
    %1053 = arith.mulf %1036, %1052 : vector<4x32xf32>
    %1054 = arith.addf %1041, %1053 : vector<4x32xf32>
    %1055 = math.tanh %1054 : vector<4x32xf32>
    %cst_254 = arith.constant dense<0.000000e+00> : vector<4x32xf32>
    %1056 = tpu.matmul %1055, %3, %cst_254 {dimension_numbers = #tpu.dot_dimension_numbers<[1], [0], [0], [1], [0, 0, 1, 1], [], []>} : vector<4x32xf32>, vector<32x32xf32>, vector<4x32xf32> -> vector<4x32xf32>
    %1057 = vector.broadcast %4 : vector<1x32xf32> to vector<4x32xf32>
    %1058 = arith.addf %1056, %1057 : vector<4x32xf32>
    %1059 = arith.mulf %1034, %1058 : vector<4x32xf32>
    %1060 = arith.addf %1041, %1059 : vector<4x32xf32>
    %1061 = math.tanh %1060 : vector<4x32xf32>
    %1062 = arith.addf %1049, %1055 : vector<4x32xf32>
    %cst_255 = arith.constant 2.000000e+00 : f32
    %1063 = vector.broadcast %cst_255 : f32 to vector<4x32xf32>
    %1064 = arith.mulf %1063, %1062 : vector<4x32xf32>
    %1065 = arith.addf %1043, %1064 : vector<4x32xf32>
    %1066 = arith.addf %1065, %1061 : vector<4x32xf32>
    %1067 = arith.addf %1042, %1066 : vector<4x32xf32>
    %cst_256 = arith.constant dense<0.000000e+00> : vector<4x32xf32>
    %1068 = tpu.matmul %1061, %3, %cst_256 {dimension_numbers = #tpu.dot_dimension_numbers<[1], [0], [0], [1], [0, 0, 1, 1], [], []>} : vector<4x32xf32>, vector<32x32xf32>, vector<4x32xf32> -> vector<4x32xf32>
    %1069 = vector.broadcast %4 : vector<1x32xf32> to vector<4x32xf32>
    %1070 = arith.addf %1068, %1069 : vector<4x32xf32>
    %1071 = arith.addf %1052, %1058 : vector<4x32xf32>
    %cst_257 = arith.constant 2.000000e+00 : f32
    %1072 = vector.broadcast %cst_257 : f32 to vector<4x32xf32>
    %1073 = arith.mulf %1072, %1071 : vector<4x32xf32>
    %1074 = arith.addf %1046, %1073 : vector<4x32xf32>
    %1075 = arith.addf %1074, %1070 : vector<4x32xf32>
    %1076 = arith.mulf %1038, %1075 : vector<4x32xf32>
    %1077 = arith.addf %1041, %1076 : vector<4x32xf32>
    %1078 = math.tanh %1077 : vector<4x32xf32>
    %cst_258 = arith.constant dense<0.000000e+00> : vector<4x32xf32>
    %1079 = tpu.matmul %1078, %3, %cst_258 {dimension_numbers = #tpu.dot_dimension_numbers<[1], [0], [0], [1], [0, 0, 1, 1], [], []>} : vector<4x32xf32>, vector<32x32xf32>, vector<4x32xf32> -> vector<4x32xf32>
    %1080 = vector.broadcast %4 : vector<1x32xf32> to vector<4x32xf32>
    %1081 = arith.addf %1079, %1080 : vector<4x32xf32>
    %1082 = arith.mulf %1036, %1081 : vector<4x32xf32>
    %1083 = arith.addf %1077, %1082 : vector<4x32xf32>
    %1084 = math.tanh %1083 : vector<4x32xf32>
    %cst_259 = arith.constant dense<0.000000e+00> : vector<4x32xf32>
    %1085 = tpu.matmul %1084, %3, %cst_259 {dimension_numbers = #tpu.dot_dimension_numbers<[1], [0], [0], [1], [0, 0, 1, 1], [], []>} : vector<4x32xf32>, vector<32x32xf32>, vector<4x32xf32> -> vector<4x32xf32>
    %1086 = vector.broadcast %4 : vector<1x32xf32> to vector<4x32xf32>
    %1087 = arith.addf %1085, %1086 : vector<4x32xf32>
    %1088 = arith.mulf %1036, %1087 : vector<4x32xf32>
    %1089 = arith.addf %1077, %1088 : vector<4x32xf32>
    %1090 = math.tanh %1089 : vector<4x32xf32>
    %cst_260 = arith.constant dense<0.000000e+00> : vector<4x32xf32>
    %1091 = tpu.matmul %1090, %3, %cst_260 {dimension_numbers = #tpu.dot_dimension_numbers<[1], [0], [0], [1], [0, 0, 1, 1], [], []>} : vector<4x32xf32>, vector<32x32xf32>, vector<4x32xf32> -> vector<4x32xf32>
    %1092 = vector.broadcast %4 : vector<1x32xf32> to vector<4x32xf32>
    %1093 = arith.addf %1091, %1092 : vector<4x32xf32>
    %1094 = arith.mulf %1034, %1093 : vector<4x32xf32>
    %1095 = arith.addf %1077, %1094 : vector<4x32xf32>
    %1096 = math.tanh %1095 : vector<4x32xf32>
    %1097 = arith.addf %1084, %1090 : vector<4x32xf32>
    %cst_261 = arith.constant 2.000000e+00 : f32
    %1098 = vector.broadcast %cst_261 : f32 to vector<4x32xf32>
    %1099 = arith.mulf %1098, %1097 : vector<4x32xf32>
    %1100 = arith.addf %1078, %1099 : vector<4x32xf32>
    %1101 = arith.addf %1100, %1096 : vector<4x32xf32>
    %1102 = arith.addf %1067, %1101 : vector<4x32xf32>
    %cst_262 = arith.constant dense<0.000000e+00> : vector<4x32xf32>
    %1103 = tpu.matmul %1096, %3, %cst_262 {dimension_numbers = #tpu.dot_dimension_numbers<[1], [0], [0], [1], [0, 0, 1, 1], [], []>} : vector<4x32xf32>, vector<32x32xf32>, vector<4x32xf32> -> vector<4x32xf32>
    %1104 = vector.broadcast %4 : vector<1x32xf32> to vector<4x32xf32>
    %1105 = arith.addf %1103, %1104 : vector<4x32xf32>
    %1106 = arith.addf %1087, %1093 : vector<4x32xf32>
    %cst_263 = arith.constant 2.000000e+00 : f32
    %1107 = vector.broadcast %cst_263 : f32 to vector<4x32xf32>
    %1108 = arith.mulf %1107, %1106 : vector<4x32xf32>
    %1109 = arith.addf %1081, %1108 : vector<4x32xf32>
    %1110 = arith.addf %1109, %1105 : vector<4x32xf32>
    %1111 = arith.mulf %1038, %1110 : vector<4x32xf32>
    %1112 = arith.addf %1077, %1111 : vector<4x32xf32>
    %1113 = math.tanh %1112 : vector<4x32xf32>
    %cst_264 = arith.constant dense<0.000000e+00> : vector<4x32xf32>
    %1114 = tpu.matmul %1113, %3, %cst_264 {dimension_numbers = #tpu.dot_dimension_numbers<[1], [0], [0], [1], [0, 0, 1, 1], [], []>} : vector<4x32xf32>, vector<32x32xf32>, vector<4x32xf32> -> vector<4x32xf32>
    %1115 = vector.broadcast %4 : vector<1x32xf32> to vector<4x32xf32>
    %1116 = arith.addf %1114, %1115 : vector<4x32xf32>
    %1117 = arith.mulf %1036, %1116 : vector<4x32xf32>
    %1118 = arith.addf %1112, %1117 : vector<4x32xf32>
    %1119 = math.tanh %1118 : vector<4x32xf32>
    %cst_265 = arith.constant dense<0.000000e+00> : vector<4x32xf32>
    %1120 = tpu.matmul %1119, %3, %cst_265 {dimension_numbers = #tpu.dot_dimension_numbers<[1], [0], [0], [1], [0, 0, 1, 1], [], []>} : vector<4x32xf32>, vector<32x32xf32>, vector<4x32xf32> -> vector<4x32xf32>
    %1121 = vector.broadcast %4 : vector<1x32xf32> to vector<4x32xf32>
    %1122 = arith.addf %1120, %1121 : vector<4x32xf32>
    %1123 = arith.mulf %1036, %1122 : vector<4x32xf32>
    %1124 = arith.addf %1112, %1123 : vector<4x32xf32>
    %1125 = math.tanh %1124 : vector<4x32xf32>
    %cst_266 = arith.constant dense<0.000000e+00> : vector<4x32xf32>
    %1126 = tpu.matmul %1125, %3, %cst_266 {dimension_numbers = #tpu.dot_dimension_numbers<[1], [0], [0], [1], [0, 0, 1, 1], [], []>} : vector<4x32xf32>, vector<32x32xf32>, vector<4x32xf32> -> vector<4x32xf32>
    %1127 = vector.broadcast %4 : vector<1x32xf32> to vector<4x32xf32>
    %1128 = arith.addf %1126, %1127 : vector<4x32xf32>
    %1129 = arith.mulf %1034, %1128 : vector<4x32xf32>
    %1130 = arith.addf %1112, %1129 : vector<4x32xf32>
    %1131 = math.tanh %1130 : vector<4x32xf32>
    %1132 = arith.addf %1119, %1125 : vector<4x32xf32>
    %cst_267 = arith.constant 2.000000e+00 : f32
    %1133 = vector.broadcast %cst_267 : f32 to vector<4x32xf32>
    %1134 = arith.mulf %1133, %1132 : vector<4x32xf32>
    %1135 = arith.addf %1113, %1134 : vector<4x32xf32>
    %1136 = arith.addf %1135, %1131 : vector<4x32xf32>
    %1137 = arith.addf %1102, %1136 : vector<4x32xf32>
    %cst_268 = arith.constant dense<0.000000e+00> : vector<4x32xf32>
    %1138 = tpu.matmul %1137, %5, %cst_268 {dimension_numbers = #tpu.dot_dimension_numbers<[1], [0], [0], [1], [0, 0, 1, 1], [], []>} : vector<4x32xf32>, vector<32x32xf32>, vector<4x32xf32> -> vector<4x32xf32>
    %1139 = vector.broadcast %8 : vector<1x32xf32> to vector<4x32xf32>
    %1140 = arith.addf %1138, %1139 : vector<4x32xf32>
    %1141 = arith.mulf %1038, %1140 : vector<4x32xf32>
    %1142 = arith.addf %1027, %1141 : vector<4x32xf32>
    %1143 = arith.index_cast %c7_i32 : i32 to index
    %c0_269 = arith.constant 0 : index
    %c0_270 = arith.constant 0 : index
    %1144 = vector.load %arg9[%1143, %c0_269, %c0_270] : memref<8x4x32xf32, #tpu.memory_space<vmem>>, vector<1x4x32xf32>
    %1145 = vector.shape_cast %1144 : vector<1x4x32xf32> to vector<4x32xf32>
    %1146 = vector.shape_cast %1142 : vector<4x32xf32> to vector<1x4x32xf32>
    tpu.vector_store %arg9[%1143, %c0_269, %c0_270], %1146 {strides = array<i32>} : memref<8x4x32xf32, #tpu.memory_space<vmem>>, vector<1x4x32xf32>,
    %c8_i32 = arith.constant 8 : i32
    return
  }
}

</mosaic_0001>

<bundles_post_ra>
// kernel: tpu_custom_call.1
= control target key start
LH: loop header
LB: loop body
LE: loop exit
PB: predicated region body
PF: predicated region fallthrough
CT: control target
= control target key end

     0   :  { %14 = vsyncpa [#allocation3], 0  ;;  %s13676_s0 = inlined_call_operand.vmem [shape: f32[8,4,128], index: 0, kind: input, shape index: {}]   ;;  %s13677_s1 = inlined_call_operand.vmem [shape: f32[8,4,1], index: 1, kind: input, shape index: {}]   ;;  %s13678_s2 = inlined_call_operand.hbm [shape: f32[32,128], index: 2, kind: input, shape index: {}]   ;;  %s13679_s3 = inlined_call_operand.hbm [shape: f32[32,32], index: 3, kind: input, shape index: {}]   ;;  %s13680_s4 = inlined_call_operand.vmem [shape: f32[1,32], index: 4, kind: input, shape index: {}]   ;;  %s13681_s5 = inlined_call_operand.hbm [shape: f32[32,32], index: 5, kind: input, shape index: {}]   ;;  %s13682_s6 = inlined_call_operand.vmem [shape: f32[1,32], index: 6, kind: input, shape index: {}]   ;;  %s13683_s7 = inlined_call_operand.hbm [shape: f32[32,32], index: 7, kind: input, shape index: {}]   ;;  %s13684_s8 = inlined_call_operand.vmem [shape: f32[1,32], index: 8, kind: input, shape index: {}]   ;;  %s13685_s9 = inlined_call_operand.hbm [shape: f32[8,4,32], index: 9, kind: output, shape index: {}]  }
   0x1   :  { %15 = vsyncpa [#allocation6], 0 }
   0x2   :  { %16 = vsyncpa [#allocation9], 0 }
   0x3   :  { %17 = vsyncpa [#allocation4], 0  ;;  %s12172_s30 = smov [#allocation5]   ;;  %s12173_s11 = smov [#allocation2]  }
   0x4   :  { %s39_s10 = sshll.u32 %s12172_s30, 4  ;;  %s27_s12 = sshll.u32 %s12173_s11, 4  ;;  %s40_s10 = int_to_ptr.vmem [resolvable:$true] %s39_s10  ;;  %s12237_s12 = int_to_ptr.vmem [resolvable:$true] %s27_s12 }
   0x5   :  { %s12054_s15 = scalar_lea.hbm %s13679_s3, 512 }
   0x6   :  { %p12055_p0 = scmp.ne.s32.totalorder %s13679_s3, %s12054_s15  ;;  %p12058_p1 = scmp.lt.u32.totalorder %s12054_s15, %s13679_s3 }
   0x8   :  { %p12060_p2 = pnand %p12058_p1, %p12055_p0 }
   0xa   :  { %12063 = shalt.err (!%p12060_p2)
}
   0xb   :  { %s12064_s20 = scalar_lea.vmem %s40_s10, 512  ;;  %p12069_p4 = scmp.lt.s32.totalorder %s40_s10, %s40_s10 }
   0xc   :  { %p12065_p3 = scmp.ne.s32.totalorder %s40_s10, %s12064_s20  ;;  %p12070_p5 = scmp.lt.s32.totalorder %s12064_s20, %s12064_s20 }
   0xe   :  { %p12071_p6 = por %p12070_p5, %p12069_p4 }
  0x10   :  { %p12072_p7 = pnand %p12071_p6, %p12065_p3 }
  0x12   :  { %12075 = shalt.err (!%p12072_p7)
}
  0x13   :  { %s12174_s21 = smov 128   ;;  %s12175_s22 = smov 8  }
  0x14   :  { %45 = dma.hbm_to_vmem [thread:$0]  %s13679_s3, 512, %s40_s10, [#allocation6], %s12174_s21, %s12174_s21, %s12175_s22  }
  0x15   :  { %s12076_s27 = scalar_lea.hbm %s13678_s2, 512 }
  0x16   :  { %p12077_p8 = scmp.ne.s32.totalorder %s13678_s2, %s12076_s27  ;;  %p12080_p9 = scmp.lt.u32.totalorder %s12076_s27, %s13678_s2 }
  0x18   :  { %p12082_p10 = pnand %p12080_p9, %p12077_p8 }
  0x1a   :  { %12085 = shalt.err (!%p12082_p10)
}
  0x1b   :  { %s12086_s13 = scalar_lea.vmem %s12237_s12, 512  ;;  %p12091_p12 = scmp.lt.s32.totalorder %s12237_s12, %s12237_s12 }
  0x1c   :  { %p12087_p11 = scmp.ne.s32.totalorder %s12237_s12, %s12086_s13  ;;  %p12092_p13 = scmp.lt.s32.totalorder %s12086_s13, %s12086_s13 }
  0x1e   :  { %p12093_p0 = por %p12092_p13, %p12091_p12 }
  0x20   :  { %p12094_p1 = pnand %p12093_p0, %p12087_p11 }
  0x22   :  { %12097 = shalt.err (!%p12094_p1)
}
  0x23   :  { %33 = dma.hbm_to_vmem [thread:$0]  %s13678_s2, 512, %s12237_s12, [#allocation3], %s12174_s21, %s12174_s21, %s12175_s22  }
  0x24   :  { %s12176_s14 = smov [#allocation7]   ;;  %s12177_s16 = smov [#allocation8]  }
  0x25   :  { %s53_s15 = sshll.u32 %s12176_s14, 4  ;;  %s67_s17 = sshll.u32 %s12177_s16, 4  ;;  %s54_s15 = int_to_ptr.vmem [resolvable:$true] %s53_s15  ;;  %s12274_s17 = int_to_ptr.vmem [resolvable:$true] %s67_s17 }
  0x26   :  { %s12098_s20 = scalar_lea.hbm %s13681_s5, 512 }
  0x27   :  { %p12099_p2 = scmp.ne.s32.totalorder %s13681_s5, %s12098_s20  ;;  %p12102_p3 = scmp.lt.u32.totalorder %s12098_s20, %s13681_s5 }
  0x29   :  { %p12104_p4 = pnand %p12102_p3, %p12099_p2 }
  0x2b   :  { %12107 = shalt.err (!%p12104_p4)
}
  0x2c   :  { %s12108_s2 = scalar_lea.vmem %s54_s15, 512  ;;  %p12113_p6 = scmp.lt.s32.totalorder %s54_s15, %s54_s15 }
  0x2d   :  { %p12109_p5 = scmp.ne.s32.totalorder %s54_s15, %s12108_s2  ;;  %p12114_p7 = scmp.lt.s32.totalorder %s12108_s2, %s12108_s2 }
  0x2f   :  { %p12115_p8 = por %p12114_p7, %p12113_p6 }
  0x31   :  { %p12116_p9 = pnand %p12115_p8, %p12109_p5 }
  0x33   :  { %12119 = shalt.err (!%p12116_p9)
}
  0x34   :  { %59 = dma.hbm_to_vmem [thread:$0]  %s13681_s5, 512, %s54_s15, [#allocation6], %s12174_s21, %s12174_s21, %s12175_s22  }
  0x35   :  { %s12120_s30 = scalar_lea.hbm %s13683_s7, 512 }
  0x36   :  { %p12121_p10 = scmp.ne.s32.totalorder %s13683_s7, %s12120_s30  ;;  %p12124_p11 = scmp.lt.u32.totalorder %s12120_s30, %s13683_s7 }
  0x38   :  { %p12126_p12 = pnand %p12124_p11, %p12121_p10 }
  0x3a   :  { %12129 = shalt.err (!%p12126_p12)
}
  0x3b   :  { %s12130_s14 = scalar_lea.vmem %s12274_s17, 512  ;;  %p12135_p0 = scmp.lt.s32.totalorder %s12274_s17, %s12274_s17 }
  0x3c   :  { %p12131_p13 = scmp.ne.s32.totalorder %s12274_s17, %s12130_s14  ;;  %p12136_p1 = scmp.lt.s32.totalorder %s12130_s14, %s12130_s14 }
  0x3e   :  { %p12137_p2 = por %p12136_p1, %p12135_p0 }
  0x40   :  { %p12138_p3 = pnand %p12137_p2, %p12131_p13 }
  0x42   :  { %12141 = shalt.err (!%p12138_p3)
}
  0x43   :  { %73 = dma.hbm_to_vmem [thread:$0]  %s13683_s7, 512, %s12274_s17, [#allocation9], %s12174_s21, %s12174_s21, %s12175_s22  }
  0x44   :  { %12164 = dma.done.wait [#allocation3], 512  }
  0x45   :  { %12165 = vsyncadd [#allocation3], 4294966784 }
  0x46   :  { %12166 = dma.done.wait [#allocation6], 1024  }
  0x47   :  { %12167 = vsyncadd [#allocation6], 4294966272 }
  0x48   :  { %12168 = dma.done.wait [#allocation9], 512  }
  0x49   :  { %12169 = vsyncadd [#allocation9], 4294966784  ;;  %v12178_v0 = vmov 0.0|0.0   ;;  %vm12179_vm0 = vmmov 0   ;;  %v12180_v1 = vmov 0.0   ;;  %v88_v2 = vld [vmem:[#allocation2] sm:$0xff] }
  0x4a   :  { %11120 = vmatprep.subr.bf16.mxu0 %v12178_v0  ;;  %9896 = vmatprep.mubr.msk.f32.mxu0 %vm12179_vm0, %v12180_v1  ;;  %v89_v3 = vld [vmem:[#allocation2 + $0x8] sm:$0xff]  ;;  %v90_v5 = vld [vmem:[#allocation2 + $0x10] sm:$0xff]  ;;  %v91_v6 = vld [vmem:[#allocation2 + $0x18] sm:$0xff]  ;;  %s12181_s22 = smov 64   ;;  %s12182_s16 = smov 32   ;;  %vm109_vm1 = vcmask 261120  }
  0x4b   :  { %11126 = vmatprep.subr.bf16.mxu1 %v12178_v0  ;;  %9907 = vmatprep.mubr.msk.f32.mxu1 %vm12179_vm0, %v12180_v1  ;;  %v12317_v4 = vpack.c.bf16 %v89_v3, %v88_v2  ;;  %v12320_v7 = vpack.c.bf16 %v91_v6, %v90_v5  ;;  %v97_v8 = vld [vmem:[#allocation7] sm:$0xff]  ;;  %v98_v9 = vld [vmem:[#allocation7 + $0x8] sm:$0xff]  ;;  %v99_v11 = vld [vmem:[#allocation7 + $0x10] sm:$0xff]  ;;  %v12183_v40 = vmov 0   ;;  %s12184_s2 = smov 96   ;;  %vm1254_vm2 = vcmask 257024  }
  0x4c   :  { %v12323_v10 = vpack.c.bf16 %v98_v9, %v97_v8  ;;  %v100_v12 = vld [vmem:[#allocation7 + $0x18] sm:$0xff]  ;;  %v108_v14 = vld [vmem:[%s13676_s0] sm:$0xf]  ;;  %v93_v30 = vld [vmem:[#allocation5 + $0x8] sm:$0xff]  ;;  %11807 = vset.pattern.permute.xlu0 %v12183_v40  ;;  %11808 = vset.pattern.permute.xlu1 %v12183_v40 }
  0x4d   :  { %11122 = vmatpush3.bf16.msra.mxu0 %v12317_v4  ;;  %v12328_v13 = vpack.c.bf16 %v100_v12, %v99_v11  ;;  %v92_v29 = vld [vmem:[#allocation5] sm:$0xff]  ;;  %v94_v31 = vld [vmem:[#allocation5 + $0x10] sm:$0xff]  ;;  %v95_v33 = vld [vmem:[#allocation5 + $0x18] sm:$0xff] }
  0x4e   :  { %11123 = vmatprep.subr.bf16.mxu0 %v12178_v0  ;;  %v12344_v32 = vpack.c.bf16 %v93_v30, %v92_v29  ;;  %v12347_v34 = vpack.c.bf16 %v95_v33, %v94_v31  ;;  %v209_v39 = vld [vmem:[%s13677_s1] sm:$0xf] }
  0x4f   :  { %v210_v41 = vmul.f32 0.33333334, %v209_v39  ;;  %v12370_v42 = vld [vmem:[%s13680_s4] ss:$0 sm:$0xff] }
  0x50   :  { %11128 = vmatpush3.bf16.msra.mxu1 %v12344_v32  ;;  %v12388_v48 = vld [vmem:[%s13682_s6] ss:$0 sm:$0xff] }
  0x51   :  { %11125 = vmatpush3.bf16.msra.mxu0 %v12320_v7  ;;  %11129 = vmatprep.subr.bf16.mxu1 %v12178_v0 }
  0x52   :  { %11132 = vmatprep.subr.bf16.mxu0 %v12178_v0 }
  0x54   :  { %9897 = vmatmul.mubr.f32.vlgmr.msra.gmra.mrb[0].mxu0 %v12180_v1  ;;  %11131 = vmatpush3.bf16.msra.mxu1 %v12347_v34 }
  0x55   :  { %11134 = vmatpush3.bf16.msra.mxu0 %v12323_v10  ;;  %9918 = vmatprep.mubr.msk.f32.mxu0 %vm12179_vm0, %v12180_v1 }
  0x56   :  { %11135 = vmatprep.subr.bf16.mxu0 %v12178_v0  ;;  %11138 = vmatprep.subr.bf16.mxu1 %v12178_v0 }
  0x59   :  { %11137 = vmatpush3.bf16.msra.mxu0 %v12328_v13 }
  0x5a   :  { %11144 = vmatprep.subr.bf16.mxu0 %v12178_v0 }
 0x127   :  { %v179_v15 = vpop.f32.mrb[0].mxu0 }
 0x128   :  { %v183_v16 = vadd.f32 %v179_v15, %v108_v14  ;;  %v9898_v17 = vpop.f32.mrb[1].mxu0 }
 0x12a   :  { %v9185_v18 = vmul.f32 -1.442695, %v183_v16 }
 0x12c   :  { %11809 = vpow2.f32 %v9185_v18 }
 0x136   :  { %v11810_v19 = vpop.eup %11809 }
 0x137   :  { %v187_v20 = vadd.f32 1.0, %v11810_v19 }
 0x139   :  { %11811 = vrcp.f32 %v187_v20 }
 0x143   :  { %v11812_v21 = vpop.eup %11811 }
 0x144   :  { %v190_v22 = vmul.f32 2.0, %v11812_v21  ;;  %v192_v26 = vmul.f32 0.0, %v11812_v21 }
 0x146   :  { %v9186_v23 = vadd.f32 -1.0, %v190_v22 }
 0x148   :  { %194 = vrot.lane.b32.xlu0 %v9186_v23, %s12181_s22 }
 0x1ba   :  { %v195_v24 = vpop.permute.xlu0 %194 }
 0x1bb   :  { %v197_v25 = vmul.f32 %v11812_v21, %v195_v24 }
 0x1bd   :  { %199 = vrot.lane.b32.xlu0 %v197_v25, %s12182_s16 }
 0x1c1   :  { %213 = vperm.xlu0 %11807, %v210_v41  }
 0x22f   :  { %v200_v27 = vpop.permute.xlu0 %199 }
 0x230   :  { %v12341_v28 = vadd.f32 %v200_v27, %v192_v26 }
 0x232   :  { %11813 = vtanh.f32 %v12341_v28 }
 0x23c   :  { %v11814_v35 = vpop.eup %11813 }
 0x23d   :  { %205 = vrot.lane.b32.xlu1 %v11814_v35, %s12181_s22 }
 0x240   :  { %v12383_v47 = vpop.permute.xlu0 %213 }
 0x241   :  { %v12391_v49 = vmul.f32 0.5, %v12383_v47  ;;  %v12427_v20 = vmul.f32 0.16666667, %v12383_v47 }
 0x2af   :  { %v206_v36 = vpop.permute.xlu1 %205 }
 0x2b0   :  { %v12353_v37 = vmul.f32 %v11812_v21, %v206_v36 }
 0x2b2   :  { %225 = vrot.lane.b32.xlu1 %v12353_v37, %s12182_s16 }
 0x324   :  { %v226_v38 = vpop.permute.xlu1 %225 }
 0x325   :  { %9908 = vmatmul.mubr.msk.f32.vlgmr.msra.gmra.mrb[0].mxu1 %vm109_vm1, %v226_v38 }
 0x326   :  { %11140 = vmatpush3.bf16.msra.mxu1 %v12323_v10  ;;  %9929 = vmatprep.mubr.msk.f32.mxu1 %vm12179_vm0, %v12180_v1 }
 0x327   :  { %11141 = vmatprep.subr.bf16.mxu1 %v12178_v0 }
 0x32a   :  { %11143 = vmatpush3.bf16.msra.mxu1 %v12328_v13 }
 0x32b   :  { %11150 = vmatprep.subr.bf16.mxu1 %v12178_v0 }
 0x3f8   :  { %v295_v43 = vpop.f32.mrb[0].mxu1 }
 0x3f9   :  { %v12373_v44 = vadd.f32 %v12370_v42, %v295_v43  ;;  %v9909_v45 = vpop.f32.mrb[1].mxu1 }
 0x3fb   :  { %11815 = vtanh.f32 %v12373_v44 }
 0x405   :  { %v11816_v46 = vpop.eup %11815 }
 0x406   :  { %9919 = vmatmul.mubr.msk.f32.vlgmr.msra.gmra.mrb[2].mxu0 %vm109_vm1, %v11816_v46 }
 0x407   :  { %11146 = vmatpush3.bf16.msra.mxu0 %v12323_v10  ;;  %9940 = vmatprep.mubr.msk.f32.mxu0 %vm12179_vm0, %v12180_v1 }
 0x408   :  { %11147 = vmatprep.subr.bf16.mxu0 %v12178_v0 }
 0x40b   :  { %11149 = vmatpush3.bf16.msra.mxu0 %v12328_v13 }
 0x40c   :  { %11156 = vmatprep.subr.bf16.mxu0 %v12178_v0 }
 0x4d9   :  { %v375_v50 = vpop.f32.mrb[2].mxu0 }
 0x4da   :  { %v376_v51 = vadd.f32 %v12388_v48, %v375_v50  ;;  %v9920_v52 = vpop.f32.mrb[3].mxu0 }
 0x4dc   :  { %v379_v53 = vmul.f32 %v376_v51, %v12391_v49 }
 0x4de   :  { %v380_v54 = vadd.f32 %v379_v53, %v12373_v44 }
 0x4e0   :  { %11817 = vtanh.f32 %v380_v54 }
 0x4ea   :  { %v11818_v55 = vpop.eup %11817 }
 0x4eb   :  { %9930 = vmatmul.mubr.msk.f32.vlgmr.msra.gmra.mrb[2].mxu1 %vm109_vm1, %v11818_v55 }
 0x4ec   :  { %11152 = vmatpush3.bf16.msra.mxu1 %v12323_v10  ;;  %9951 = vmatprep.mubr.msk.f32.mxu1 %vm12179_vm0, %v12180_v1 }
 0x4ed   :  { %11153 = vmatprep.subr.bf16.mxu1 %v12178_v0 }
 0x4f0   :  { %11155 = vmatpush3.bf16.msra.mxu1 %v12328_v13 }
 0x4f1   :  { %11162 = vmatprep.subr.bf16.mxu1 %v12178_v0 }
 0x5be   :  { %v451_v56 = vpop.f32.mrb[2].mxu1 }
 0x5bf   :  { %v452_v57 = vadd.f32 %v12388_v48, %v451_v56  ;;  %v9931_v58 = vpop.f32.mrb[3].mxu1 }
 0x5c1   :  { %v455_v59 = vmul.f32 %v452_v57, %v12391_v49 }
 0x5c3   :  { %v456_v60 = vadd.f32 %v455_v59, %v12373_v44 }
 0x5c5   :  { %11819 = vtanh.f32 %v456_v60 }
 0x5cf   :  { %v11820_v61 = vpop.eup %11819 }
 0x5d0   :  { %9941 = vmatmul.mubr.msk.f32.vlgmr.msra.gmra.mrb[4].mxu0 %vm109_vm1, %v11820_v61  ;;  %v534_v6 = vadd.f32 %v11820_v61, %v11818_v55 }
 0x5d1   :  { %11158 = vmatpush3.bf16.msra.mxu0 %v12323_v10  ;;  %9962 = vmatprep.mubr.msk.f32.mxu0 %vm12179_vm0, %v12180_v1 }
 0x5d2   :  { %11159 = vmatprep.subr.bf16.mxu0 %v12178_v0  ;;  %v535_v8 = vmul.f32 2.0, %v534_v6 }
 0x5d4   :  { %v536_v9 = vadd.f32 %v11816_v46, %v535_v8 }
 0x5d5   :  { %11161 = vmatpush3.bf16.msra.mxu0 %v12328_v13 }
 0x5d6   :  { %11168 = vmatprep.subr.bf16.mxu0 %v12178_v0 }
 0x6a3   :  { %v527_v62 = vpop.f32.mrb[4].mxu0 }
 0x6a4   :  { %v528_v63 = vadd.f32 %v12388_v48, %v527_v62  ;;  %v9942_v2 = vpop.f32.mrb[5].mxu0 }
 0x6a6   :  { %v531_v3 = vmul.f32 %v528_v63, %v12383_v47  ;;  %v612_v14 = vadd.f32 %v528_v63, %v452_v57 }
 0x6a8   :  { %v532_v5 = vadd.f32 %v531_v3, %v12373_v44  ;;  %v613_v15 = vmul.f32 2.0, %v612_v14 }
 0x6aa   :  { %11821 = vtanh.f32 %v532_v5  ;;  %v614_v18 = vadd.f32 %v613_v15, %v376_v51 }
 0x6b4   :  { %v11822_v11 = vpop.eup %11821 }
 0x6b5   :  { %9952 = vmatmul.mubr.msk.f32.vlgmr.msra.gmra.mrb[4].mxu1 %vm109_vm1, %v11822_v11  ;;  %v12417_v12 = vadd.f32 %v11822_v11, %v536_v9 }
 0x6b6   :  { %11164 = vmatpush3.bf16.msra.mxu1 %v12323_v10  ;;  %9973 = vmatprep.mubr.msk.f32.mxu1 %vm12179_vm0, %v12180_v1 }
 0x6b7   :  { %11165 = vmatprep.subr.bf16.mxu1 %v12178_v0 }
 0x6ba   :  { %11167 = vmatpush3.bf16.msra.mxu1 %v12328_v13 }
 0x6bb   :  { %11174 = vmatprep.subr.bf16.mxu1 %v12178_v0 }
 0x788   :  { %v608_v16 = vpop.f32.mrb[4].mxu1 }
 0x789   :  { %v609_v17 = vadd.f32 %v12388_v48, %v608_v16  ;;  %v9953_v19 = vpop.f32.mrb[5].mxu1 }
 0x78b   :  { %v615_v21 = vadd.f32 %v614_v18, %v609_v17 }
 0x78d   :  { %v616_v22 = vmul.f32 %v615_v21, %v12427_v20  ;;  %v102_v21 = vld [vmem:[#allocation8] sm:$0xff] }
 0x78f   :  { %v617_v23 = vadd.f32 %v616_v22, %v12373_v44  ;;  %v103_v22 = vld [vmem:[#allocation8 + $0x8] sm:$0xff] }
 0x791   :  { %11823 = vtanh.f32 %v617_v23 }
 0x79b   :  { %v11824_v24 = vpop.eup %11823 }
 0x79c   :  { %9963 = vmatmul.mubr.msk.f32.vlgmr.msra.gmra.mrb[6].mxu0 %vm109_vm1, %v11824_v24 }
 0x79d   :  { %11170 = vmatpush3.bf16.msra.mxu0 %v12323_v10  ;;  %9984 = vmatprep.mubr.msk.f32.mxu0 %vm12179_vm0, %v12180_v1 }
 0x79e   :  { %11171 = vmatprep.subr.bf16.mxu0 %v12178_v0 }
 0x7a1   :  { %11173 = vmatpush3.bf16.msra.mxu0 %v12328_v13 }
 0x7a2   :  { %11180 = vmatprep.subr.bf16.mxu0 %v12178_v0 }
 0x86f   :  { %v688_v25 = vpop.f32.mrb[6].mxu0 }
 0x870   :  { %v689_v26 = vadd.f32 %v12388_v48, %v688_v25  ;;  %v9964_v27 = vpop.f32.mrb[7].mxu0 }
 0x872   :  { %v692_v29 = vmul.f32 %v689_v26, %v12391_v49 }
 0x874   :  { %v693_v30 = vadd.f32 %v692_v29, %v617_v23 }
 0x876   :  { %11825 = vtanh.f32 %v693_v30 }
 0x880   :  { %v11826_v31 = vpop.eup %11825 }
 0x881   :  { %9974 = vmatmul.mubr.msk.f32.vlgmr.msra.gmra.mrb[6].mxu1 %vm109_vm1, %v11826_v31 }
 0x882   :  { %11176 = vmatpush3.bf16.msra.mxu1 %v12323_v10  ;;  %9995 = vmatprep.mubr.msk.f32.mxu1 %vm12179_vm0, %v12180_v1 }
 0x883   :  { %11177 = vmatprep.subr.bf16.mxu1 %v12178_v0 }
 0x886   :  { %11179 = vmatpush3.bf16.msra.mxu1 %v12328_v13 }
 0x887   :  { %11186 = vmatprep.subr.bf16.mxu1 %v12178_v0 }
 0x954   :  { %v764_v33 = vpop.f32.mrb[6].mxu1 }
 0x955   :  { %v765_v35 = vadd.f32 %v12388_v48, %v764_v33  ;;  %v9975_v36 = vpop.f32.mrb[7].mxu1 }
 0x957   :  { %v768_v38 = vmul.f32 %v765_v35, %v12391_v49 }
 0x959   :  { %v769_v39 = vadd.f32 %v768_v38, %v617_v23 }
 0x95b   :  { %11827 = vtanh.f32 %v769_v39 }
 0x965   :  { %v11828_v40 = vpop.eup %11827 }
 0x966   :  { %9985 = vmatmul.mubr.msk.f32.vlgmr.msra.gmra.mrb[8].mxu0 %vm109_vm1, %v11828_v40  ;;  %v847_v50 = vadd.f32 %v11828_v40, %v11826_v31 }
 0x967   :  { %11182 = vmatpush3.bf16.msra.mxu0 %v12323_v10  ;;  %10006 = vmatprep.mubr.msk.f32.mxu0 %vm12179_vm0, %v12180_v1 }
 0x968   :  { %11183 = vmatprep.subr.bf16.mxu0 %v12178_v0  ;;  %v848_v51 = vmul.f32 2.0, %v847_v50 }
 0x96a   :  { %v849_v52 = vadd.f32 %v11824_v24, %v848_v51  ;;  %v105_v24 = vld [vmem:[#allocation8 + $0x18] sm:$0xff] }
 0x96b   :  { %11185 = vmatpush3.bf16.msra.mxu0 %v12328_v13 }
 0x96c   :  { %11192 = vmatprep.subr.bf16.mxu0 %v12178_v0 }
 0xa39   :  { %v840_v41 = vpop.f32.mrb[8].mxu0 }
 0xa3a   :  { %v841_v43 = vadd.f32 %v12388_v48, %v840_v41  ;;  %v9986_v44 = vpop.f32.mrb[9].mxu0 }
 0xa3c   :  { %v844_v45 = vmul.f32 %v841_v43, %v12383_v47  ;;  %v925_v56 = vadd.f32 %v841_v43, %v765_v35  ;;  %v106_v43 = vld [vmem:[%s13684_s8] sm:$0x1] }
 0xa3d   :  { %v107_v44 = vmul.f32 18.0, %v106_v43 }
 0xa3e   :  { %v845_v46 = vadd.f32 %v844_v45, %v617_v23  ;;  %v926_v57 = vmul.f32 2.0, %v925_v56 }
 0xa40   :  { %11829 = vtanh.f32 %v845_v46  ;;  %v927_v60 = vadd.f32 %v926_v57, %v689_v26 }
 0xa4a   :  { %v11830_v53 = vpop.eup %11829 }
 0xa4b   :  { %9996 = vmatmul.mubr.msk.f32.vlgmr.msra.gmra.mrb[8].mxu1 %vm109_vm1, %v11830_v53  ;;  %v850_v54 = vadd.f32 %v11830_v53, %v849_v52 }
 0xa4c   :  { %11188 = vmatpush3.bf16.msra.mxu1 %v12323_v10  ;;  %10017 = vmatprep.mubr.msk.f32.mxu1 %vm12179_vm0, %v12180_v1 }
 0xa4d   :  { %11189 = vmatprep.subr.bf16.mxu1 %v12178_v0  ;;  %v12464_v55 = vadd.f32 %v850_v54, %v12417_v12 }
 0xa50   :  { %11191 = vmatpush3.bf16.msra.mxu1 %v12328_v13 }
 0xa51   :  { %11198 = vmatprep.subr.bf16.mxu1 %v12178_v0 }
 0xb1e   :  { %v921_v58 = vpop.f32.mrb[8].mxu1 }
 0xb1f   :  { %v922_v59 = vadd.f32 %v12388_v48, %v921_v58  ;;  %v9997_v61 = vpop.f32.mrb[9].mxu1 }
 0xb21   :  { %v928_v62 = vadd.f32 %v927_v60, %v922_v59 }
 0xb23   :  { %v929_v63 = vmul.f32 %v928_v62, %v12427_v20 }
 0xb25   :  { %v930_v2 = vadd.f32 %v929_v63, %v617_v23  ;;  %v104_v23 = vld [vmem:[#allocation8 + $0x10] sm:$0xff] }
 0xb26   :  { %v12494_v25 = vpack.c.bf16 %v105_v24, %v104_v23 }
 0xb27   :  { %11831 = vtanh.f32 %v930_v2 }
 0xb31   :  { %v11832_v3 = vpop.eup %11831 }
 0xb32   :  { %10007 = vmatmul.mubr.msk.f32.vlgmr.msra.gmra.mrb[10].mxu0 %vm109_vm1, %v11832_v3 }
 0xb33   :  { %11194 = vmatpush3.bf16.msra.mxu0 %v12323_v10  ;;  %10028 = vmatprep.mubr.msk.f32.mxu0 %vm12179_vm0, %v12180_v1 }
 0xb34   :  { %11195 = vmatprep.subr.bf16.mxu0 %v12178_v0 }
 0xb37   :  { %11197 = vmatpush3.bf16.msra.mxu0 %v12328_v13 }
 0xb38   :  { %11204 = vmatprep.subr.bf16.mxu0 %v12178_v0 }
 0xc05   :  { %v1001_v5 = vpop.f32.mrb[10].mxu0 }
 0xc06   :  { %v1002_v6 = vadd.f32 %v12388_v48, %v1001_v5  ;;  %v10008_v8 = vpop.f32.mrb[11].mxu0 }
 0xc08   :  { %v1005_v9 = vmul.f32 %v1002_v6, %v12391_v49 }
 0xc0a   :  { %v1006_v11 = vadd.f32 %v1005_v9, %v930_v2 }
 0xc0c   :  { %11833 = vtanh.f32 %v1006_v11  ;;  %v9206_v11 = vld [vmem:[%s13677_s1 + $0x4] sm:$0xf] }
 0xc16   :  { %v11834_v12 = vpop.eup %11833 }
 0xc17   :  { %10018 = vmatmul.mubr.msk.f32.vlgmr.msra.gmra.mrb[10].mxu1 %vm109_vm1, %v11834_v12 }
 0xc18   :  { %10039 = vmatprep.mubr.msk.f32.mxu1 %vm12179_vm0, %v12180_v1 }
 0xcea   :  { %v1077_v14 = vpop.f32.mrb[10].mxu1 }
 0xceb   :  { %v1078_v15 = vadd.f32 %v12388_v48, %v1077_v14  ;;  %v10019_v16 = vpop.f32.mrb[11].mxu1  ;;  %v1358_v14 = vmul.f32 0.33333334, %v9206_v11 }
 0xced   :  { %v1081_v17 = vmul.f32 %v1078_v15, %v12391_v49  ;;  %v12491_v49 = vpack.c.bf16 %v103_v22, %v102_v21 }
 0xcef   :  { %v1082_v18 = vadd.f32 %v1081_v17, %v930_v2  ;;  %11200 = vmatpush3.bf16.msra.mxu1 %v12491_v49 }
 0xcf0   :  { %11201 = vmatprep.subr.bf16.mxu1 %v12178_v0 }
 0xcf1   :  { %11835 = vtanh.f32 %v1082_v18 }
 0xcf3   :  { %11203 = vmatpush3.bf16.msra.mxu1 %v12494_v25 }
 0xcf4   :  { %11210 = vmatprep.subr.bf16.mxu1 %v12178_v0 }
 0xcfb   :  { %v11836_v19 = vpop.eup %11835 }
 0xcfc   :  { %10029 = vmatmul.mubr.msk.f32.vlgmr.msra.gmra.mrb[12].mxu0 %vm109_vm1, %v11836_v19  ;;  %v1160_v33 = vadd.f32 %v11836_v19, %v11834_v12 }
 0xcfd   :  { %11206 = vmatpush3.bf16.msra.mxu0 %v12317_v4  ;;  %10050 = vmatprep.mubr.msk.f32.mxu0 %vm12179_vm0, %v12180_v1 }
 0xcfe   :  { %11207 = vmatprep.subr.bf16.mxu0 %v12178_v0  ;;  %v1161_v35 = vmul.f32 2.0, %v1160_v33 }
 0xd00   :  { %v1162_v36 = vadd.f32 %v11832_v3, %v1161_v35 }
 0xd01   :  { %11209 = vmatpush3.bf16.msra.mxu0 %v12320_v7 }
 0xd02   :  { %11216 = vmatprep.subr.bf16.mxu0 %v12178_v0 }
 0xdcf   :  { %v1153_v26 = vpop.f32.mrb[12].mxu0 }
 0xdd0   :  { %v1154_v27 = vadd.f32 %v12388_v48, %v1153_v26  ;;  %v10030_v29 = vpop.f32.mrb[13].mxu0 }
 0xdd2   :  { %v1157_v30 = vmul.f32 %v1154_v27, %v12383_v47  ;;  %v1166_v47 = vlaneseq }
 0xdd4   :  { %v1158_v31 = vadd.f32 %v1157_v30, %v930_v2  ;;  %v1167_v41 = vshrl.u32 %v1166_v47, 7 }
 0xdd6   :  { %11837 = vtanh.f32 %v1158_v31  ;;  %v1168_v45 = vsub.s32 0, %v1167_v41 }
 0xdd8   :  { %v12512_v46 = vrot.slane %v107_v44, %v1168_v45 }
 0xde0   :  { %v11838_v38 = vpop.eup %11837 }
 0xde1   :  { %v1163_v39 = vadd.f32 %v11838_v38, %v1162_v36 }
 0xde3   :  { %v1164_v40 = vadd.f32 %v1163_v39, %v12464_v55 }
 0xde5   :  { %10040 = vmatmul.mubr.msk.f32.vlgmr.msra.gmra.mrb[12].mxu1 %vm109_vm1, %v1164_v40 }
 0xde6   :  { %11212 = vmatpush3.bf16.msra.mxu1 %v12344_v32  ;;  %10061 = vmatprep.mubr.msk.f32.mxu1 %vm12179_vm0, %v12180_v1 }
 0xde7   :  { %11213 = vmatprep.subr.bf16.mxu1 %v12178_v0 }
 0xdea   :  { %11215 = vmatpush3.bf16.msra.mxu1 %v12347_v34 }
 0xdeb   :  { %11222 = vmatprep.subr.bf16.mxu1 %v12178_v0 }
 0xeb8   :  { %v1240_v50 = vpop.f32.mrb[12].mxu1 }
 0xeb9   :  { %v1241_v51 = vadd.f32 %v1240_v50, %v12512_v46  ;;  %v10041_v52 = vpop.f32.mrb[13].mxu1 }
 0xebb   :  { %v1244_v53 = vmul.f32 %v1241_v51, %v12427_v20 }
 0xebd   :  { %1246 = vrot.lane.b32.xlu1 %v1244_v53, %s12184_s2 }
 0xf2f   :  { %v1247_v54 = vpop.permute.xlu1 %1246 }
 0xf30   :  { %v1249_v55 = vadd.f32 %v1247_v54, %v12353_v37  ;;  %v9202_v37 = vld [vmem:[%s13676_s0 + $0x4] sm:$0xf] }
 0xf32   :  { %1251 = vrot.lane.b32.xlu1 %v1249_v55, %s12182_s16 }
 0xfa4   :  { %v1252_v56 = vpop.permute.xlu1 %1251 }
 0xfa5   :  { %1255 = vst.msk [vmem:[#allocation10] sm:$0xf] %vm1254_vm2, %v1252_v56  ;;  %10051 = vmatmul.mubr.msk.f32.vlgmr.msra.gmra.mrb[14].mxu0 %vm109_vm1, %v1252_v56 }
 0xfa6   :  { %11218 = vmatpush3.bf16.msra.mxu0 %v12323_v10  ;;  %10072 = vmatprep.mubr.msk.f32.mxu0 %vm12179_vm0, %v12180_v1 }
 0xfa7   :  { %11219 = vmatprep.subr.bf16.mxu0 %v12178_v0 }
 0xfaa   :  { %11221 = vmatpush3.bf16.msra.mxu0 %v12328_v13 }
 0xfab   :  { %11228 = vmatprep.subr.bf16.mxu0 %v12178_v0 }
0x1078   :  { %v1326_v20 = vpop.f32.mrb[14].mxu0 }
0x1079   :  { %v1330_v57 = vadd.f32 %v9202_v37, %v1326_v20  ;;  %v10052_v58 = vpop.f32.mrb[15].mxu0 }
0x107b   :  { %v9204_v59 = vmul.f32 -1.442695, %v1330_v57 }
0x107d   :  { %11839 = vpow2.f32 %v9204_v59 }
0x1087   :  { %v11840_v60 = vpop.eup %11839 }
0x1088   :  { %v1334_v61 = vadd.f32 1.0, %v11840_v60 }
0x108a   :  { %11841 = vrcp.f32 %v1334_v61 }
0x1094   :  { %v11842_v62 = vpop.eup %11841 }
0x1095   :  { %v1337_v63 = vmul.f32 2.0, %v11842_v62  ;;  %v1339_v6 = vmul.f32 %v11842_v62, %v12341_v28 }
0x1097   :  { %v9205_v2 = vadd.f32 -1.0, %v1337_v63 }
0x1099   :  { %1341 = vrot.lane.b32.xlu0 %v9205_v2, %s12181_s22 }
0x110b   :  { %v1342_v3 = vpop.permute.xlu0 %1341 }
0x110c   :  { %v1344_v5 = vmul.f32 %v11842_v62, %v1342_v3 }
0x110e   :  { %1346 = vrot.lane.b32.xlu1 %v1344_v5, %s12182_s16 }
0x1180   :  { %v1347_v8 = vpop.permute.xlu1 %1346 }
0x1181   :  { %v12533_v9 = vadd.f32 %v1347_v8, %v1339_v6 }
0x1183   :  { %11843 = vtanh.f32 %v12533_v9 }
0x118d   :  { %v11844_v12 = vpop.eup %11843 }
0x118e   :  { %1352 = vrot.lane.b32.xlu0 %v11844_v12, %s12181_s22 }
0x1192   :  { %1361 = vperm.xlu0 %11807, %v1358_v14  }
0x1200   :  { %v1353_v15 = vpop.permute.xlu0 %1352 }
0x1201   :  { %v12540_v16 = vmul.f32 %v11842_v62, %v1353_v15 }
0x1203   :  { %1367 = vrot.lane.b32.xlu1 %v12540_v16, %s12182_s16 }
0x1211   :  { %v12562_v22 = vpop.permute.xlu0 %1361 }
0x1212   :  { %v12565_v24 = vmul.f32 0.5, %v12562_v22  ;;  %v12601_v59 = vmul.f32 0.16666667, %v12562_v22 }
0x1275   :  { %v1368_v28 = vpop.permute.xlu1 %1367 }
0x1276   :  { %10062 = vmatmul.mubr.msk.f32.vlgmr.msra.gmra.mrb[14].mxu1 %vm109_vm1, %v1368_v28 }
0x1277   :  { %11224 = vmatpush3.bf16.msra.mxu1 %v12323_v10  ;;  %10083 = vmatprep.mubr.msk.f32.mxu1 %vm12179_vm0, %v12180_v1 }
0x1278   :  { %11225 = vmatprep.subr.bf16.mxu1 %v12178_v0 }
0x127b   :  { %11227 = vmatpush3.bf16.msra.mxu1 %v12328_v13 }
0x127c   :  { %11234 = vmatprep.subr.bf16.mxu1 %v12178_v0 }
0x1349   :  { %v1437_v17 = vpop.f32.mrb[14].mxu1 }
0x134a   :  { %v12552_v18 = vadd.f32 %v12370_v42, %v1437_v17  ;;  %v10063_v19 = vpop.f32.mrb[15].mxu1 }
0x134c   :  { %11845 = vtanh.f32 %v12552_v18 }
0x1356   :  { %v11846_v21 = vpop.eup %11845 }
0x1357   :  { %10073 = vmatmul.mubr.msk.f32.vlgmr.msra.gmra.mrb[16].mxu0 %vm109_vm1, %v11846_v21 }
0x1358   :  { %11230 = vmatpush3.bf16.msra.mxu0 %v12323_v10  ;;  %10094 = vmatprep.mubr.msk.f32.mxu0 %vm12179_vm0, %v12180_v1 }
0x1359   :  { %11231 = vmatprep.subr.bf16.mxu0 %v12178_v0 }
0x135c   :  { %11233 = vmatpush3.bf16.msra.mxu0 %v12328_v13 }
0x135d   :  { %11240 = vmatprep.subr.bf16.mxu0 %v12178_v0 }
0x142a   :  { %v1511_v23 = vpop.f32.mrb[16].mxu0 }
0x142b   :  { %v1512_v26 = vadd.f32 %v12388_v48, %v1511_v23  ;;  %v10074_v27 = vpop.f32.mrb[17].mxu0 }
0x142d   :  { %v1515_v29 = vmul.f32 %v1512_v26, %v12565_v24 }
0x142f   :  { %v1516_v30 = vadd.f32 %v1515_v29, %v12552_v18 }
0x1431   :  { %11847 = vtanh.f32 %v1516_v30 }
0x143b   :  { %v11848_v31 = vpop.eup %11847 }
0x143c   :  { %10084 = vmatmul.mubr.msk.f32.vlgmr.msra.gmra.mrb[16].mxu1 %vm109_vm1, %v11848_v31 }
0x143d   :  { %11236 = vmatpush3.bf16.msra.mxu1 %v12323_v10  ;;  %10105 = vmatprep.mubr.msk.f32.mxu1 %vm12179_vm0, %v12180_v1 }
0x143e   :  { %11237 = vmatprep.subr.bf16.mxu1 %v12178_v0 }
0x1441   :  { %11239 = vmatpush3.bf16.msra.mxu1 %v12328_v13 }
0x1442   :  { %11246 = vmatprep.subr.bf16.mxu1 %v12178_v0 }
0x150f   :  { %v1587_v33 = vpop.f32.mrb[16].mxu1 }
0x1510   :  { %v1588_v35 = vadd.f32 %v12388_v48, %v1587_v33  ;;  %v10085_v36 = vpop.f32.mrb[17].mxu1 }
0x1512   :  { %v1591_v38 = vmul.f32 %v1588_v35, %v12565_v24 }
0x1514   :  { %v1592_v39 = vadd.f32 %v1591_v38, %v12552_v18 }
0x1516   :  { %11849 = vtanh.f32 %v1592_v39 }
0x1520   :  { %v11850_v40 = vpop.eup %11849 }
0x1521   :  { %10095 = vmatmul.mubr.msk.f32.vlgmr.msra.gmra.mrb[18].mxu0 %vm109_vm1, %v11850_v40  ;;  %v1670_v50 = vadd.f32 %v11850_v40, %v11848_v31 }
0x1522   :  { %11242 = vmatpush3.bf16.msra.mxu0 %v12323_v10  ;;  %10116 = vmatprep.mubr.msk.f32.mxu0 %vm12179_vm0, %v12180_v1 }
0x1523   :  { %11243 = vmatprep.subr.bf16.mxu0 %v12178_v0  ;;  %v1671_v51 = vmul.f32 2.0, %v1670_v50 }
0x1525   :  { %v1672_v52 = vadd.f32 %v11846_v21, %v1671_v51 }
0x1526   :  { %11245 = vmatpush3.bf16.msra.mxu0 %v12328_v13 }
0x1527   :  { %11252 = vmatprep.subr.bf16.mxu0 %v12178_v0 }
0x15f4   :  { %v1663_v47 = vpop.f32.mrb[18].mxu0 }
0x15f5   :  { %v1664_v41 = vadd.f32 %v12388_v48, %v1663_v47  ;;  %v10096_v43 = vpop.f32.mrb[19].mxu0 }
0x15f7   :  { %v1667_v44 = vmul.f32 %v1664_v41, %v12562_v22  ;;  %v1748_v55 = vadd.f32 %v1664_v41, %v1588_v35 }
0x15f9   :  { %v1668_v45 = vadd.f32 %v1667_v44, %v12552_v18  ;;  %v1749_v56 = vmul.f32 2.0, %v1748_v55 }
0x15fb   :  { %11851 = vtanh.f32 %v1668_v45  ;;  %v1750_v57 = vadd.f32 %v1749_v56, %v1512_v26 }
0x1605   :  { %v11852_v53 = vpop.eup %11851 }
0x1606   :  { %10106 = vmatmul.mubr.msk.f32.vlgmr.msra.gmra.mrb[18].mxu1 %vm109_vm1, %v11852_v53  ;;  %v12591_v54 = vadd.f32 %v11852_v53, %v1672_v52 }
0x1607   :  { %11248 = vmatpush3.bf16.msra.mxu1 %v12323_v10  ;;  %10127 = vmatprep.mubr.msk.f32.mxu1 %vm12179_vm0, %v12180_v1 }
0x1608   :  { %11249 = vmatprep.subr.bf16.mxu1 %v12178_v0 }
0x160b   :  { %11251 = vmatpush3.bf16.msra.mxu1 %v12328_v13 }
0x160c   :  { %11258 = vmatprep.subr.bf16.mxu1 %v12178_v0 }
0x16d9   :  { %v1744_v37 = vpop.f32.mrb[18].mxu1 }
0x16da   :  { %v1745_v20 = vadd.f32 %v12388_v48, %v1744_v37  ;;  %v10107_v58 = vpop.f32.mrb[19].mxu1 }
0x16dc   :  { %v1751_v60 = vadd.f32 %v1750_v57, %v1745_v20 }
0x16de   :  { %v1752_v61 = vmul.f32 %v1751_v60, %v12601_v59 }
0x16e0   :  { %v1753_v62 = vadd.f32 %v1752_v61, %v12552_v18 }
0x16e2   :  { %11853 = vtanh.f32 %v1753_v62 }
0x16ec   :  { %v11854_v63 = vpop.eup %11853 }
0x16ed   :  { %10117 = vmatmul.mubr.msk.f32.vlgmr.msra.gmra.mrb[20].mxu0 %vm109_vm1, %v11854_v63 }
0x16ee   :  { %11254 = vmatpush3.bf16.msra.mxu0 %v12323_v10  ;;  %10138 = vmatprep.mubr.msk.f32.mxu0 %vm12179_vm0, %v12180_v1 }
0x16ef   :  { %11255 = vmatprep.subr.bf16.mxu0 %v12178_v0 }
0x16f2   :  { %11257 = vmatpush3.bf16.msra.mxu0 %v12328_v13 }
0x16f3   :  { %11264 = vmatprep.subr.bf16.mxu0 %v12178_v0 }
0x17c0   :  { %v1824_v2 = vpop.f32.mrb[20].mxu0 }
0x17c1   :  { %v1825_v3 = vadd.f32 %v12388_v48, %v1824_v2  ;;  %v10118_v5 = vpop.f32.mrb[21].mxu0 }
0x17c3   :  { %v1828_v6 = vmul.f32 %v1825_v3, %v12565_v24 }
0x17c5   :  { %v1829_v8 = vadd.f32 %v1828_v6, %v1753_v62 }
0x17c7   :  { %11855 = vtanh.f32 %v1829_v8 }
0x17d1   :  { %v11856_v11 = vpop.eup %11855 }
0x17d2   :  { %10128 = vmatmul.mubr.msk.f32.vlgmr.msra.gmra.mrb[20].mxu1 %vm109_vm1, %v11856_v11 }
0x17d3   :  { %11260 = vmatpush3.bf16.msra.mxu1 %v12323_v10  ;;  %10149 = vmatprep.mubr.msk.f32.mxu1 %vm12179_vm0, %v12180_v1 }
0x17d4   :  { %11261 = vmatprep.subr.bf16.mxu1 %v12178_v0 }
0x17d7   :  { %11263 = vmatpush3.bf16.msra.mxu1 %v12328_v13 }
0x17d8   :  { %11270 = vmatprep.subr.bf16.mxu1 %v12178_v0 }
0x18a5   :  { %v1900_v12 = vpop.f32.mrb[20].mxu1 }
0x18a6   :  { %v1901_v14 = vadd.f32 %v12388_v48, %v1900_v12  ;;  %v10129_v15 = vpop.f32.mrb[21].mxu1 }
0x18a8   :  { %v1904_v28 = vmul.f32 %v1901_v14, %v12565_v24 }
0x18aa   :  { %v1905_v17 = vadd.f32 %v1904_v28, %v1753_v62 }
0x18ac   :  { %11857 = vtanh.f32 %v1905_v17 }
0x18b6   :  { %v11858_v18 = vpop.eup %11857 }
0x18b7   :  { %10139 = vmatmul.mubr.msk.f32.vlgmr.msra.gmra.mrb[22].mxu0 %vm109_vm1, %v11858_v18  ;;  %v1983_v29 = vadd.f32 %v11858_v18, %v11856_v11 }
0x18b8   :  { %11266 = vmatpush3.bf16.msra.mxu0 %v12323_v10  ;;  %10160 = vmatprep.mubr.msk.f32.mxu0 %vm12179_vm0, %v12180_v1 }
0x18b9   :  { %11267 = vmatprep.subr.bf16.mxu0 %v12178_v0  ;;  %v1984_v30 = vmul.f32 2.0, %v1983_v29 }
0x18bb   :  { %v1985_v31 = vadd.f32 %v11854_v63, %v1984_v30 }
0x18bc   :  { %11269 = vmatpush3.bf16.msra.mxu0 %v12328_v13 }
0x18bd   :  { %11276 = vmatprep.subr.bf16.mxu0 %v12178_v0 }
0x198a   :  { %v1976_v19 = vpop.f32.mrb[22].mxu0 }
0x198b   :  { %v1977_v21 = vadd.f32 %v12388_v48, %v1976_v19  ;;  %v10140_v23 = vpop.f32.mrb[23].mxu0 }
0x198d   :  { %v1980_v26 = vmul.f32 %v1977_v21, %v12562_v22  ;;  %v2061_v38 = vadd.f32 %v1977_v21, %v1901_v14 }
0x198f   :  { %v1981_v27 = vadd.f32 %v1980_v26, %v1753_v62  ;;  %v2062_v39 = vmul.f32 2.0, %v2061_v38 }
0x1991   :  { %11859 = vtanh.f32 %v1981_v27  ;;  %v2063_v41 = vadd.f32 %v2062_v39, %v1825_v3 }
0x199b   :  { %v11860_v33 = vpop.eup %11859 }
0x199c   :  { %10150 = vmatmul.mubr.msk.f32.vlgmr.msra.gmra.mrb[22].mxu1 %vm109_vm1, %v11860_v33  ;;  %v1986_v35 = vadd.f32 %v11860_v33, %v1985_v31 }
0x199d   :  { %11272 = vmatpush3.bf16.msra.mxu1 %v12323_v10  ;;  %10171 = vmatprep.mubr.msk.f32.mxu1 %vm12179_vm0, %v12180_v1 }
0x199e   :  { %11273 = vmatprep.subr.bf16.mxu1 %v12178_v0  ;;  %v1987_v36 = vadd.f32 %v1986_v35, %v12591_v54 }
0x19a1   :  { %11275 = vmatpush3.bf16.msra.mxu1 %v12328_v13 }
0x19a2   :  { %11282 = vmatprep.subr.bf16.mxu1 %v12178_v0 }
0x1a6f   :  { %v2057_v40 = vpop.f32.mrb[22].mxu1 }
0x1a70   :  { %v2058_v47 = vadd.f32 %v12388_v48, %v2057_v40  ;;  %v10151_v43 = vpop.f32.mrb[23].mxu1 }
0x1a72   :  { %v2064_v44 = vadd.f32 %v2063_v41, %v2058_v47 }
0x1a74   :  { %v2065_v45 = vmul.f32 %v2064_v44, %v12601_v59 }
0x1a76   :  { %v2066_v50 = vadd.f32 %v2065_v45, %v1753_v62 }
0x1a78   :  { %11861 = vtanh.f32 %v2066_v50 }
0x1a82   :  { %v11862_v51 = vpop.eup %11861 }
0x1a83   :  { %10161 = vmatmul.mubr.msk.f32.vlgmr.msra.gmra.mrb[24].mxu0 %vm109_vm1, %v11862_v51 }
0x1a84   :  { %11278 = vmatpush3.bf16.msra.mxu0 %v12323_v10  ;;  %10182 = vmatprep.mubr.msk.f32.mxu0 %vm12179_vm0, %v12180_v1 }
0x1a85   :  { %11279 = vmatprep.subr.bf16.mxu0 %v12178_v0 }
0x1a88   :  { %11281 = vmatpush3.bf16.msra.mxu0 %v12328_v13 }
0x1a89   :  { %11288 = vmatprep.subr.bf16.mxu0 %v12178_v0 }
0x1b56   :  { %v2137_v52 = vpop.f32.mrb[24].mxu0 }
0x1b57   :  { %v2138_v53 = vadd.f32 %v12388_v48, %v2137_v52  ;;  %v10162_v54 = vpop.f32.mrb[25].mxu0 }
0x1b59   :  { %v2141_v55 = vmul.f32 %v2138_v53, %v12565_v24 }
0x1b5b   :  { %v2142_v56 = vadd.f32 %v2141_v55, %v2066_v50 }
0x1b5d   :  { %11863 = vtanh.f32 %v2142_v56 }
0x1b67   :  { %v11864_v37 = vpop.eup %11863 }
0x1b68   :  { %10172 = vmatmul.mubr.msk.f32.vlgmr.msra.gmra.mrb[24].mxu1 %vm109_vm1, %v11864_v37 }
0x1b69   :  { %11284 = vmatpush3.bf16.msra.mxu1 %v12491_v49  ;;  %10193 = vmatprep.mubr.msk.f32.mxu1 %vm12179_vm0, %v12180_v1 }
0x1b6a   :  { %11285 = vmatprep.subr.bf16.mxu1 %v12178_v0 }
0x1b6d   :  { %11287 = vmatpush3.bf16.msra.mxu1 %v12494_v25 }
0x1b6e   :  { %11294 = vmatprep.subr.bf16.mxu1 %v12178_v0 }
0x1c3b   :  { %v2213_v20 = vpop.f32.mrb[24].mxu1 }
0x1c3c   :  { %v2214_v57 = vadd.f32 %v12388_v48, %v2213_v20  ;;  %v10173_v58 = vpop.f32.mrb[25].mxu1 }
0x1c3e   :  { %v2217_v60 = vmul.f32 %v2214_v57, %v12565_v24 }
0x1c40   :  { %v2218_v61 = vadd.f32 %v2217_v60, %v2066_v50 }
0x1c42   :  { %11865 = vtanh.f32 %v2218_v61 }
0x1c4c   :  { %v11866_v62 = vpop.eup %11865 }
0x1c4d   :  { %10183 = vmatmul.mubr.msk.f32.vlgmr.msra.gmra.mrb[26].mxu0 %vm109_vm1, %v11866_v62  ;;  %v2296_v6 = vadd.f32 %v11866_v62, %v11864_v37 }
0x1c4e   :  { %11290 = vmatpush3.bf16.msra.mxu0 %v12317_v4  ;;  %10204 = vmatprep.mubr.msk.f32.mxu0 %vm12179_vm0, %v12180_v1 }
0x1c4f   :  { %11291 = vmatprep.subr.bf16.mxu0 %v12178_v0  ;;  %v2297_v8 = vmul.f32 2.0, %v2296_v6 }
0x1c51   :  { %v2298_v11 = vadd.f32 %v11862_v51, %v2297_v8 }
0x1c52   :  { %11293 = vmatpush3.bf16.msra.mxu0 %v12320_v7 }
0x1c53   :  { %11300 = vmatprep.subr.bf16.mxu0 %v12178_v0 }
0x1d20   :  { %v2289_v63 = vpop.f32.mrb[26].mxu0 }
0x1d21   :  { %v2290_v2 = vadd.f32 %v12388_v48, %v2289_v63  ;;  %v10184_v24 = vpop.f32.mrb[27].mxu0 }
0x1d23   :  { %v2293_v3 = vmul.f32 %v2290_v2, %v12562_v22 }
0x1d25   :  { %v2294_v5 = vadd.f32 %v2293_v3, %v2066_v50 }
0x1d27   :  { %11867 = vtanh.f32 %v2294_v5 }
0x1d31   :  { %v11868_v12 = vpop.eup %11867 }
0x1d32   :  { %v2299_v14 = vadd.f32 %v11868_v12, %v2298_v11 }
0x1d34   :  { %v2300_v15 = vadd.f32 %v2299_v14, %v1987_v36 }
0x1d36   :  { %10194 = vmatmul.mubr.msk.f32.vlgmr.msra.gmra.mrb[26].mxu1 %vm109_vm1, %v2300_v15 }
0x1d37   :  { %11296 = vmatpush3.bf16.msra.mxu1 %v12344_v32  ;;  %10215 = vmatprep.mubr.msk.f32.mxu1 %vm12179_vm0, %v12180_v1 }
0x1d38   :  { %11297 = vmatprep.subr.bf16.mxu1 %v12178_v0 }
0x1d3b   :  { %11299 = vmatpush3.bf16.msra.mxu1 %v12347_v34 }
0x1d3c   :  { %11306 = vmatprep.subr.bf16.mxu1 %v12178_v0 }
0x1e09   :  { %v2370_v22 = vpop.f32.mrb[26].mxu1 }
0x1e0a   :  { %v2371_v28 = vadd.f32 %v2370_v22, %v12512_v46  ;;  %v10195_v17 = vpop.f32.mrb[27].mxu1 }
0x1e0c   :  { %v2374_v18 = vmul.f32 %v2371_v28, %v12601_v59 }
0x1e0e   :  { %2376 = vrot.lane.b32.xlu1 %v2374_v18, %s12184_s2 }
0x1e80   :  { %v2377_v19 = vpop.permute.xlu1 %2376 }
0x1e81   :  { %v2379_v21 = vadd.f32 %v2377_v19, %v12540_v16  ;;  %v9220_v16 = vld [vmem:[%s13676_s0 + $0x8] sm:$0xf] }
0x1e83   :  { %2381 = vrot.lane.b32.xlu0 %v2379_v21, %s12182_s16 }
0x1ef5   :  { %v2382_v23 = vpop.permute.xlu0 %2381 }
0x1ef6   :  { %2385 = vst.msk [vmem:[#allocation10 + $0x4] sm:$0xf] %vm1254_vm2, %v2382_v23  ;;  %10205 = vmatmul.mubr.msk.f32.vlgmr.msra.gmra.mrb[28].mxu0 %vm109_vm1, %v2382_v23  ;;  %v12764_v23 = vld [vmem:[%s13682_s6] ss:$0 sm:$0xff] }
0x1ef7   :  { %11302 = vmatpush3.bf16.msra.mxu0 %v12323_v10  ;;  %10226 = vmatprep.mubr.msk.f32.mxu0 %vm12179_vm0, %v12180_v1 }
0x1ef8   :  { %11303 = vmatprep.subr.bf16.mxu0 %v12178_v0 }
0x1efb   :  { %11305 = vmatpush3.bf16.msra.mxu0 %v12328_v13 }
0x1efc   :  { %11312 = vmatprep.subr.bf16.mxu0 %v12178_v0 }
0x1fc9   :  { %v2456_v59 = vpop.f32.mrb[28].mxu0 }
0x1fca   :  { %v2460_v26 = vadd.f32 %v9220_v16, %v2456_v59  ;;  %v10206_v27 = vpop.f32.mrb[29].mxu0 }
0x1fcc   :  { %v9222_v29 = vmul.f32 -1.442695, %v2460_v26 }
0x1fce   :  { %11869 = vpow2.f32 %v9222_v29 }
0x1fd8   :  { %v11870_v30 = vpop.eup %11869 }
0x1fd9   :  { %v2464_v31 = vadd.f32 1.0, %v11870_v30 }
0x1fdb   :  { %11871 = vrcp.f32 %v2464_v31 }
0x1fe5   :  { %v11872_v33 = vpop.eup %11871 }
0x1fe6   :  { %v2467_v35 = vmul.f32 2.0, %v11872_v33  ;;  %v2469_v40 = vmul.f32 %v11872_v33, %v12533_v9  ;;  %v9224_v9 = vld [vmem:[%s13677_s1 + $0x8] sm:$0xf] }
0x1fe7   :  { %v2488_v51 = vmul.f32 0.33333334, %v9224_v9 }
0x1fe8   :  { %v9223_v36 = vadd.f32 -1.0, %v2467_v35 }
0x1fea   :  { %2471 = vrot.lane.b32.xlu1 %v9223_v36, %s12181_s22 }
0x205c   :  { %v2472_v38 = vpop.permute.xlu1 %2471 }
0x205d   :  { %v2474_v39 = vmul.f32 %v11872_v33, %v2472_v38 }
0x205f   :  { %2476 = vrot.lane.b32.xlu0 %v2474_v39, %s12182_s16 }
0x20d1   :  { %v2477_v47 = vpop.permute.xlu0 %2476 }
0x20d2   :  { %v12695_v41 = vadd.f32 %v2477_v47, %v2469_v40 }
0x20d4   :  { %11873 = vtanh.f32 %v12695_v41 }
0x20de   :  { %v11874_v43 = vpop.eup %11873 }
0x20df   :  { %2482 = vrot.lane.b32.xlu1 %v11874_v43, %s12181_s22 }
0x20e3   :  { %2491 = vperm.xlu1 %11808, %v2488_v51  }
0x2151   :  { %v2483_v44 = vpop.permute.xlu1 %2482 }
0x2152   :  { %v12699_v45 = vmul.f32 %v11872_v33, %v2483_v44 }
0x2154   :  { %2497 = vrot.lane.b32.xlu0 %v12699_v45, %s12182_s16 }
0x2162   :  { %v12724_v56 = vpop.permute.xlu1 %2491 }
0x2163   :  { %v12768_v27 = vmul.f32 0.16666667, %v12724_v56 }
0x21c6   :  { %v2498_v50 = vpop.permute.xlu0 %2497 }
0x21c7   :  { %10216 = vmatmul.mubr.msk.f32.vlgmr.msra.gmra.mrb[28].mxu1 %vm109_vm1, %v2498_v50 }
0x21c8   :  { %11308 = vmatpush3.bf16.msra.mxu1 %v12323_v10  ;;  %10237 = vmatprep.mubr.msk.f32.mxu1 %vm12179_vm0, %v12180_v1 }
0x21c9   :  { %11309 = vmatprep.subr.bf16.mxu1 %v12178_v0 }
0x21cc   :  { %11311 = vmatpush3.bf16.msra.mxu1 %v12328_v13 }
0x21cd   :  { %11318 = vmatprep.subr.bf16.mxu1 %v12178_v0 }
0x229a   :  { %v2567_v52 = vpop.f32.mrb[28].mxu1 }
0x229b   :  { %v12714_v53 = vadd.f32 %v12370_v42, %v2567_v52  ;;  %v10217_v54 = vpop.f32.mrb[29].mxu1  ;;  %v12727_v42 = vmul.f32 0.5, %v12724_v56 }
0x229d   :  { %11875 = vtanh.f32 %v12714_v53 }
0x22a7   :  { %v11876_v55 = vpop.eup %11875 }
0x22a8   :  { %10227 = vmatmul.mubr.msk.f32.vlgmr.msra.gmra.mrb[30].mxu0 %vm109_vm1, %v11876_v55 }
0x22a9   :  { %11314 = vmatpush3.bf16.msra.mxu0 %v12323_v10  ;;  %10248 = vmatprep.mubr.msk.f32.mxu0 %vm12179_vm0, %v12180_v1 }
0x22aa   :  { %11315 = vmatprep.subr.bf16.mxu0 %v12178_v0 }
0x22ad   :  { %11317 = vmatpush3.bf16.msra.mxu0 %v12328_v13 }
0x22ae   :  { %11324 = vmatprep.subr.bf16.mxu0 %v12178_v0 }
0x237b   :  { %v2641_v37 = vpop.f32.mrb[30].mxu0 }
0x237c   :  { %v2642_v20 = vadd.f32 %v12388_v48, %v2641_v37  ;;  %v10228_v57 = vpop.f32.mrb[31].mxu0 }
0x237e   :  { %v2645_v58 = vmul.f32 %v2642_v20, %v12727_v42 }
0x2380   :  { %v2646_v60 = vadd.f32 %v2645_v58, %v12714_v53 }
0x2382   :  { %11877 = vtanh.f32 %v2646_v60 }
0x238c   :  { %v11878_v61 = vpop.eup %11877 }
0x238d   :  { %10238 = vmatmul.mubr.msk.f32.vlgmr.msra.gmra.mrb[30].mxu1 %vm109_vm1, %v11878_v61 }
0x238e   :  { %11320 = vmatpush3.bf16.msra.mxu1 %v12323_v10  ;;  %10259 = vmatprep.mubr.msk.f32.mxu1 %vm12179_vm0, %v12180_v1 }
0x238f   :  { %11321 = vmatprep.subr.bf16.mxu1 %v12178_v0 }
0x2392   :  { %11323 = vmatpush3.bf16.msra.mxu1 %v12328_v13 }
0x2393   :  { %11330 = vmatprep.subr.bf16.mxu1 %v12178_v0 }
0x2460   :  { %v2717_v62 = vpop.f32.mrb[30].mxu1 }
0x2461   :  { %v2718_v63 = vadd.f32 %v12388_v48, %v2717_v62  ;;  %v10239_v2 = vpop.f32.mrb[31].mxu1 }
0x2463   :  { %v2721_v24 = vmul.f32 %v2718_v63, %v12727_v42 }
0x2465   :  { %v2722_v3 = vadd.f32 %v2721_v24, %v12714_v53 }
0x2467   :  { %11879 = vtanh.f32 %v2722_v3 }
0x2471   :  { %v11880_v5 = vpop.eup %11879 }
0x2472   :  { %10249 = vmatmul.mubr.msk.f32.vlgmr.msra.gmra.mrb[32].mxu0 %vm109_vm1, %v11880_v5  ;;  %v2800_v15 = vadd.f32 %v11880_v5, %v11878_v61 }
0x2473   :  { %11326 = vmatpush3.bf16.msra.mxu0 %v12323_v10  ;;  %10270 = vmatprep.mubr.msk.f32.mxu0 %vm12179_vm0, %v12180_v1 }
0x2474   :  { %11327 = vmatprep.subr.bf16.mxu0 %v12178_v0  ;;  %v2801_v22 = vmul.f32 2.0, %v2800_v15 }
0x2476   :  { %v2802_v28 = vadd.f32 %v11876_v55, %v2801_v22 }
0x2477   :  { %11329 = vmatpush3.bf16.msra.mxu0 %v12328_v13 }
0x2478   :  { %11336 = vmatprep.subr.bf16.mxu0 %v12178_v0 }
0x2545   :  { %v2793_v6 = vpop.f32.mrb[32].mxu0 }
0x2546   :  { %v2794_v8 = vadd.f32 %v12388_v48, %v2793_v6  ;;  %v10250_v11 = vpop.f32.mrb[33].mxu0 }
0x2548   :  { %v2797_v12 = vmul.f32 %v2794_v8, %v12724_v56  ;;  %v2878_v48 = vadd.f32 %v2794_v8, %v2718_v63 }
0x254a   :  { %v2798_v14 = vadd.f32 %v2797_v12, %v12714_v53  ;;  %v2879_v19 = vmul.f32 2.0, %v2878_v48 }
0x254c   :  { %11881 = vtanh.f32 %v2798_v14  ;;  %v2880_v59 = vadd.f32 %v2879_v19, %v2642_v20 }
0x2556   :  { %v11882_v17 = vpop.eup %11881 }
0x2557   :  { %10260 = vmatmul.mubr.msk.f32.vlgmr.msra.gmra.mrb[32].mxu1 %vm109_vm1, %v11882_v17  ;;  %v12753_v18 = vadd.f32 %v11882_v17, %v2802_v28 }
0x2558   :  { %11332 = vmatpush3.bf16.msra.mxu1 %v12323_v10  ;;  %10281 = vmatprep.mubr.msk.f32.mxu1 %vm12179_vm0, %v12180_v1 }
0x2559   :  { %11333 = vmatprep.subr.bf16.mxu1 %v12178_v0 }
0x255c   :  { %11335 = vmatpush3.bf16.msra.mxu1 %v12328_v13 }
0x255d   :  { %11342 = vmatprep.subr.bf16.mxu1 %v12178_v0 }
0x262a   :  { %v2874_v21 = vpop.f32.mrb[32].mxu1 }
0x262b   :  { %v2875_v16 = vadd.f32 %v12764_v23, %v2874_v21  ;;  %v10261_v26 = vpop.f32.mrb[33].mxu1 }
0x262d   :  { %v2881_v29 = vadd.f32 %v2880_v59, %v2875_v16 }
0x262f   :  { %v2882_v30 = vmul.f32 %v2881_v29, %v12768_v27 }
0x2631   :  { %v2883_v31 = vadd.f32 %v2882_v30, %v12714_v53 }
0x2633   :  { %11883 = vtanh.f32 %v2883_v31 }
0x263d   :  { %v11884_v33 = vpop.eup %11883 }
0x263e   :  { %10271 = vmatmul.mubr.msk.f32.vlgmr.msra.gmra.mrb[34].mxu0 %vm109_vm1, %v11884_v33 }
0x263f   :  { %11338 = vmatpush3.bf16.msra.mxu0 %v12323_v10  ;;  %10292 = vmatprep.mubr.msk.f32.mxu0 %vm12179_vm0, %v12180_v1 }
0x2640   :  { %11339 = vmatprep.subr.bf16.mxu0 %v12178_v0 }
0x2643   :  { %11341 = vmatpush3.bf16.msra.mxu0 %v12328_v13 }
0x2644   :  { %11348 = vmatprep.subr.bf16.mxu0 %v12178_v0 }
0x2711   :  { %v2954_v35 = vpop.f32.mrb[34].mxu0 }
0x2712   :  { %v2955_v36 = vadd.f32 %v12764_v23, %v2954_v35  ;;  %v10272_v38 = vpop.f32.mrb[35].mxu0 }
0x2714   :  { %v2958_v39 = vmul.f32 %v2955_v36, %v12727_v42 }
0x2716   :  { %v2959_v40 = vadd.f32 %v2958_v39, %v2883_v31 }
0x2718   :  { %11885 = vtanh.f32 %v2959_v40 }
0x2722   :  { %v11886_v47 = vpop.eup %11885 }
0x2723   :  { %10282 = vmatmul.mubr.msk.f32.vlgmr.msra.gmra.mrb[34].mxu1 %vm109_vm1, %v11886_v47 }
0x2724   :  { %11344 = vmatpush3.bf16.msra.mxu1 %v12323_v10  ;;  %10303 = vmatprep.mubr.msk.f32.mxu1 %vm12179_vm0, %v12180_v1 }
0x2725   :  { %11345 = vmatprep.subr.bf16.mxu1 %v12178_v0 }
0x2728   :  { %11347 = vmatpush3.bf16.msra.mxu1 %v12328_v13 }
0x2729   :  { %11354 = vmatprep.subr.bf16.mxu1 %v12178_v0 }
0x27f6   :  { %v3030_v43 = vpop.f32.mrb[34].mxu1 }
0x27f7   :  { %v3031_v44 = vadd.f32 %v12764_v23, %v3030_v43  ;;  %v10283_v50 = vpop.f32.mrb[35].mxu1 }
0x27f9   :  { %v3034_v9 = vmul.f32 %v3031_v44, %v12727_v42 }
0x27fb   :  { %v3035_v51 = vadd.f32 %v3034_v9, %v2883_v31 }
0x27fd   :  { %11887 = vtanh.f32 %v3035_v51 }
0x2807   :  { %v11888_v52 = vpop.eup %11887 }
0x2808   :  { %10293 = vmatmul.mubr.msk.f32.vlgmr.msra.gmra.mrb[36].mxu0 %vm109_vm1, %v11888_v52  ;;  %v3113_v57 = vadd.f32 %v11888_v52, %v11886_v47 }
0x2809   :  { %11350 = vmatpush3.bf16.msra.mxu0 %v12323_v10  ;;  %10314 = vmatprep.mubr.msk.f32.mxu0 %vm12179_vm0, %v12180_v1 }
0x280a   :  { %11351 = vmatprep.subr.bf16.mxu0 %v12178_v0  ;;  %v3114_v58 = vmul.f32 2.0, %v3113_v57 }
0x280c   :  { %v3115_v60 = vadd.f32 %v11884_v33, %v3114_v58 }
0x280d   :  { %11353 = vmatpush3.bf16.msra.mxu0 %v12328_v13 }
0x280e   :  { %11360 = vmatprep.subr.bf16.mxu0 %v12178_v0 }
0x28db   :  { %v3106_v53 = vpop.f32.mrb[36].mxu0 }
0x28dc   :  { %v3107_v54 = vadd.f32 %v12764_v23, %v3106_v53  ;;  %v10294_v55 = vpop.f32.mrb[37].mxu0 }
0x28de   :  { %v3110_v37 = vmul.f32 %v3107_v54, %v12724_v56  ;;  %v3191_v2 = vadd.f32 %v3107_v54, %v3031_v44 }
0x28e0   :  { %v3111_v20 = vadd.f32 %v3110_v37, %v2883_v31  ;;  %v3192_v24 = vmul.f32 2.0, %v3191_v2 }
0x28e2   :  { %11889 = vtanh.f32 %v3111_v20  ;;  %v3193_v6 = vadd.f32 %v3192_v24, %v2955_v36 }
0x28ec   :  { %v11890_v61 = vpop.eup %11889 }
0x28ed   :  { %10304 = vmatmul.mubr.msk.f32.vlgmr.msra.gmra.mrb[36].mxu1 %vm109_vm1, %v11890_v61  ;;  %v3116_v62 = vadd.f32 %v11890_v61, %v3115_v60 }
0x28ee   :  { %11356 = vmatpush3.bf16.msra.mxu1 %v12323_v10  ;;  %10325 = vmatprep.mubr.msk.f32.mxu1 %vm12179_vm0, %v12180_v1 }
0x28ef   :  { %11357 = vmatprep.subr.bf16.mxu1 %v12178_v0  ;;  %v3117_v63 = vadd.f32 %v3116_v62, %v12753_v18 }
0x28f2   :  { %11359 = vmatpush3.bf16.msra.mxu1 %v12328_v13 }
0x28f3   :  { %11366 = vmatprep.subr.bf16.mxu1 %v12178_v0 }
0x29c0   :  { %v3187_v3 = vpop.f32.mrb[36].mxu1 }
0x29c1   :  { %v3188_v5 = vadd.f32 %v12764_v23, %v3187_v3  ;;  %v10305_v8 = vpop.f32.mrb[37].mxu1 }
0x29c3   :  { %v3194_v11 = vadd.f32 %v3193_v6, %v3188_v5  ;;  %v9242_v6 = vld [vmem:[%s13677_s1 + $0xc] sm:$0xf] }
0x29c5   :  { %v3195_v12 = vmul.f32 %v3194_v11, %v12768_v27  ;;  %v3618_v11 = vmul.f32 0.33333334, %v9242_v6 }
0x29c7   :  { %v3196_v14 = vadd.f32 %v3195_v12, %v2883_v31 }
0x29c9   :  { %11891 = vtanh.f32 %v3196_v14 }
0x29d3   :  { %v11892_v15 = vpop.eup %11891 }
0x29d4   :  { %10315 = vmatmul.mubr.msk.f32.vlgmr.msra.gmra.mrb[38].mxu0 %vm109_vm1, %v11892_v15 }
0x29d5   :  { %11362 = vmatpush3.bf16.msra.mxu0 %v12323_v10  ;;  %10336 = vmatprep.mubr.msk.f32.mxu0 %vm12179_vm0, %v12180_v1 }
0x29d6   :  { %11363 = vmatprep.subr.bf16.mxu0 %v12178_v0 }
0x29d9   :  { %11365 = vmatpush3.bf16.msra.mxu0 %v12328_v13 }
0x29da   :  { %11372 = vmatprep.subr.bf16.mxu0 %v12178_v0 }
0x2aa7   :  { %v3267_v22 = vpop.f32.mrb[38].mxu0 }
0x2aa8   :  { %v3268_v28 = vadd.f32 %v12764_v23, %v3267_v22  ;;  %v10316_v17 = vpop.f32.mrb[39].mxu0  ;;  %v12883_v22 = vld [vmem:[%s13680_s4] ss:$0 sm:$0xff] }
0x2aaa   :  { %v3271_v18 = vmul.f32 %v3268_v28, %v12727_v42 }
0x2aac   :  { %v3272_v48 = vadd.f32 %v3271_v18, %v3196_v14 }
0x2aae   :  { %11893 = vtanh.f32 %v3272_v48 }
0x2ab8   :  { %v11894_v19 = vpop.eup %11893 }
0x2ab9   :  { %10326 = vmatmul.mubr.msk.f32.vlgmr.msra.gmra.mrb[38].mxu1 %vm109_vm1, %v11894_v19 }
0x2aba   :  { %11368 = vmatpush3.bf16.msra.mxu1 %v12491_v49  ;;  %10347 = vmatprep.mubr.msk.f32.mxu1 %vm12179_vm0, %v12180_v1 }
0x2abb   :  { %11369 = vmatprep.subr.bf16.mxu1 %v12178_v0 }
0x2abe   :  { %11371 = vmatpush3.bf16.msra.mxu1 %v12494_v25 }
0x2abf   :  { %11378 = vmatprep.subr.bf16.mxu1 %v12178_v0 }
0x2b8c   :  { %v3343_v21 = vpop.f32.mrb[38].mxu1 }
0x2b8d   :  { %v3344_v16 = vadd.f32 %v12764_v23, %v3343_v21  ;;  %v10327_v59 = vpop.f32.mrb[39].mxu1 }
0x2b8f   :  { %v3347_v26 = vmul.f32 %v3344_v16, %v12727_v42 }
0x2b91   :  { %v3348_v29 = vadd.f32 %v3347_v26, %v3196_v14 }
0x2b93   :  { %11895 = vtanh.f32 %v3348_v29 }
0x2b9d   :  { %v11896_v30 = vpop.eup %11895 }
0x2b9e   :  { %10337 = vmatmul.mubr.msk.f32.vlgmr.msra.gmra.mrb[40].mxu0 %vm109_vm1, %v11896_v30  ;;  %v3426_v38 = vadd.f32 %v11896_v30, %v11894_v19 }
0x2b9f   :  { %11374 = vmatpush3.bf16.msra.mxu0 %v12317_v4  ;;  %10358 = vmatprep.mubr.msk.f32.mxu0 %vm12179_vm0, %v12180_v1 }
0x2ba0   :  { %11375 = vmatprep.subr.bf16.mxu0 %v12178_v0  ;;  %v3427_v39 = vmul.f32 2.0, %v3426_v38 }
0x2ba2   :  { %v3428_v40 = vadd.f32 %v11892_v15, %v3427_v39 }
0x2ba3   :  { %11377 = vmatpush3.bf16.msra.mxu0 %v12320_v7 }
0x2ba4   :  { %11384 = vmatprep.subr.bf16.mxu0 %v12178_v0 }
0x2c71   :  { %v3419_v31 = vpop.f32.mrb[40].mxu0 }
0x2c72   :  { %v3420_v33 = vadd.f32 %v12764_v23, %v3419_v31  ;;  %v10338_v42 = vpop.f32.mrb[41].mxu0 }
0x2c74   :  { %v3423_v35 = vmul.f32 %v3420_v33, %v12724_v56 }
0x2c76   :  { %v3424_v36 = vadd.f32 %v3423_v35, %v3196_v14 }
0x2c78   :  { %11897 = vtanh.f32 %v3424_v36 }
0x2c82   :  { %v11898_v47 = vpop.eup %11897 }
0x2c83   :  { %v3429_v43 = vadd.f32 %v11898_v47, %v3428_v40 }
0x2c85   :  { %v3430_v44 = vadd.f32 %v3429_v43, %v3117_v63 }
0x2c87   :  { %10348 = vmatmul.mubr.msk.f32.vlgmr.msra.gmra.mrb[40].mxu1 %vm109_vm1, %v3430_v44 }
0x2c88   :  { %11380 = vmatpush3.bf16.msra.mxu1 %v12344_v32  ;;  %10369 = vmatprep.mubr.msk.f32.mxu1 %vm12179_vm0, %v12180_v1 }
0x2c89   :  { %11381 = vmatprep.subr.bf16.mxu1 %v12178_v0 }
0x2c8c   :  { %11383 = vmatpush3.bf16.msra.mxu1 %v12347_v34 }
0x2c8d   :  { %11390 = vmatprep.subr.bf16.mxu1 %v12178_v0 }
0x2d5a   :  { %v3500_v56 = vpop.f32.mrb[40].mxu1 }
0x2d5b   :  { %v3501_v50 = vadd.f32 %v3500_v56, %v12512_v46  ;;  %v10349_v9 = vpop.f32.mrb[41].mxu1 }
0x2d5d   :  { %v3504_v51 = vmul.f32 %v3501_v50, %v12768_v27 }
0x2d5f   :  { %3506 = vrot.lane.b32.xlu0 %v3504_v51, %s12184_s2 }
0x2dd1   :  { %v3507_v52 = vpop.permute.xlu0 %3506 }
0x2dd2   :  { %v3509_v53 = vadd.f32 %v3507_v52, %v12699_v45  ;;  %v9238_v45 = vld [vmem:[%s13676_s0 + $0xc] sm:$0xf] }
0x2dd4   :  { %3511 = vrot.lane.b32.xlu1 %v3509_v53, %s12182_s16 }
0x2e46   :  { %v3512_v54 = vpop.permute.xlu1 %3511 }
0x2e47   :  { %3515 = vst.msk [vmem:[#allocation10 + $0x8] sm:$0xf] %vm1254_vm2, %v3512_v54  ;;  %10359 = vmatmul.mubr.msk.f32.vlgmr.msra.gmra.mrb[42].mxu0 %vm109_vm1, %v3512_v54 }
0x2e48   :  { %11386 = vmatpush3.bf16.msra.mxu0 %v12323_v10  ;;  %10380 = vmatprep.mubr.msk.f32.mxu0 %vm12179_vm0, %v12180_v1 }
0x2e49   :  { %11387 = vmatprep.subr.bf16.mxu0 %v12178_v0 }
0x2e4c   :  { %11389 = vmatpush3.bf16.msra.mxu0 %v12328_v13 }
0x2e4d   :  { %11396 = vmatprep.subr.bf16.mxu0 %v12178_v0 }
0x2f1a   :  { %v3586_v27 = vpop.f32.mrb[42].mxu0 }
0x2f1b   :  { %v3590_v55 = vadd.f32 %v9238_v45, %v3586_v27  ;;  %v10360_v37 = vpop.f32.mrb[43].mxu0 }
0x2f1d   :  { %v9240_v20 = vmul.f32 -1.442695, %v3590_v55 }
0x2f1f   :  { %11899 = vpow2.f32 %v9240_v20 }
0x2f29   :  { %v11900_v57 = vpop.eup %11899 }
0x2f2a   :  { %v3594_v58 = vadd.f32 1.0, %v11900_v57 }
0x2f2c   :  { %11901 = vrcp.f32 %v3594_v58 }
0x2f36   :  { %v11902_v60 = vpop.eup %11901 }
0x2f37   :  { %v3597_v61 = vmul.f32 2.0, %v11902_v60  ;;  %v3599_v24 = vmul.f32 %v11902_v60, %v12695_v41 }
0x2f39   :  { %v9241_v62 = vadd.f32 -1.0, %v3597_v61 }
0x2f3b   :  { %3601 = vrot.lane.b32.xlu0 %v9241_v62, %s12181_s22 }
0x2fad   :  { %v3602_v63 = vpop.permute.xlu0 %3601 }
0x2fae   :  { %v3604_v2 = vmul.f32 %v11902_v60, %v3602_v63 }
0x2fb0   :  { %3606 = vrot.lane.b32.xlu1 %v3604_v2, %s12182_s16 }
0x3022   :  { %v3607_v3 = vpop.permute.xlu1 %3606 }
0x3023   :  { %v12862_v5 = vadd.f32 %v3607_v3, %v3599_v24 }
0x3025   :  { %11903 = vtanh.f32 %v12862_v5 }
0x302f   :  { %v11904_v8 = vpop.eup %11903 }
0x3030   :  { %3612 = vrot.lane.b32.xlu0 %v11904_v8, %s12181_s22 }
0x3034   :  { %3621 = vperm.xlu0 %11807, %v3618_v11  }
0x30a2   :  { %v3613_v12 = vpop.permute.xlu0 %3612 }
0x30a3   :  { %v12869_v14 = vmul.f32 %v11902_v60, %v3613_v12 }
0x30a5   :  { %3627 = vrot.lane.b32.xlu1 %v12869_v14, %s12182_s16 }
0x30b3   :  { %v12896_v48 = vpop.permute.xlu0 %3621 }
0x30b4   :  { %v12899_v21 = vmul.f32 0.5, %v12896_v48  ;;  %v12935_v20 = vmul.f32 0.16666667, %v12896_v48 }
0x3117   :  { %v3628_v41 = vpop.permute.xlu1 %3627 }
0x3118   :  { %10370 = vmatmul.mubr.msk.f32.vlgmr.msra.gmra.mrb[42].mxu1 %vm109_vm1, %v3628_v41 }
0x3119   :  { %11392 = vmatpush3.bf16.msra.mxu1 %v12323_v10  ;;  %10391 = vmatprep.mubr.msk.f32.mxu1 %vm12179_vm0, %v12180_v1 }
0x311a   :  { %11393 = vmatprep.subr.bf16.mxu1 %v12178_v0 }
0x311d   :  { %11395 = vmatpush3.bf16.msra.mxu1 %v12328_v13 }
0x311e   :  { %11402 = vmatprep.subr.bf16.mxu1 %v12178_v0 }
0x31eb   :  { %v3697_v15 = vpop.f32.mrb[42].mxu1 }
0x31ec   :  { %v12886_v28 = vadd.f32 %v12883_v22, %v3697_v15  ;;  %v10371_v17 = vpop.f32.mrb[43].mxu1 }
0x31ee   :  { %11905 = vtanh.f32 %v12886_v28 }
0x31f8   :  { %v11906_v18 = vpop.eup %11905 }
0x31f9   :  { %10381 = vmatmul.mubr.msk.f32.vlgmr.msra.gmra.mrb[44].mxu0 %vm109_vm1, %v11906_v18 }
0x31fa   :  { %11398 = vmatpush3.bf16.msra.mxu0 %v12323_v10  ;;  %10402 = vmatprep.mubr.msk.f32.mxu0 %vm12179_vm0, %v12180_v1 }
0x31fb   :  { %11399 = vmatprep.subr.bf16.mxu0 %v12178_v0 }
0x31fe   :  { %11401 = vmatpush3.bf16.msra.mxu0 %v12328_v13 }
0x31ff   :  { %11408 = vmatprep.subr.bf16.mxu0 %v12178_v0 }
0x32cc   :  { %v3771_v19 = vpop.f32.mrb[44].mxu0 }
0x32cd   :  { %v3772_v16 = vadd.f32 %v12764_v23, %v3771_v19  ;;  %v10382_v59 = vpop.f32.mrb[45].mxu0 }
0x32cf   :  { %v3775_v26 = vmul.f32 %v3772_v16, %v12899_v21 }
0x32d1   :  { %v3776_v29 = vadd.f32 %v3775_v26, %v12886_v28 }
0x32d3   :  { %11907 = vtanh.f32 %v3776_v29 }
0x32dd   :  { %v11908_v30 = vpop.eup %11907 }
0x32de   :  { %10392 = vmatmul.mubr.msk.f32.vlgmr.msra.gmra.mrb[44].mxu1 %vm109_vm1, %v11908_v30 }
0x32df   :  { %11404 = vmatpush3.bf16.msra.mxu1 %v12323_v10  ;;  %10413 = vmatprep.mubr.msk.f32.mxu1 %vm12179_vm0, %v12180_v1 }
0x32e0   :  { %11405 = vmatprep.subr.bf16.mxu1 %v12178_v0 }
0x32e3   :  { %11407 = vmatpush3.bf16.msra.mxu1 %v12328_v13 }
0x32e4   :  { %11414 = vmatprep.subr.bf16.mxu1 %v12178_v0 }
0x33b1   :  { %v3847_v31 = vpop.f32.mrb[44].mxu1 }
0x33b2   :  { %v3848_v33 = vadd.f32 %v12764_v23, %v3847_v31  ;;  %v10393_v42 = vpop.f32.mrb[45].mxu1 }
0x33b4   :  { %v3851_v35 = vmul.f32 %v3848_v33, %v12899_v21 }
0x33b6   :  { %v3852_v36 = vadd.f32 %v3851_v35, %v12886_v28 }
0x33b8   :  { %11909 = vtanh.f32 %v3852_v36 }
0x33c2   :  { %v11910_v38 = vpop.eup %11909 }
0x33c3   :  { %10403 = vmatmul.mubr.msk.f32.vlgmr.msra.gmra.mrb[46].mxu0 %vm109_vm1, %v11910_v38  ;;  %v3930_v56 = vadd.f32 %v11910_v38, %v11908_v30 }
0x33c4   :  { %11410 = vmatpush3.bf16.msra.mxu0 %v12323_v10  ;;  %10424 = vmatprep.mubr.msk.f32.mxu0 %vm12179_vm0, %v12180_v1 }
0x33c5   :  { %11411 = vmatprep.subr.bf16.mxu0 %v12178_v0  ;;  %v3931_v50 = vmul.f32 2.0, %v3930_v56 }
0x33c7   :  { %v3932_v9 = vadd.f32 %v11906_v18, %v3931_v50 }
0x33c8   :  { %11413 = vmatpush3.bf16.msra.mxu0 %v12328_v13 }
0x33c9   :  { %11420 = vmatprep.subr.bf16.mxu0 %v12178_v0 }
0x3496   :  { %v3923_v39 = vpop.f32.mrb[46].mxu0 }
0x3497   :  { %v3924_v40 = vadd.f32 %v12764_v23, %v3923_v39  ;;  %v10404_v47 = vpop.f32.mrb[47].mxu0 }
0x3499   :  { %v3927_v43 = vmul.f32 %v3924_v40, %v12896_v48  ;;  %v4008_v53 = vadd.f32 %v3924_v40, %v3848_v33 }
0x349b   :  { %v3928_v44 = vadd.f32 %v3927_v43, %v12886_v28  ;;  %v4009_v54 = vmul.f32 2.0, %v4008_v53 }
0x349d   :  { %11911 = vtanh.f32 %v3928_v44  ;;  %v4010_v55 = vadd.f32 %v4009_v54, %v3772_v16 }
0x34a7   :  { %v11912_v51 = vpop.eup %11911 }
0x34a8   :  { %10414 = vmatmul.mubr.msk.f32.vlgmr.msra.gmra.mrb[46].mxu1 %vm109_vm1, %v11912_v51  ;;  %v12925_v52 = vadd.f32 %v11912_v51, %v3932_v9 }
0x34a9   :  { %11416 = vmatpush3.bf16.msra.mxu1 %v12323_v10  ;;  %10435 = vmatprep.mubr.msk.f32.mxu1 %vm12179_vm0, %v12180_v1 }
0x34aa   :  { %11417 = vmatprep.subr.bf16.mxu1 %v12178_v0 }
0x34ad   :  { %11419 = vmatpush3.bf16.msra.mxu1 %v12328_v13 }
0x34ae   :  { %11426 = vmatprep.subr.bf16.mxu1 %v12178_v0 }
0x357b   :  { %v4004_v45 = vpop.f32.mrb[46].mxu1 }
0x357c   :  { %v4005_v27 = vadd.f32 %v12764_v23, %v4004_v45  ;;  %v10415_v37 = vpop.f32.mrb[47].mxu1 }
0x357e   :  { %v4011_v57 = vadd.f32 %v4010_v55, %v4005_v27 }
0x3580   :  { %v4012_v58 = vmul.f32 %v4011_v57, %v12935_v20 }
0x3582   :  { %v4013_v60 = vadd.f32 %v4012_v58, %v12886_v28 }
0x3584   :  { %11913 = vtanh.f32 %v4013_v60 }
0x358e   :  { %v11914_v61 = vpop.eup %11913 }
0x358f   :  { %10425 = vmatmul.mubr.msk.f32.vlgmr.msra.gmra.mrb[48].mxu0 %vm109_vm1, %v11914_v61 }
0x3590   :  { %11422 = vmatpush3.bf16.msra.mxu0 %v12323_v10  ;;  %10446 = vmatprep.mubr.msk.f32.mxu0 %vm12179_vm0, %v12180_v1 }
0x3591   :  { %11423 = vmatprep.subr.bf16.mxu0 %v12178_v0 }
0x3594   :  { %11425 = vmatpush3.bf16.msra.mxu0 %v12328_v13 }
0x3595   :  { %11432 = vmatprep.subr.bf16.mxu0 %v12178_v0 }
0x3662   :  { %v4084_v62 = vpop.f32.mrb[48].mxu0 }
0x3663   :  { %v4085_v63 = vadd.f32 %v12764_v23, %v4084_v62  ;;  %v10426_v2 = vpop.f32.mrb[49].mxu0 }
0x3665   :  { %v4088_v24 = vmul.f32 %v4085_v63, %v12899_v21 }
0x3667   :  { %v4089_v3 = vadd.f32 %v4088_v24, %v4013_v60 }
0x3669   :  { %11915 = vtanh.f32 %v4089_v3 }
0x3673   :  { %v11916_v6 = vpop.eup %11915 }
0x3674   :  { %10436 = vmatmul.mubr.msk.f32.vlgmr.msra.gmra.mrb[48].mxu1 %vm109_vm1, %v11916_v6 }
0x3675   :  { %11428 = vmatpush3.bf16.msra.mxu1 %v12323_v10  ;;  %10457 = vmatprep.mubr.msk.f32.mxu1 %vm12179_vm0, %v12180_v1 }
0x3676   :  { %11429 = vmatprep.subr.bf16.mxu1 %v12178_v0 }
0x3679   :  { %11431 = vmatpush3.bf16.msra.mxu1 %v12328_v13 }
0x367a   :  { %11438 = vmatprep.subr.bf16.mxu1 %v12178_v0 }
0x3747   :  { %v4160_v8 = vpop.f32.mrb[48].mxu1 }
0x3748   :  { %v4161_v11 = vadd.f32 %v12764_v23, %v4160_v8  ;;  %v10437_v12 = vpop.f32.mrb[49].mxu1 }
0x374a   :  { %v4164_v41 = vmul.f32 %v4161_v11, %v12899_v21 }
0x374c   :  { %v4165_v15 = vadd.f32 %v4164_v41, %v4013_v60 }
0x374e   :  { %11917 = vtanh.f32 %v4165_v15 }
0x3758   :  { %v11918_v28 = vpop.eup %11917 }
0x3759   :  { %10447 = vmatmul.mubr.msk.f32.vlgmr.msra.gmra.mrb[50].mxu0 %vm109_vm1, %v11918_v28  ;;  %v4243_v26 = vadd.f32 %v11918_v28, %v11916_v6 }
0x375a   :  { %11434 = vmatpush3.bf16.msra.mxu0 %v12323_v10  ;;  %10468 = vmatprep.mubr.msk.f32.mxu0 %vm12179_vm0, %v12180_v1 }
0x375b   :  { %11435 = vmatprep.subr.bf16.mxu0 %v12178_v0  ;;  %v4244_v29 = vmul.f32 2.0, %v4243_v26 }
0x375d   :  { %v4245_v30 = vadd.f32 %v11914_v61, %v4244_v29 }
0x375e   :  { %11437 = vmatpush3.bf16.msra.mxu0 %v12328_v13 }
0x375f   :  { %11444 = vmatprep.subr.bf16.mxu0 %v12178_v0 }
0x382c   :  { %v4236_v17 = vpop.f32.mrb[50].mxu0 }
0x382d   :  { %v4237_v18 = vadd.f32 %v12764_v23, %v4236_v17  ;;  %v10448_v19 = vpop.f32.mrb[51].mxu0 }
0x382f   :  { %v4240_v16 = vmul.f32 %v4237_v18, %v12896_v48  ;;  %v4321_v35 = vadd.f32 %v4237_v18, %v4161_v11 }
0x3831   :  { %v4241_v59 = vadd.f32 %v4240_v16, %v4013_v60  ;;  %v4322_v36 = vmul.f32 2.0, %v4321_v35 }
0x3833   :  { %11919 = vtanh.f32 %v4241_v59  ;;  %v4323_v40 = vadd.f32 %v4322_v36, %v4085_v63 }
0x383d   :  { %v11920_v31 = vpop.eup %11919 }
0x383e   :  { %10458 = vmatmul.mubr.msk.f32.vlgmr.msra.gmra.mrb[50].mxu1 %vm109_vm1, %v11920_v31  ;;  %v4246_v33 = vadd.f32 %v11920_v31, %v4245_v30 }
0x383f   :  { %11440 = vmatpush3.bf16.msra.mxu1 %v12323_v10  ;;  %10479 = vmatprep.mubr.msk.f32.mxu1 %vm12179_vm0, %v12180_v1 }
0x3840   :  { %11441 = vmatprep.subr.bf16.mxu1 %v12178_v0  ;;  %v4247_v42 = vadd.f32 %v4246_v33, %v12925_v52 }
0x3843   :  { %11443 = vmatpush3.bf16.msra.mxu1 %v12328_v13 }
0x3844   :  { %11450 = vmatprep.subr.bf16.mxu1 %v12178_v0 }
0x3911   :  { %v4317_v38 = vpop.f32.mrb[50].mxu1 }
0x3912   :  { %v4318_v39 = vadd.f32 %v12764_v23, %v4317_v38  ;;  %v10459_v47 = vpop.f32.mrb[51].mxu1 }
0x3913   :  { %v9260_v47 = vld [vmem:[%s13677_s1 + $0x10] sm:$0xf] }
0x3914   :  { %v4324_v43 = vadd.f32 %v4323_v40, %v4318_v39 }
0x3916   :  { %v4325_v44 = vmul.f32 %v4324_v43, %v12935_v20 }
0x3918   :  { %v4326_v56 = vadd.f32 %v4325_v44, %v4013_v60  ;;  %v4748_v44 = vmul.f32 0.33333334, %v9260_v47 }
0x391a   :  { %11921 = vtanh.f32 %v4326_v56 }
0x3924   :  { %v11922_v50 = vpop.eup %11921 }
0x3925   :  { %10469 = vmatmul.mubr.msk.f32.vlgmr.msra.gmra.mrb[52].mxu0 %vm109_vm1, %v11922_v50 }
0x3926   :  { %11446 = vmatpush3.bf16.msra.mxu0 %v12323_v10  ;;  %10490 = vmatprep.mubr.msk.f32.mxu0 %vm12179_vm0, %v12180_v1 }
0x3927   :  { %11447 = vmatprep.subr.bf16.mxu0 %v12178_v0 }
0x392a   :  { %11449 = vmatpush3.bf16.msra.mxu0 %v12328_v13 }
0x392b   :  { %11456 = vmatprep.subr.bf16.mxu0 %v12178_v0 }
0x39f8   :  { %v4397_v9 = vpop.f32.mrb[52].mxu0 }
0x39f9   :  { %v4398_v51 = vadd.f32 %v12764_v23, %v4397_v9  ;;  %v10470_v52 = vpop.f32.mrb[53].mxu0 }
0x39fb   :  { %v4401_v53 = vmul.f32 %v4398_v51, %v12899_v21 }
0x39fd   :  { %v4402_v54 = vadd.f32 %v4401_v53, %v4326_v56 }
0x39ff   :  { %11923 = vtanh.f32 %v4402_v54 }
0x3a09   :  { %v11924_v45 = vpop.eup %11923 }
0x3a0a   :  { %10480 = vmatmul.mubr.msk.f32.vlgmr.msra.gmra.mrb[52].mxu1 %vm109_vm1, %v11924_v45 }
0x3a0b   :  { %11452 = vmatpush3.bf16.msra.mxu1 %v12491_v49  ;;  %10501 = vmatprep.mubr.msk.f32.mxu1 %vm12179_vm0, %v12180_v1 }
0x3a0c   :  { %11453 = vmatprep.subr.bf16.mxu1 %v12178_v0 }
0x3a0f   :  { %11455 = vmatpush3.bf16.msra.mxu1 %v12494_v25 }
0x3a10   :  { %11462 = vmatprep.subr.bf16.mxu1 %v12178_v0 }
0x3add   :  { %v4473_v27 = vpop.f32.mrb[52].mxu1 }
0x3ade   :  { %v4474_v55 = vadd.f32 %v12764_v23, %v4473_v27  ;;  %v10481_v37 = vpop.f32.mrb[53].mxu1 }
0x3ae0   :  { %v4477_v57 = vmul.f32 %v4474_v55, %v12899_v21 }
0x3ae2   :  { %v4478_v58 = vadd.f32 %v4477_v57, %v4326_v56 }
0x3ae4   :  { %11925 = vtanh.f32 %v4478_v58 }
0x3aee   :  { %v11926_v60 = vpop.eup %11925 }
0x3aef   :  { %10491 = vmatmul.mubr.msk.f32.vlgmr.msra.gmra.mrb[54].mxu0 %vm109_vm1, %v11926_v60  ;;  %v4556_v24 = vadd.f32 %v11926_v60, %v11924_v45 }
0x3af0   :  { %11458 = vmatpush3.bf16.msra.mxu0 %v12317_v4  ;;  %10512 = vmatprep.mubr.msk.f32.mxu0 %vm12179_vm0, %v12180_v1 }
0x3af1   :  { %11459 = vmatprep.subr.bf16.mxu0 %v12178_v0  ;;  %v4557_v3 = vmul.f32 2.0, %v4556_v24 }
0x3af3   :  { %v4558_v6 = vadd.f32 %v11922_v50, %v4557_v3 }
0x3af4   :  { %11461 = vmatpush3.bf16.msra.mxu0 %v12320_v7 }
0x3af5   :  { %11468 = vmatprep.subr.bf16.mxu0 %v12178_v0 }
0x3bc2   :  { %v4549_v61 = vpop.f32.mrb[54].mxu0 }
0x3bc3   :  { %v4550_v62 = vadd.f32 %v12764_v23, %v4549_v61  ;;  %v10492_v21 = vpop.f32.mrb[55].mxu0 }
0x3bc5   :  { %v4553_v63 = vmul.f32 %v4550_v62, %v12896_v48 }
0x3bc7   :  { %v4554_v2 = vadd.f32 %v4553_v63, %v4326_v56 }
0x3bc9   :  { %11927 = vtanh.f32 %v4554_v2 }
0x3bd3   :  { %v11928_v8 = vpop.eup %11927 }
0x3bd4   :  { %v4559_v11 = vadd.f32 %v11928_v8, %v4558_v6 }
0x3bd6   :  { %v4560_v12 = vadd.f32 %v4559_v11, %v4247_v42 }
0x3bd8   :  { %10502 = vmatmul.mubr.msk.f32.vlgmr.msra.gmra.mrb[54].mxu1 %vm109_vm1, %v4560_v12 }
0x3bd9   :  { %11464 = vmatpush3.bf16.msra.mxu1 %v12344_v32  ;;  %10523 = vmatprep.mubr.msk.f32.mxu1 %vm12179_vm0, %v12180_v1 }
0x3bda   :  { %11465 = vmatprep.subr.bf16.mxu1 %v12178_v0 }
0x3bdd   :  { %11467 = vmatpush3.bf16.msra.mxu1 %v12347_v34 }
0x3bde   :  { %11474 = vmatprep.subr.bf16.mxu1 %v12178_v0 }
0x3cab   :  { %v4630_v48 = vpop.f32.mrb[54].mxu1 }
0x3cac   :  { %v4631_v41 = vadd.f32 %v4630_v48, %v12512_v46  ;;  %v10503_v15 = vpop.f32.mrb[55].mxu1 }
0x3cae   :  { %v4634_v28 = vmul.f32 %v4631_v41, %v12935_v20 }
0x3cb0   :  { %4636 = vrot.lane.b32.xlu1 %v4634_v28, %s12184_s2 }
0x3d22   :  { %v4637_v17 = vpop.permute.xlu1 %4636 }
0x3d23   :  { %v4639_v18 = vadd.f32 %v4637_v17, %v12869_v14  ;;  %v9256_v14 = vld [vmem:[%s13676_s0 + $0x10] sm:$0xf] }
0x3d25   :  { %4641 = vrot.lane.b32.xlu0 %v4639_v18, %s12182_s16 }
0x3d97   :  { %v4642_v19 = vpop.permute.xlu0 %4641 }
0x3d98   :  { %4645 = vst.msk [vmem:[#allocation10 + $0xc] sm:$0xf] %vm1254_vm2, %v4642_v19  ;;  %10513 = vmatmul.mubr.msk.f32.vlgmr.msra.gmra.mrb[56].mxu0 %vm109_vm1, %v4642_v19 }
0x3d99   :  { %11470 = vmatpush3.bf16.msra.mxu0 %v12323_v10  ;;  %10534 = vmatprep.mubr.msk.f32.mxu0 %vm12179_vm0, %v12180_v1 }
0x3d9a   :  { %11471 = vmatprep.subr.bf16.mxu0 %v12178_v0 }
0x3d9d   :  { %11473 = vmatpush3.bf16.msra.mxu0 %v12328_v13 }
0x3d9e   :  { %11480 = vmatprep.subr.bf16.mxu0 %v12178_v0 }
0x3e6b   :  { %v4716_v20 = vpop.f32.mrb[56].mxu0 }
0x3e6c   :  { %v4720_v16 = vadd.f32 %v9256_v14, %v4716_v20  ;;  %v10514_v59 = vpop.f32.mrb[57].mxu0 }
0x3e6e   :  { %v9258_v26 = vmul.f32 -1.442695, %v4720_v16 }
0x3e70   :  { %11929 = vpow2.f32 %v9258_v26 }
0x3e7a   :  { %v11930_v29 = vpop.eup %11929 }
0x3e7b   :  { %v4724_v30 = vadd.f32 1.0, %v11930_v29 }
0x3e7d   :  { %11931 = vrcp.f32 %v4724_v30 }
0x3e87   :  { %v11932_v31 = vpop.eup %11931 }
0x3e88   :  { %v4727_v33 = vmul.f32 2.0, %v11932_v31  ;;  %v4729_v38 = vmul.f32 %v11932_v31, %v12862_v5 }
0x3e8a   :  { %v9259_v42 = vadd.f32 -1.0, %v4727_v33 }
0x3e8c   :  { %4731 = vrot.lane.b32.xlu1 %v9259_v42, %s12181_s22 }
0x3efe   :  { %v4732_v35 = vpop.permute.xlu1 %4731 }
0x3eff   :  { %v4734_v36 = vmul.f32 %v11932_v31, %v4732_v35 }
0x3f01   :  { %4736 = vrot.lane.b32.xlu0 %v4734_v36, %s12182_s16 }
0x3f73   :  { %v4737_v39 = vpop.permute.xlu0 %4736 }
0x3f74   :  { %v13029_v40 = vadd.f32 %v4737_v39, %v4729_v38 }
0x3f76   :  { %11933 = vtanh.f32 %v13029_v40 }
0x3f80   :  { %v11934_v43 = vpop.eup %11933 }
0x3f81   :  { %4742 = vrot.lane.b32.xlu1 %v11934_v43, %s12181_s22 }
0x3f85   :  { %4751 = vperm.xlu1 %11808, %v4748_v44  }
0x3ff3   :  { %v4743_v56 = vpop.permute.xlu1 %4742 }
0x3ff4   :  { %v13036_v50 = vmul.f32 %v11932_v31, %v4743_v56 }
0x3ff6   :  { %4757 = vrot.lane.b32.xlu0 %v13036_v50, %s12182_s16 }
0x4004   :  { %v13058_v54 = vpop.permute.xlu1 %4751 }
0x4005   :  { %v13061_v27 = vmul.f32 0.5, %v13058_v54  ;;  %v13097_v26 = vmul.f32 0.16666667, %v13058_v54 }
0x4068   :  { %v4758_v5 = vpop.permute.xlu0 %4757 }
0x4069   :  { %10524 = vmatmul.mubr.msk.f32.vlgmr.msra.gmra.mrb[56].mxu1 %vm109_vm1, %v4758_v5 }
0x406a   :  { %11476 = vmatpush3.bf16.msra.mxu1 %v12323_v10  ;;  %10545 = vmatprep.mubr.msk.f32.mxu1 %vm12179_vm0, %v12180_v1 }
0x406b   :  { %11477 = vmatprep.subr.bf16.mxu1 %v12178_v0 }
0x406e   :  { %11479 = vmatpush3.bf16.msra.mxu1 %v12328_v13 }
0x406f   :  { %11486 = vmatprep.subr.bf16.mxu1 %v12178_v0 }
0x413c   :  { %v4827_v9 = vpop.f32.mrb[56].mxu1 }
0x413d   :  { %v13048_v51 = vadd.f32 %v12883_v22, %v4827_v9  ;;  %v10525_v52 = vpop.f32.mrb[57].mxu1 }
0x413f   :  { %11935 = vtanh.f32 %v13048_v51 }
0x4149   :  { %v11936_v53 = vpop.eup %11935 }
0x414a   :  { %10535 = vmatmul.mubr.msk.f32.vlgmr.msra.gmra.mrb[58].mxu0 %vm109_vm1, %v11936_v53 }
0x414b   :  { %11482 = vmatpush3.bf16.msra.mxu0 %v12323_v10  ;;  %10556 = vmatprep.mubr.msk.f32.mxu0 %vm12179_vm0, %v12180_v1 }
0x414c   :  { %11483 = vmatprep.subr.bf16.mxu0 %v12178_v0 }
0x414f   :  { %11485 = vmatpush3.bf16.msra.mxu0 %v12328_v13 }
0x4150   :  { %11492 = vmatprep.subr.bf16.mxu0 %v12178_v0 }
0x421d   :  { %v4901_v45 = vpop.f32.mrb[58].mxu0 }
0x421e   :  { %v4902_v55 = vadd.f32 %v12764_v23, %v4901_v45  ;;  %v10536_v37 = vpop.f32.mrb[59].mxu0 }
0x4220   :  { %v4905_v57 = vmul.f32 %v4902_v55, %v13061_v27 }
0x4222   :  { %v4906_v58 = vadd.f32 %v4905_v57, %v13048_v51 }
0x4224   :  { %11937 = vtanh.f32 %v4906_v58 }
0x422e   :  { %v11938_v60 = vpop.eup %11937 }
0x422f   :  { %10546 = vmatmul.mubr.msk.f32.vlgmr.msra.gmra.mrb[58].mxu1 %vm109_vm1, %v11938_v60 }
0x4230   :  { %11488 = vmatpush3.bf16.msra.mxu1 %v12323_v10  ;;  %10567 = vmatprep.mubr.msk.f32.mxu1 %vm12179_vm0, %v12180_v1 }
0x4231   :  { %11489 = vmatprep.subr.bf16.mxu1 %v12178_v0 }
0x4234   :  { %11491 = vmatpush3.bf16.msra.mxu1 %v12328_v13 }
0x4235   :  { %11498 = vmatprep.subr.bf16.mxu1 %v12178_v0 }
0x4302   :  { %v4977_v61 = vpop.f32.mrb[58].mxu1 }
0x4303   :  { %v4978_v62 = vadd.f32 %v12764_v23, %v4977_v61  ;;  %v10547_v21 = vpop.f32.mrb[59].mxu1 }
0x4305   :  { %v4981_v63 = vmul.f32 %v4978_v62, %v13061_v27 }
0x4307   :  { %v4982_v2 = vadd.f32 %v4981_v63, %v13048_v51 }
0x4309   :  { %11939 = vtanh.f32 %v4982_v2 }
0x4313   :  { %v11940_v24 = vpop.eup %11939 }
0x4314   :  { %10557 = vmatmul.mubr.msk.f32.vlgmr.msra.gmra.mrb[60].mxu0 %vm109_vm1, %v11940_v24  ;;  %v5060_v48 = vadd.f32 %v11940_v24, %v11938_v60  ;;  %v13139_v24 = vld [vmem:[%s13682_s6] ss:$0 sm:$0xff] }
0x4315   :  { %11494 = vmatpush3.bf16.msra.mxu0 %v12323_v10  ;;  %10578 = vmatprep.mubr.msk.f32.mxu0 %vm12179_vm0, %v12180_v1 }
0x4316   :  { %11495 = vmatprep.subr.bf16.mxu0 %v12178_v0  ;;  %v5061_v41 = vmul.f32 2.0, %v5060_v48 }
0x4318   :  { %v5062_v15 = vadd.f32 %v11936_v53, %v5061_v41 }
0x4319   :  { %11497 = vmatpush3.bf16.msra.mxu0 %v12328_v13 }
0x431a   :  { %11504 = vmatprep.subr.bf16.mxu0 %v12178_v0 }
0x43e7   :  { %v5053_v3 = vpop.f32.mrb[60].mxu0 }
0x43e8   :  { %v5054_v6 = vadd.f32 %v12764_v23, %v5053_v3  ;;  %v10558_v8 = vpop.f32.mrb[61].mxu0 }
0x43ea   :  { %v5057_v11 = vmul.f32 %v5054_v6, %v13058_v54  ;;  %v5138_v18 = vadd.f32 %v5054_v6, %v4978_v62 }
0x43ec   :  { %v5058_v12 = vadd.f32 %v5057_v11, %v13048_v51  ;;  %v5139_v19 = vmul.f32 2.0, %v5138_v18 }
0x43ee   :  { %11941 = vtanh.f32 %v5058_v12  ;;  %v5140_v16 = vadd.f32 %v5139_v19, %v4902_v55 }
0x43f8   :  { %v11942_v28 = vpop.eup %11941 }
0x43f9   :  { %10568 = vmatmul.mubr.msk.f32.vlgmr.msra.gmra.mrb[60].mxu1 %vm109_vm1, %v11942_v28  ;;  %v13087_v17 = vadd.f32 %v11942_v28, %v5062_v15 }
0x43fa   :  { %11500 = vmatpush3.bf16.msra.mxu1 %v12323_v10  ;;  %10589 = vmatprep.mubr.msk.f32.mxu1 %vm12179_vm0, %v12180_v1 }
0x43fb   :  { %11501 = vmatprep.subr.bf16.mxu1 %v12178_v0 }
0x43fe   :  { %11503 = vmatpush3.bf16.msra.mxu1 %v12328_v13 }
0x43ff   :  { %11510 = vmatprep.subr.bf16.mxu1 %v12178_v0 }
0x44cc   :  { %v5134_v14 = vpop.f32.mrb[60].mxu1 }
0x44cd   :  { %v5135_v20 = vadd.f32 %v12764_v23, %v5134_v14  ;;  %v10569_v59 = vpop.f32.mrb[61].mxu1 }
0x44cf   :  { %v5141_v29 = vadd.f32 %v5140_v16, %v5135_v20 }
0x44d1   :  { %v5142_v30 = vmul.f32 %v5141_v29, %v13097_v26 }
0x44d3   :  { %v5143_v31 = vadd.f32 %v5142_v30, %v13048_v51 }
0x44d5   :  { %11943 = vtanh.f32 %v5143_v31 }
0x44df   :  { %v11944_v33 = vpop.eup %11943 }
0x44e0   :  { %10579 = vmatmul.mubr.msk.f32.vlgmr.msra.gmra.mrb[62].mxu0 %vm109_vm1, %v11944_v33 }
0x44e1   :  { %11506 = vmatpush3.bf16.msra.mxu0 %v12323_v10  ;;  %10600 = vmatprep.mubr.msk.f32.mxu0 %vm12179_vm0, %v12180_v1 }
0x44e2   :  { %11507 = vmatprep.subr.bf16.mxu0 %v12178_v0 }
0x44e5   :  { %11509 = vmatpush3.bf16.msra.mxu0 %v12328_v13 }
0x44e6   :  { %11516 = vmatprep.subr.bf16.mxu0 %v12178_v0 }
0x45b3   :  { %v5214_v42 = vpop.f32.mrb[62].mxu0 }
0x45b4   :  { %v5215_v35 = vadd.f32 %v12764_v23, %v5214_v42  ;;  %v10580_v36 = vpop.f32.mrb[63].mxu0 }
0x45b6   :  { %v5218_v38 = vmul.f32 %v5215_v35, %v13061_v27 }
0x45b8   :  { %v5219_v39 = vadd.f32 %v5218_v38, %v5143_v31 }
0x45ba   :  { %11945 = vtanh.f32 %v5219_v39 }
0x45c4   :  { %v11946_v47 = vpop.eup %11945 }
0x45c5   :  { %10590 = vmatmul.mubr.msk.f32.vlgmr.msra.gmra.mrb[62].mxu1 %vm109_vm1, %v11946_v47 }
0x45c6   :  { %11512 = vmatpush3.bf16.msra.mxu1 %v12323_v10  ;;  %10611 = vmatprep.mubr.msk.f32.mxu1 %vm12179_vm0, %v12180_v1 }
0x45c7   :  { %11513 = vmatprep.subr.bf16.mxu1 %v12178_v0 }
0x45ca   :  { %11515 = vmatpush3.bf16.msra.mxu1 %v12328_v13 }
0x45cb   :  { %11522 = vmatprep.subr.bf16.mxu1 %v12178_v0 }
0x4698   :  { %v5290_v43 = vpop.f32.mrb[62].mxu1 }
0x4699   :  { %v5291_v44 = vadd.f32 %v12764_v23, %v5290_v43  ;;  %v10591_v56 = vpop.f32.mrb[63].mxu1 }
0x469b   :  { %v5294_v5 = vmul.f32 %v5291_v44, %v13061_v27 }
0x469d   :  { %v5295_v9 = vadd.f32 %v5294_v5, %v5143_v31 }
0x469f   :  { %11947 = vtanh.f32 %v5295_v9 }
0x46a9   :  { %v11948_v51 = vpop.eup %11947 }
0x46aa   :  { %10601 = vmatmul.mubr.msk.f32.vlgmr.msra.gmra.mrb[64].mxu0 %vm109_vm1, %v11948_v51  ;;  %v5373_v57 = vadd.f32 %v11948_v51, %v11946_v47 }
0x46ab   :  { %11518 = vmatpush3.bf16.msra.mxu0 %v12323_v10  ;;  %10622 = vmatprep.mubr.msk.f32.mxu0 %vm12179_vm0, %v12180_v1 }
0x46ac   :  { %11519 = vmatprep.subr.bf16.mxu0 %v12178_v0  ;;  %v5374_v58 = vmul.f32 2.0, %v5373_v57 }
0x46ae   :  { %v5375_v60 = vadd.f32 %v11944_v33, %v5374_v58 }
0x46af   :  { %11521 = vmatpush3.bf16.msra.mxu0 %v12328_v13 }
0x46b0   :  { %11528 = vmatprep.subr.bf16.mxu0 %v12178_v0 }
0x477d   :  { %v5366_v52 = vpop.f32.mrb[64].mxu0 }
0x477e   :  { %v5367_v53 = vadd.f32 %v12764_v23, %v5366_v52  ;;  %v10602_v45 = vpop.f32.mrb[65].mxu0 }
0x4780   :  { %v5370_v55 = vmul.f32 %v5367_v53, %v13058_v54  ;;  %v5451_v21 = vadd.f32 %v5367_v53, %v5291_v44 }
0x4782   :  { %v5371_v37 = vadd.f32 %v5370_v55, %v5143_v31  ;;  %v5452_v63 = vmul.f32 2.0, %v5451_v21 }
0x4784   :  { %11949 = vtanh.f32 %v5371_v37  ;;  %v5453_v6 = vadd.f32 %v5452_v63, %v5215_v35 }
0x478e   :  { %v11950_v61 = vpop.eup %11949 }
0x478f   :  { %10612 = vmatmul.mubr.msk.f32.vlgmr.msra.gmra.mrb[64].mxu1 %vm109_vm1, %v11950_v61  ;;  %v5376_v62 = vadd.f32 %v11950_v61, %v5375_v60 }
0x4790   :  { %11524 = vmatpush3.bf16.msra.mxu1 %v12323_v10  ;;  %10633 = vmatprep.mubr.msk.f32.mxu1 %vm12179_vm0, %v12180_v1 }
0x4791   :  { %11525 = vmatprep.subr.bf16.mxu1 %v12178_v0  ;;  %v5377_v23 = vadd.f32 %v5376_v62, %v13087_v17 }
0x4794   :  { %11527 = vmatpush3.bf16.msra.mxu1 %v12328_v13 }
0x4795   :  { %11534 = vmatprep.subr.bf16.mxu1 %v12178_v0 }
0x4862   :  { %v5447_v2 = vpop.f32.mrb[64].mxu1 }
0x4863   :  { %v5448_v3 = vadd.f32 %v13139_v24, %v5447_v2  ;;  %v10613_v8 = vpop.f32.mrb[65].mxu1 }
0x4864   :  { %v9278_v8 = vld [vmem:[%s13677_s1 + $0x14] sm:$0xf] }
0x4865   :  { %v5454_v11 = vadd.f32 %v5453_v6, %v5448_v3 }
0x4867   :  { %v5455_v12 = vmul.f32 %v5454_v11, %v13097_v26 }
0x4869   :  { %v5456_v48 = vadd.f32 %v5455_v12, %v5143_v31  ;;  %v5878_v12 = vmul.f32 0.33333334, %v9278_v8 }
0x486b   :  { %11951 = vtanh.f32 %v5456_v48 }
0x4875   :  { %v11952_v41 = vpop.eup %11951 }
0x4876   :  { %10623 = vmatmul.mubr.msk.f32.vlgmr.msra.gmra.mrb[66].mxu0 %vm109_vm1, %v11952_v41 }
0x4877   :  { %11530 = vmatpush3.bf16.msra.mxu0 %v12323_v10  ;;  %10644 = vmatprep.mubr.msk.f32.mxu0 %vm12179_vm0, %v12180_v1 }
0x4878   :  { %11531 = vmatprep.subr.bf16.mxu0 %v12178_v0 }
0x487b   :  { %11533 = vmatpush3.bf16.msra.mxu0 %v12328_v13 }
0x487c   :  { %11540 = vmatprep.subr.bf16.mxu0 %v12178_v0 }
0x4949   :  { %v5527_v15 = vpop.f32.mrb[66].mxu0 }
0x494a   :  { %v5528_v28 = vadd.f32 %v13139_v24, %v5527_v15  ;;  %v10624_v17 = vpop.f32.mrb[67].mxu0 }
0x494c   :  { %v5531_v18 = vmul.f32 %v5528_v28, %v13061_v27 }
0x494e   :  { %v5532_v19 = vadd.f32 %v5531_v18, %v5456_v48 }
0x4950   :  { %11953 = vtanh.f32 %v5532_v19 }
0x495a   :  { %v11954_v14 = vpop.eup %11953 }
0x495b   :  { %10634 = vmatmul.mubr.msk.f32.vlgmr.msra.gmra.mrb[66].mxu1 %vm109_vm1, %v11954_v14 }
0x495c   :  { %11536 = vmatpush3.bf16.msra.mxu1 %v12491_v49  ;;  %10655 = vmatprep.mubr.msk.f32.mxu1 %vm12179_vm0, %v12180_v1 }
0x495d   :  { %11537 = vmatprep.subr.bf16.mxu1 %v12178_v0 }
0x4960   :  { %11539 = vmatpush3.bf16.msra.mxu1 %v12494_v25 }
0x4961   :  { %11546 = vmatprep.subr.bf16.mxu1 %v12178_v0 }
0x4a2e   :  { %v5603_v20 = vpop.f32.mrb[66].mxu1 }
0x4a2f   :  { %v5604_v16 = vadd.f32 %v13139_v24, %v5603_v20  ;;  %v10635_v59 = vpop.f32.mrb[67].mxu1 }
0x4a31   :  { %v5607_v29 = vmul.f32 %v5604_v16, %v13061_v27 }
0x4a33   :  { %v5608_v30 = vadd.f32 %v5607_v29, %v5456_v48 }
0x4a35   :  { %11955 = vtanh.f32 %v5608_v30 }
0x4a3f   :  { %v11956_v31 = vpop.eup %11955 }
0x4a40   :  { %10645 = vmatmul.mubr.msk.f32.vlgmr.msra.gmra.mrb[68].mxu0 %vm109_vm1, %v11956_v31  ;;  %v5686_v38 = vadd.f32 %v11956_v31, %v11954_v14 }
0x4a41   :  { %11542 = vmatpush3.bf16.msra.mxu0 %v12317_v4  ;;  %10666 = vmatprep.mubr.msk.f32.mxu0 %vm12179_vm0, %v12180_v1 }
0x4a42   :  { %11543 = vmatprep.subr.bf16.mxu0 %v12178_v0  ;;  %v5687_v39 = vmul.f32 2.0, %v5686_v38 }
0x4a44   :  { %v5688_v47 = vadd.f32 %v11952_v41, %v5687_v39 }
0x4a45   :  { %11545 = vmatpush3.bf16.msra.mxu0 %v12320_v7 }
0x4a46   :  { %11552 = vmatprep.subr.bf16.mxu0 %v12178_v0 }
0x4b13   :  { %v5679_v33 = vpop.f32.mrb[68].mxu0 }
0x4b14   :  { %v5680_v42 = vadd.f32 %v13139_v24, %v5679_v33  ;;  %v10646_v27 = vpop.f32.mrb[69].mxu0 }
0x4b16   :  { %v5683_v35 = vmul.f32 %v5680_v42, %v13058_v54 }
0x4b18   :  { %v5684_v36 = vadd.f32 %v5683_v35, %v5456_v48 }
0x4b1a   :  { %11957 = vtanh.f32 %v5684_v36 }
0x4b24   :  { %v11958_v43 = vpop.eup %11957 }
0x4b25   :  { %v5689_v44 = vadd.f32 %v11958_v43, %v5688_v47 }
0x4b27   :  { %v5690_v56 = vadd.f32 %v5689_v44, %v5377_v23 }
0x4b29   :  { %10656 = vmatmul.mubr.msk.f32.vlgmr.msra.gmra.mrb[68].mxu1 %vm109_vm1, %v5690_v56 }
0x4b2a   :  { %11548 = vmatpush3.bf16.msra.mxu1 %v12344_v32  ;;  %10677 = vmatprep.mubr.msk.f32.mxu1 %vm12179_vm0, %v12180_v1 }
0x4b2b   :  { %11549 = vmatprep.subr.bf16.mxu1 %v12178_v0 }
0x4b2e   :  { %11551 = vmatpush3.bf16.msra.mxu1 %v12347_v34 }
0x4b2f   :  { %11558 = vmatprep.subr.bf16.mxu1 %v12178_v0 }
0x4bfc   :  { %v5760_v54 = vpop.f32.mrb[68].mxu1 }
0x4bfd   :  { %v5761_v5 = vadd.f32 %v5760_v54, %v12512_v46  ;;  %v10657_v9 = vpop.f32.mrb[69].mxu1 }
0x4bff   :  { %v5764_v51 = vmul.f32 %v5761_v5, %v13097_v26 }
0x4c01   :  { %5766 = vrot.lane.b32.xlu0 %v5764_v51, %s12184_s2 }
0x4c73   :  { %v5767_v52 = vpop.permute.xlu0 %5766 }
0x4c74   :  { %v5769_v53 = vadd.f32 %v5767_v52, %v13036_v50  ;;  %v9274_v50 = vld [vmem:[%s13676_s0 + $0x14] sm:$0xf] }
0x4c76   :  { %5771 = vrot.lane.b32.xlu1 %v5769_v53, %s12182_s16 }
0x4ce8   :  { %v5772_v45 = vpop.permute.xlu1 %5771 }
0x4ce9   :  { %5775 = vst.msk [vmem:[#allocation10 + $0x10] sm:$0xf] %vm1254_vm2, %v5772_v45  ;;  %10667 = vmatmul.mubr.msk.f32.vlgmr.msra.gmra.mrb[70].mxu0 %vm109_vm1, %v5772_v45 }
0x4cea   :  { %11554 = vmatpush3.bf16.msra.mxu0 %v12323_v10  ;;  %10688 = vmatprep.mubr.msk.f32.mxu0 %vm12179_vm0, %v12180_v1 }
0x4ceb   :  { %11555 = vmatprep.subr.bf16.mxu0 %v12178_v0 }
0x4cee   :  { %11557 = vmatpush3.bf16.msra.mxu0 %v12328_v13 }
0x4cef   :  { %11564 = vmatprep.subr.bf16.mxu0 %v12178_v0 }
0x4dbc   :  { %v5846_v26 = vpop.f32.mrb[70].mxu0 }
0x4dbd   :  { %v5850_v55 = vadd.f32 %v9274_v50, %v5846_v26  ;;  %v10668_v37 = vpop.f32.mrb[71].mxu0 }
0x4dbf   :  { %v9276_v57 = vmul.f32 -1.442695, %v5850_v55 }
0x4dc1   :  { %11959 = vpow2.f32 %v9276_v57 }
0x4dcb   :  { %v11960_v58 = vpop.eup %11959 }
0x4dcc   :  { %v5854_v60 = vadd.f32 1.0, %v11960_v58 }
0x4dce   :  { %11961 = vrcp.f32 %v5854_v60 }
0x4dd8   :  { %v11962_v61 = vpop.eup %11961 }
0x4dd9   :  { %v5857_v62 = vmul.f32 2.0, %v11962_v61  ;;  %v5859_v2 = vmul.f32 %v11962_v61, %v13029_v40 }
0x4ddb   :  { %v9277_v23 = vadd.f32 -1.0, %v5857_v62 }
0x4ddd   :  { %5861 = vrot.lane.b32.xlu0 %v9277_v23, %s12181_s22 }
0x4e4f   :  { %v5862_v21 = vpop.permute.xlu0 %5861 }
0x4e50   :  { %v5864_v63 = vmul.f32 %v11962_v61, %v5862_v21 }
0x4e52   :  { %5866 = vrot.lane.b32.xlu1 %v5864_v63, %s12182_s16 }
0x4ec4   :  { %v5867_v3 = vpop.permute.xlu1 %5866 }
0x4ec5   :  { %v13196_v6 = vadd.f32 %v5867_v3, %v5859_v2 }
0x4ec7   :  { %11963 = vtanh.f32 %v13196_v6 }
0x4ed1   :  { %v11964_v11 = vpop.eup %11963 }
0x4ed2   :  { %5872 = vrot.lane.b32.xlu0 %v11964_v11, %s12181_s22 }
0x4ed6   :  { %5881 = vperm.xlu0 %11807, %v5878_v12  }
0x4f44   :  { %v5873_v48 = vpop.permute.xlu0 %5872 }
0x4f45   :  { %v13203_v41 = vmul.f32 %v11962_v61, %v5873_v48 }
0x4f47   :  { %5887 = vrot.lane.b32.xlu1 %v13203_v41, %s12182_s16 }
0x4f55   :  { %v13225_v19 = vpop.permute.xlu0 %5881 }
0x4f56   :  { %v13228_v14 = vmul.f32 0.5, %v13225_v19  ;;  %v13264_v37 = vmul.f32 0.16666667, %v13225_v19 }
0x4fb9   :  { %v5888_v40 = vpop.permute.xlu1 %5887 }
0x4fba   :  { %10678 = vmatmul.mubr.msk.f32.vlgmr.msra.gmra.mrb[70].mxu1 %vm109_vm1, %v5888_v40 }
0x4fbb   :  { %11560 = vmatpush3.bf16.msra.mxu1 %v12323_v10  ;;  %10699 = vmatprep.mubr.msk.f32.mxu1 %vm12179_vm0, %v12180_v1 }
0x4fbc   :  { %11561 = vmatprep.subr.bf16.mxu1 %v12178_v0 }
0x4fbf   :  { %11563 = vmatpush3.bf16.msra.mxu1 %v12328_v13 }
0x4fc0   :  { %11570 = vmatprep.subr.bf16.mxu1 %v12178_v0 }
0x508d   :  { %v5957_v15 = vpop.f32.mrb[70].mxu1 }
0x508e   :  { %v13215_v28 = vadd.f32 %v12883_v22, %v5957_v15  ;;  %v10679_v17 = vpop.f32.mrb[71].mxu1 }
0x5090   :  { %11965 = vtanh.f32 %v13215_v28 }
0x509a   :  { %v11966_v18 = vpop.eup %11965 }
0x509b   :  { %10689 = vmatmul.mubr.msk.f32.vlgmr.msra.gmra.mrb[72].mxu0 %vm109_vm1, %v11966_v18 }
0x509c   :  { %11566 = vmatpush3.bf16.msra.mxu0 %v12323_v10  ;;  %10710 = vmatprep.mubr.msk.f32.mxu0 %vm12179_vm0, %v12180_v1 }
0x509d   :  { %11567 = vmatprep.subr.bf16.mxu0 %v12178_v0 }
0x50a0   :  { %11569 = vmatpush3.bf16.msra.mxu0 %v12328_v13 }
0x50a1   :  { %11576 = vmatprep.subr.bf16.mxu0 %v12178_v0 }
0x516e   :  { %v6031_v22 = vpop.f32.mrb[72].mxu0 }
0x516f   :  { %v6032_v20 = vadd.f32 %v13139_v24, %v6031_v22  ;;  %v10690_v16 = vpop.f32.mrb[73].mxu0 }
0x5171   :  { %v6035_v59 = vmul.f32 %v6032_v20, %v13228_v14 }
0x5173   :  { %v6036_v29 = vadd.f32 %v6035_v59, %v13215_v28 }
0x5175   :  { %11967 = vtanh.f32 %v6036_v29 }
0x517f   :  { %v11968_v30 = vpop.eup %11967 }
0x5180   :  { %10700 = vmatmul.mubr.msk.f32.vlgmr.msra.gmra.mrb[72].mxu1 %vm109_vm1, %v11968_v30 }
0x5181   :  { %11572 = vmatpush3.bf16.msra.mxu1 %v12323_v10  ;;  %10721 = vmatprep.mubr.msk.f32.mxu1 %vm12179_vm0, %v12180_v1 }
0x5182   :  { %11573 = vmatprep.subr.bf16.mxu1 %v12178_v0 }
0x5185   :  { %11575 = vmatpush3.bf16.msra.mxu1 %v12328_v13 }
0x5186   :  { %11582 = vmatprep.subr.bf16.mxu1 %v12178_v0 }
0x5253   :  { %v6107_v31 = vpop.f32.mrb[72].mxu1 }
0x5254   :  { %v6108_v33 = vadd.f32 %v13139_v24, %v6107_v31  ;;  %v10701_v42 = vpop.f32.mrb[73].mxu1 }
0x5256   :  { %v6111_v27 = vmul.f32 %v6108_v33, %v13228_v14 }
0x5258   :  { %v6112_v35 = vadd.f32 %v6111_v27, %v13215_v28 }
0x525a   :  { %11969 = vtanh.f32 %v6112_v35 }
0x5264   :  { %v11970_v36 = vpop.eup %11969 }
0x5265   :  { %10711 = vmatmul.mubr.msk.f32.vlgmr.msra.gmra.mrb[74].mxu0 %vm109_vm1, %v11970_v36  ;;  %v6190_v56 = vadd.f32 %v11970_v36, %v11968_v30 }
0x5266   :  { %11578 = vmatpush3.bf16.msra.mxu0 %v12323_v10  ;;  %10732 = vmatprep.mubr.msk.f32.mxu0 %vm12179_vm0, %v12180_v1 }
0x5267   :  { %11579 = vmatprep.subr.bf16.mxu0 %v12178_v0  ;;  %v6191_v54 = vmul.f32 2.0, %v6190_v56 }
0x5269   :  { %v6192_v5 = vadd.f32 %v11966_v18, %v6191_v54 }
0x526a   :  { %11581 = vmatpush3.bf16.msra.mxu0 %v12328_v13 }
0x526b   :  { %11588 = vmatprep.subr.bf16.mxu0 %v12178_v0 }
0x5338   :  { %v6183_v38 = vpop.f32.mrb[74].mxu0 }
0x5339   :  { %v6184_v39 = vadd.f32 %v13139_v24, %v6183_v38  ;;  %v10712_v47 = vpop.f32.mrb[75].mxu0 }
0x533b   :  { %v6187_v43 = vmul.f32 %v6184_v39, %v13225_v19  ;;  %v6268_v52 = vadd.f32 %v6184_v39, %v6108_v33 }
0x533d   :  { %v6188_v44 = vadd.f32 %v6187_v43, %v13215_v28  ;;  %v6269_v53 = vmul.f32 2.0, %v6268_v52 }
0x533f   :  { %11971 = vtanh.f32 %v6188_v44  ;;  %v6270_v26 = vadd.f32 %v6269_v53, %v6032_v20 }
0x5349   :  { %v11972_v9 = vpop.eup %11971 }
0x534a   :  { %10722 = vmatmul.mubr.msk.f32.vlgmr.msra.gmra.mrb[74].mxu1 %vm109_vm1, %v11972_v9  ;;  %v13254_v51 = vadd.f32 %v11972_v9, %v6192_v5 }
0x534b   :  { %11584 = vmatpush3.bf16.msra.mxu1 %v12323_v10  ;;  %10743 = vmatprep.mubr.msk.f32.mxu1 %vm12179_vm0, %v12180_v1 }
0x534c   :  { %11585 = vmatprep.subr.bf16.mxu1 %v12178_v0 }
0x534f   :  { %11587 = vmatpush3.bf16.msra.mxu1 %v12328_v13 }
0x5350   :  { %11594 = vmatprep.subr.bf16.mxu1 %v12178_v0 }
0x541d   :  { %v6264_v45 = vpop.f32.mrb[74].mxu1 }
0x541e   :  { %v6265_v50 = vadd.f32 %v13139_v24, %v6264_v45  ;;  %v10723_v55 = vpop.f32.mrb[75].mxu1 }
0x5420   :  { %v6271_v57 = vadd.f32 %v6270_v26, %v6265_v50 }
0x5422   :  { %v6272_v58 = vmul.f32 %v6271_v57, %v13264_v37 }
0x5424   :  { %v6273_v60 = vadd.f32 %v6272_v58, %v13215_v28 }
0x5426   :  { %11973 = vtanh.f32 %v6273_v60 }
0x5430   :  { %v11974_v61 = vpop.eup %11973 }
0x5431   :  { %10733 = vmatmul.mubr.msk.f32.vlgmr.msra.gmra.mrb[76].mxu0 %vm109_vm1, %v11974_v61 }
0x5432   :  { %11590 = vmatpush3.bf16.msra.mxu0 %v12323_v10  ;;  %10754 = vmatprep.mubr.msk.f32.mxu0 %vm12179_vm0, %v12180_v1 }
0x5433   :  { %11591 = vmatprep.subr.bf16.mxu0 %v12178_v0 }
0x5436   :  { %11593 = vmatpush3.bf16.msra.mxu0 %v12328_v13 }
0x5437   :  { %11600 = vmatprep.subr.bf16.mxu0 %v12178_v0 }
0x5504   :  { %v6344_v62 = vpop.f32.mrb[76].mxu0 }
0x5505   :  { %v6345_v23 = vadd.f32 %v13139_v24, %v6344_v62  ;;  %v10734_v21 = vpop.f32.mrb[77].mxu0 }
0x5507   :  { %v6348_v63 = vmul.f32 %v6345_v23, %v13228_v14 }
0x5509   :  { %v6349_v2 = vadd.f32 %v6348_v63, %v6273_v60 }
0x550b   :  { %11975 = vtanh.f32 %v6349_v2 }
0x5515   :  { %v11976_v3 = vpop.eup %11975 }
0x5516   :  { %10744 = vmatmul.mubr.msk.f32.vlgmr.msra.gmra.mrb[76].mxu1 %vm109_vm1, %v11976_v3 }
0x5517   :  { %11596 = vmatpush3.bf16.msra.mxu1 %v12323_v10  ;;  %10765 = vmatprep.mubr.msk.f32.mxu1 %vm12179_vm0, %v12180_v1 }
0x5518   :  { %11597 = vmatprep.subr.bf16.mxu1 %v12178_v0 }
0x551b   :  { %11599 = vmatpush3.bf16.msra.mxu1 %v12328_v13 }
0x551c   :  { %11606 = vmatprep.subr.bf16.mxu1 %v12178_v0 }
0x55e9   :  { %v6420_v8 = vpop.f32.mrb[76].mxu1 }
0x55ea   :  { %v6421_v11 = vadd.f32 %v13139_v24, %v6420_v8  ;;  %v10745_v12 = vpop.f32.mrb[77].mxu1 }
0x55ec   :  { %v6424_v48 = vmul.f32 %v6421_v11, %v13228_v14 }
0x55ee   :  { %v6425_v40 = vadd.f32 %v6424_v48, %v6273_v60 }
0x55f0   :  { %11977 = vtanh.f32 %v6425_v40 }
0x55fa   :  { %v11978_v15 = vpop.eup %11977 }
0x55fb   :  { %10755 = vmatmul.mubr.msk.f32.vlgmr.msra.gmra.mrb[78].mxu0 %vm109_vm1, %v11978_v15  ;;  %v6503_v16 = vadd.f32 %v11978_v15, %v11976_v3 }
0x55fc   :  { %11602 = vmatpush3.bf16.msra.mxu0 %v12323_v10  ;;  %10776 = vmatprep.mubr.msk.f32.mxu0 %vm12179_vm0, %v12180_v1 }
0x55fd   :  { %11603 = vmatprep.subr.bf16.mxu0 %v12178_v0  ;;  %v6504_v59 = vmul.f32 2.0, %v6503_v16 }
0x55ff   :  { %v6505_v29 = vadd.f32 %v11974_v61, %v6504_v59 }
0x5600   :  { %11605 = vmatpush3.bf16.msra.mxu0 %v12328_v13 }
0x5601   :  { %11612 = vmatprep.subr.bf16.mxu0 %v12178_v0 }
0x56ce   :  { %v6496_v28 = vpop.f32.mrb[78].mxu0 }
0x56cf   :  { %v6497_v17 = vadd.f32 %v13139_v24, %v6496_v28  ;;  %v10756_v18 = vpop.f32.mrb[79].mxu0 }
0x56d1   :  { %v6500_v22 = vmul.f32 %v6497_v17, %v13225_v19  ;;  %v6581_v42 = vadd.f32 %v6497_v17, %v6421_v11 }
0x56d3   :  { %v6501_v20 = vadd.f32 %v6500_v22, %v6273_v60  ;;  %v6582_v27 = vmul.f32 2.0, %v6581_v42 }
0x56d5   :  { %11979 = vtanh.f32 %v6501_v20  ;;  %v6583_v38 = vadd.f32 %v6582_v27, %v6345_v23 }
0x56df   :  { %v11980_v30 = vpop.eup %11979 }
0x56e0   :  { %10766 = vmatmul.mubr.msk.f32.vlgmr.msra.gmra.mrb[78].mxu1 %vm109_vm1, %v11980_v30  ;;  %v6506_v31 = vadd.f32 %v11980_v30, %v6505_v29 }
0x56e1   :  { %11608 = vmatpush3.bf16.msra.mxu1 %v12323_v10  ;;  %10787 = vmatprep.mubr.msk.f32.mxu1 %vm12179_vm0, %v12180_v1 }
0x56e2   :  { %11609 = vmatprep.subr.bf16.mxu1 %v12178_v0  ;;  %v6507_v33 = vadd.f32 %v6506_v31, %v13254_v51 }
0x56e5   :  { %11611 = vmatpush3.bf16.msra.mxu1 %v12328_v13 }
0x56e6   :  { %11618 = vmatprep.subr.bf16.mxu1 %v12178_v0 }
0x57b3   :  { %v6577_v35 = vpop.f32.mrb[78].mxu1 }
0x57b4   :  { %v6578_v36 = vadd.f32 %v13139_v24, %v6577_v35  ;;  %v10767_v39 = vpop.f32.mrb[79].mxu1 }
0x57b6   :  { %v6584_v47 = vadd.f32 %v6583_v38, %v6578_v36  ;;  %v9296_v38 = vld [vmem:[%s13677_s1 + $0x18] sm:$0xf] }
0x57b8   :  { %v6585_v43 = vmul.f32 %v6584_v47, %v13264_v37  ;;  %v7008_v47 = vmul.f32 0.33333334, %v9296_v38 }
0x57ba   :  { %v6586_v44 = vadd.f32 %v6585_v43, %v6273_v60 }
0x57bc   :  { %11981 = vtanh.f32 %v6586_v44 }
0x57c6   :  { %v11982_v56 = vpop.eup %11981 }
0x57c7   :  { %10777 = vmatmul.mubr.msk.f32.vlgmr.msra.gmra.mrb[80].mxu0 %vm109_vm1, %v11982_v56 }
0x57c8   :  { %11614 = vmatpush3.bf16.msra.mxu0 %v12323_v10  ;;  %10798 = vmatprep.mubr.msk.f32.mxu0 %vm12179_vm0, %v12180_v1 }
0x57c9   :  { %11615 = vmatprep.subr.bf16.mxu0 %v12178_v0 }
0x57cc   :  { %11617 = vmatpush3.bf16.msra.mxu0 %v12328_v13 }
0x57cd   :  { %11624 = vmatprep.subr.bf16.mxu0 %v12178_v0 }
0x589a   :  { %v6657_v54 = vpop.f32.mrb[80].mxu0 }
0x589b   :  { %v6658_v5 = vadd.f32 %v13139_v24, %v6657_v54  ;;  %v10778_v9 = vpop.f32.mrb[81].mxu0  ;;  %v13379_v54 = vld [vmem:[%s13680_s4] ss:$0 sm:$0xff] }
0x589d   :  { %v6661_v51 = vmul.f32 %v6658_v5, %v13228_v14 }
0x589f   :  { %v6662_v52 = vadd.f32 %v6661_v51, %v6586_v44 }
0x58a1   :  { %11983 = vtanh.f32 %v6662_v52 }
0x58ab   :  { %v11984_v53 = vpop.eup %11983 }
0x58ac   :  { %10788 = vmatmul.mubr.msk.f32.vlgmr.msra.gmra.mrb[80].mxu1 %vm109_vm1, %v11984_v53 }
0x58ad   :  { %11620 = vmatpush3.bf16.msra.mxu1 %v12491_v49  ;;  %10809 = vmatprep.mubr.msk.f32.mxu1 %vm12179_vm0, %v12180_v1 }
0x58ae   :  { %11621 = vmatprep.subr.bf16.mxu1 %v12178_v0 }
0x58b1   :  { %11623 = vmatpush3.bf16.msra.mxu1 %v12494_v25 }
0x58b2   :  { %11630 = vmatprep.subr.bf16.mxu1 %v12178_v0 }
0x597f   :  { %v6733_v45 = vpop.f32.mrb[80].mxu1 }
0x5980   :  { %v6734_v50 = vadd.f32 %v13139_v24, %v6733_v45  ;;  %v10789_v26 = vpop.f32.mrb[81].mxu1 }
0x5982   :  { %v6737_v55 = vmul.f32 %v6734_v50, %v13228_v14 }
0x5984   :  { %v6738_v57 = vadd.f32 %v6737_v55, %v6586_v44 }
0x5986   :  { %11985 = vtanh.f32 %v6738_v57 }
0x5990   :  { %v11986_v58 = vpop.eup %11985 }
0x5991   :  { %10799 = vmatmul.mubr.msk.f32.vlgmr.msra.gmra.mrb[82].mxu0 %vm109_vm1, %v11986_v58  ;;  %v6816_v21 = vadd.f32 %v11986_v58, %v11984_v53 }
0x5992   :  { %11626 = vmatpush3.bf16.msra.mxu0 %v12317_v4  ;;  %10820 = vmatprep.mubr.msk.f32.mxu0 %vm12179_vm0, %v12180_v1 }
0x5993   :  { %11627 = vmatprep.subr.bf16.mxu0 %v12178_v0  ;;  %v6817_v63 = vmul.f32 2.0, %v6816_v21 }
0x5995   :  { %v6818_v2 = vadd.f32 %v11982_v56, %v6817_v63 }
0x5996   :  { %11629 = vmatpush3.bf16.msra.mxu0 %v12320_v7 }
0x5997   :  { %11636 = vmatprep.subr.bf16.mxu0 %v12178_v0 }
0x5a64   :  { %v6809_v60 = vpop.f32.mrb[82].mxu0 }
0x5a65   :  { %v6810_v61 = vadd.f32 %v13139_v24, %v6809_v60  ;;  %v10800_v14 = vpop.f32.mrb[83].mxu0 }
0x5a67   :  { %v6813_v62 = vmul.f32 %v6810_v61, %v13225_v19 }
0x5a69   :  { %v6814_v23 = vadd.f32 %v6813_v62, %v6586_v44 }
0x5a6b   :  { %11987 = vtanh.f32 %v6814_v23 }
0x5a75   :  { %v11988_v3 = vpop.eup %11987 }
0x5a76   :  { %v6819_v8 = vadd.f32 %v11988_v3, %v6818_v2 }
0x5a78   :  { %v6820_v11 = vadd.f32 %v6819_v8, %v6507_v33 }
0x5a7a   :  { %10810 = vmatmul.mubr.msk.f32.vlgmr.msra.gmra.mrb[82].mxu1 %vm109_vm1, %v6820_v11 }
0x5a7b   :  { %11632 = vmatpush3.bf16.msra.mxu1 %v12344_v32  ;;  %10831 = vmatprep.mubr.msk.f32.mxu1 %vm12179_vm0, %v12180_v1 }
0x5a7c   :  { %11633 = vmatprep.subr.bf16.mxu1 %v12178_v0 }
0x5a7f   :  { %11635 = vmatpush3.bf16.msra.mxu1 %v12347_v34 }
0x5a80   :  { %11642 = vmatprep.subr.bf16.mxu1 %v12178_v0 }
0x5b4d   :  { %v6890_v19 = vpop.f32.mrb[82].mxu1 }
0x5b4e   :  { %v6891_v12 = vadd.f32 %v6890_v19, %v12512_v46  ;;  %v10811_v48 = vpop.f32.mrb[83].mxu1 }
0x5b50   :  { %v6894_v40 = vmul.f32 %v6891_v12, %v13264_v37 }
0x5b52   :  { %6896 = vrot.lane.b32.xlu1 %v6894_v40, %s12184_s2 }
0x5bc4   :  { %v6897_v15 = vpop.permute.xlu1 %6896 }
0x5bc5   :  { %v6899_v28 = vadd.f32 %v6897_v15, %v13203_v41  ;;  %v9292_v41 = vld [vmem:[%s13676_s0 + $0x18] sm:$0xf] }
0x5bc7   :  { %6901 = vrot.lane.b32.xlu0 %v6899_v28, %s12182_s16 }
0x5c39   :  { %v6902_v17 = vpop.permute.xlu0 %6901 }
0x5c3a   :  { %6905 = vst.msk [vmem:[#allocation10 + $0x14] sm:$0xf] %vm1254_vm2, %v6902_v17  ;;  %10821 = vmatmul.mubr.msk.f32.vlgmr.msra.gmra.mrb[84].mxu0 %vm109_vm1, %v6902_v17 }
0x5c3b   :  { %11638 = vmatpush3.bf16.msra.mxu0 %v12323_v10  ;;  %10842 = vmatprep.mubr.msk.f32.mxu0 %vm12179_vm0, %v12180_v1 }
0x5c3c   :  { %11639 = vmatprep.subr.bf16.mxu0 %v12178_v0 }
0x5c3f   :  { %11641 = vmatpush3.bf16.msra.mxu0 %v12328_v13 }
0x5c40   :  { %11648 = vmatprep.subr.bf16.mxu0 %v12178_v0 }
0x5d0d   :  { %v6976_v37 = vpop.f32.mrb[84].mxu0 }
0x5d0e   :  { %v6980_v18 = vadd.f32 %v9292_v41, %v6976_v37  ;;  %v10822_v22 = vpop.f32.mrb[85].mxu0 }
0x5d10   :  { %v9294_v20 = vmul.f32 -1.442695, %v6980_v18 }
0x5d12   :  { %11989 = vpow2.f32 %v9294_v20 }
0x5d1c   :  { %v11990_v16 = vpop.eup %11989 }
0x5d1d   :  { %v6984_v59 = vadd.f32 1.0, %v11990_v16 }
0x5d1f   :  { %11991 = vrcp.f32 %v6984_v59 }
0x5d29   :  { %v11992_v29 = vpop.eup %11991 }
0x5d2a   :  { %v6987_v30 = vmul.f32 2.0, %v11992_v29  ;;  %v6989_v27 = vmul.f32 %v11992_v29, %v13196_v6 }
0x5d2c   :  { %v9295_v31 = vadd.f32 -1.0, %v6987_v30 }
0x5d2e   :  { %6991 = vrot.lane.b32.xlu1 %v9295_v31, %s12181_s22 }
0x5da0   :  { %v6992_v33 = vpop.permute.xlu1 %6991 }
0x5da1   :  { %v6994_v42 = vmul.f32 %v11992_v29, %v6992_v33 }
0x5da3   :  { %6996 = vrot.lane.b32.xlu0 %v6994_v42, %s12182_s16 }
0x5e15   :  { %v6997_v35 = vpop.permute.xlu0 %6996 }
0x5e16   :  { %v13358_v36 = vadd.f32 %v6997_v35, %v6989_v27 }
0x5e18   :  { %11993 = vtanh.f32 %v13358_v36 }
0x5e22   :  { %v11994_v39 = vpop.eup %11993 }
0x5e23   :  { %7002 = vrot.lane.b32.xlu1 %v11994_v39, %s12181_s22 }
0x5e27   :  { %7011 = vperm.xlu1 %11808, %v7008_v47  }
0x5e95   :  { %v7003_v43 = vpop.permute.xlu1 %7002 }
0x5e96   :  { %v13365_v44 = vmul.f32 %v11992_v29, %v7003_v43 }
0x5e98   :  { %7017 = vrot.lane.b32.xlu0 %v13365_v44, %s12182_s16 }
0x5ea6   :  { %v13392_v52 = vpop.permute.xlu1 %7011 }
0x5ea7   :  { %v13395_v45 = vmul.f32 0.5, %v13392_v52  ;;  %v13431_v20 = vmul.f32 0.16666667, %v13392_v52 }
0x5f0a   :  { %v7018_v6 = vpop.permute.xlu0 %7017 }
0x5f0b   :  { %10832 = vmatmul.mubr.msk.f32.vlgmr.msra.gmra.mrb[84].mxu1 %vm109_vm1, %v7018_v6 }
0x5f0c   :  { %11644 = vmatpush3.bf16.msra.mxu1 %v12323_v10  ;;  %10853 = vmatprep.mubr.msk.f32.mxu1 %vm12179_vm0, %v12180_v1 }
0x5f0d   :  { %11645 = vmatprep.subr.bf16.mxu1 %v12178_v0 }
0x5f10   :  { %11647 = vmatpush3.bf16.msra.mxu1 %v12328_v13 }
0x5f11   :  { %11654 = vmatprep.subr.bf16.mxu1 %v12178_v0 }
0x5fde   :  { %v7087_v56 = vpop.f32.mrb[84].mxu1 }
0x5fdf   :  { %v13382_v5 = vadd.f32 %v13379_v54, %v7087_v56  ;;  %v10833_v9 = vpop.f32.mrb[85].mxu1 }
0x5fe1   :  { %11995 = vtanh.f32 %v13382_v5 }
0x5feb   :  { %v11996_v51 = vpop.eup %11995 }
0x5fec   :  { %10843 = vmatmul.mubr.msk.f32.vlgmr.msra.gmra.mrb[86].mxu0 %vm109_vm1, %v11996_v51 }
0x5fed   :  { %11650 = vmatpush3.bf16.msra.mxu0 %v12323_v10  ;;  %10864 = vmatprep.mubr.msk.f32.mxu0 %vm12179_vm0, %v12180_v1 }
0x5fee   :  { %11651 = vmatprep.subr.bf16.mxu0 %v12178_v0 }
0x5ff1   :  { %11653 = vmatpush3.bf16.msra.mxu0 %v12328_v13 }
0x5ff2   :  { %11660 = vmatprep.subr.bf16.mxu0 %v12178_v0 }
0x60bf   :  { %v7161_v53 = vpop.f32.mrb[86].mxu0 }
0x60c0   :  { %v7162_v50 = vadd.f32 %v13139_v24, %v7161_v53  ;;  %v10844_v26 = vpop.f32.mrb[87].mxu0 }
0x60c2   :  { %v7165_v55 = vmul.f32 %v7162_v50, %v13395_v45 }
0x60c4   :  { %v7166_v57 = vadd.f32 %v7165_v55, %v13382_v5 }
0x60c6   :  { %11997 = vtanh.f32 %v7166_v57 }
0x60d0   :  { %v11998_v58 = vpop.eup %11997 }
0x60d1   :  { %10854 = vmatmul.mubr.msk.f32.vlgmr.msra.gmra.mrb[86].mxu1 %vm109_vm1, %v11998_v58 }
0x60d2   :  { %11656 = vmatpush3.bf16.msra.mxu1 %v12323_v10  ;;  %10875 = vmatprep.mubr.msk.f32.mxu1 %vm12179_vm0, %v12180_v1 }
0x60d3   :  { %11657 = vmatprep.subr.bf16.mxu1 %v12178_v0 }
0x60d6   :  { %11659 = vmatpush3.bf16.msra.mxu1 %v12328_v13 }
0x60d7   :  { %11666 = vmatprep.subr.bf16.mxu1 %v12178_v0 }
0x61a4   :  { %v7237_v60 = vpop.f32.mrb[86].mxu1 }
0x61a5   :  { %v7238_v61 = vadd.f32 %v13139_v24, %v7237_v60  ;;  %v10855_v14 = vpop.f32.mrb[87].mxu1 }
0x61a7   :  { %v7241_v62 = vmul.f32 %v7238_v61, %v13395_v45 }
0x61a9   :  { %v7242_v23 = vadd.f32 %v7241_v62, %v13382_v5 }
0x61ab   :  { %11999 = vtanh.f32 %v7242_v23 }
0x61b5   :  { %v12000_v21 = vpop.eup %11999 }
0x61b6   :  { %10865 = vmatmul.mubr.msk.f32.vlgmr.msra.gmra.mrb[88].mxu0 %vm109_vm1, %v12000_v21  ;;  %v7320_v19 = vadd.f32 %v12000_v21, %v11998_v58 }
0x61b7   :  { %11662 = vmatpush3.bf16.msra.mxu0 %v12323_v10  ;;  %10886 = vmatprep.mubr.msk.f32.mxu0 %vm12179_vm0, %v12180_v1 }
0x61b8   :  { %11663 = vmatprep.subr.bf16.mxu0 %v12178_v0  ;;  %v7321_v12 = vmul.f32 2.0, %v7320_v19 }
0x61ba   :  { %v7322_v48 = vadd.f32 %v11996_v51, %v7321_v12 }
0x61bb   :  { %11665 = vmatpush3.bf16.msra.mxu0 %v12328_v13 }
0x61bc   :  { %11672 = vmatprep.subr.bf16.mxu0 %v12178_v0 }
0x6289   :  { %v7313_v63 = vpop.f32.mrb[88].mxu0 }
0x628a   :  { %v7314_v2 = vadd.f32 %v13139_v24, %v7313_v63  ;;  %v10866_v3 = vpop.f32.mrb[89].mxu0 }
0x628c   :  { %v7317_v8 = vmul.f32 %v7314_v2, %v13392_v52  ;;  %v7398_v28 = vadd.f32 %v7314_v2, %v7238_v61 }
0x628e   :  { %v7318_v11 = vadd.f32 %v7317_v8, %v13382_v5  ;;  %v7399_v17 = vmul.f32 2.0, %v7398_v28 }
0x6290   :  { %12001 = vtanh.f32 %v7318_v11  ;;  %v7400_v18 = vadd.f32 %v7399_v17, %v7162_v50 }
0x629a   :  { %v12002_v40 = vpop.eup %12001 }
0x629b   :  { %10876 = vmatmul.mubr.msk.f32.vlgmr.msra.gmra.mrb[88].mxu1 %vm109_vm1, %v12002_v40  ;;  %v13421_v15 = vadd.f32 %v12002_v40, %v7322_v48 }
0x629c   :  { %11668 = vmatpush3.bf16.msra.mxu1 %v12323_v10  ;;  %10897 = vmatprep.mubr.msk.f32.mxu1 %vm12179_vm0, %v12180_v1 }
0x629d   :  { %11669 = vmatprep.subr.bf16.mxu1 %v12178_v0 }
0x62a0   :  { %11671 = vmatpush3.bf16.msra.mxu1 %v12328_v13 }
0x62a1   :  { %11678 = vmatprep.subr.bf16.mxu1 %v12178_v0 }
0x636e   :  { %v7394_v41 = vpop.f32.mrb[88].mxu1 }
0x636f   :  { %v7395_v37 = vadd.f32 %v13139_v24, %v7394_v41  ;;  %v10877_v22 = vpop.f32.mrb[89].mxu1 }
0x6371   :  { %v7401_v16 = vadd.f32 %v7400_v18, %v7395_v37 }
0x6373   :  { %v7402_v59 = vmul.f32 %v7401_v16, %v13431_v20 }
0x6375   :  { %v7403_v29 = vadd.f32 %v7402_v59, %v13382_v5 }
0x6377   :  { %12003 = vtanh.f32 %v7403_v29 }
0x6381   :  { %v12004_v30 = vpop.eup %12003 }
0x6382   :  { %10887 = vmatmul.mubr.msk.f32.vlgmr.msra.gmra.mrb[90].mxu0 %vm109_vm1, %v12004_v30 }
0x6383   :  { %11674 = vmatpush3.bf16.msra.mxu0 %v12323_v10  ;;  %10908 = vmatprep.mubr.msk.f32.mxu0 %vm12179_vm0, %v12180_v1 }
0x6384   :  { %11675 = vmatprep.subr.bf16.mxu0 %v12178_v0 }
0x6387   :  { %11677 = vmatpush3.bf16.msra.mxu0 %v12328_v13 }
0x6388   :  { %11684 = vmatprep.subr.bf16.mxu0 %v12178_v0 }
0x6455   :  { %v7474_v31 = vpop.f32.mrb[90].mxu0 }
0x6456   :  { %v7475_v33 = vadd.f32 %v13139_v24, %v7474_v31  ;;  %v10888_v42 = vpop.f32.mrb[91].mxu0 }
0x6458   :  { %v7478_v27 = vmul.f32 %v7475_v33, %v13395_v45 }
0x645a   :  { %v7479_v35 = vadd.f32 %v7478_v27, %v7403_v29 }
0x645c   :  { %12005 = vtanh.f32 %v7479_v35 }
0x6466   :  { %v12006_v38 = vpop.eup %12005 }
0x6467   :  { %10898 = vmatmul.mubr.msk.f32.vlgmr.msra.gmra.mrb[90].mxu1 %vm109_vm1, %v12006_v38 }
0x6468   :  { %11680 = vmatpush3.bf16.msra.mxu1 %v12323_v10  ;;  %10919 = vmatprep.mubr.msk.f32.mxu1 %vm12179_vm0, %v12180_v1 }
0x6469   :  { %11681 = vmatprep.subr.bf16.mxu1 %v12178_v0 }
0x646c   :  { %11683 = vmatpush3.bf16.msra.mxu1 %v12328_v13 }
0x646d   :  { %11690 = vmatprep.subr.bf16.mxu1 %v12178_v0 }
0x653a   :  { %v7550_v39 = vpop.f32.mrb[90].mxu1 }
0x653b   :  { %v7551_v47 = vadd.f32 %v13139_v24, %v7550_v39  ;;  %v10899_v43 = vpop.f32.mrb[91].mxu1 }
0x653d   :  { %v7554_v6 = vmul.f32 %v7551_v47, %v13395_v45 }
0x653f   :  { %v7555_v56 = vadd.f32 %v7554_v6, %v7403_v29 }
0x6541   :  { %12007 = vtanh.f32 %v7555_v56 }
0x654b   :  { %v12008_v5 = vpop.eup %12007 }
0x654c   :  { %10909 = vmatmul.mubr.msk.f32.vlgmr.msra.gmra.mrb[92].mxu0 %vm109_vm1, %v12008_v5  ;;  %v7633_v55 = vadd.f32 %v12008_v5, %v12006_v38 }
0x654d   :  { %11686 = vmatpush3.bf16.msra.mxu0 %v12323_v10  ;;  %10930 = vmatprep.mubr.msk.f32.mxu0 %vm12179_vm0, %v12180_v1 }
0x654e   :  { %11687 = vmatprep.subr.bf16.mxu0 %v12178_v0  ;;  %v7634_v57 = vmul.f32 2.0, %v7633_v55 }
0x6550   :  { %v7635_v58 = vadd.f32 %v12004_v30, %v7634_v57 }
0x6551   :  { %11689 = vmatpush3.bf16.msra.mxu0 %v12328_v13 }
0x6552   :  { %11696 = vmatprep.subr.bf16.mxu0 %v12178_v0 }
0x661f   :  { %v7626_v9 = vpop.f32.mrb[92].mxu0 }
0x6620   :  { %v7627_v51 = vadd.f32 %v13139_v24, %v7626_v9  ;;  %v10910_v53 = vpop.f32.mrb[93].mxu0 }
0x6622   :  { %v7630_v50 = vmul.f32 %v7627_v51, %v13392_v52  ;;  %v7711_v62 = vadd.f32 %v7627_v51, %v7551_v47 }
0x6624   :  { %v7631_v26 = vadd.f32 %v7630_v50, %v7403_v29  ;;  %v7712_v23 = vmul.f32 2.0, %v7711_v62  ;;  %v9314_v62 = vld [vmem:[%s13677_s1 + $0x1c] sm:$0xf] }
0x6626   :  { %12009 = vtanh.f32 %v7631_v26  ;;  %v7713_v2 = vadd.f32 %v7712_v23, %v7475_v33 }
0x6630   :  { %v12010_v60 = vpop.eup %12009 }
0x6631   :  { %10920 = vmatmul.mubr.msk.f32.vlgmr.msra.gmra.mrb[92].mxu1 %vm109_vm1, %v12010_v60  ;;  %v7636_v61 = vadd.f32 %v12010_v60, %v7635_v58 }
0x6632   :  { %11692 = vmatpush3.bf16.msra.mxu1 %v12323_v10  ;;  %10941 = vmatprep.mubr.msk.f32.mxu1 %vm12179_vm0, %v12180_v1 }
0x6633   :  { %11693 = vmatprep.subr.bf16.mxu1 %v12178_v0  ;;  %v7637_v14 = vadd.f32 %v7636_v61, %v13421_v15 }
0x6636   :  { %11695 = vmatpush3.bf16.msra.mxu1 %v12328_v13 }
0x6637   :  { %11702 = vmatprep.subr.bf16.mxu1 %v12178_v0 }
0x6704   :  { %v7707_v21 = vpop.f32.mrb[92].mxu1 }
0x6705   :  { %v7708_v63 = vadd.f32 %v13139_v24, %v7707_v21  ;;  %v10921_v3 = vpop.f32.mrb[93].mxu1  ;;  %v8138_v21 = vmul.f32 0.33333334, %v9314_v62 }
0x6707   :  { %v7714_v8 = vadd.f32 %v7713_v2, %v7708_v63 }
0x6709   :  { %v7715_v11 = vmul.f32 %v7714_v8, %v13431_v20 }
0x670b   :  { %v7716_v19 = vadd.f32 %v7715_v11, %v7403_v29 }
0x670d   :  { %12011 = vtanh.f32 %v7716_v19 }
0x6717   :  { %v12012_v12 = vpop.eup %12011 }
0x6718   :  { %10931 = vmatmul.mubr.msk.f32.vlgmr.msra.gmra.mrb[94].mxu0 %vm109_vm1, %v12012_v12 }
0x6719   :  { %11698 = vmatpush3.bf16.msra.mxu0 %v12323_v10  ;;  %10952 = vmatprep.mubr.msk.f32.mxu0 %vm12179_vm0, %v12180_v1 }
0x671a   :  { %11699 = vmatprep.subr.bf16.mxu0 %v12178_v0 }
0x671d   :  { %11701 = vmatpush3.bf16.msra.mxu0 %v12328_v13 }
0x671e   :  { %11708 = vmatprep.subr.bf16.mxu0 %v12178_v0 }
0x67eb   :  { %v7787_v48 = vpop.f32.mrb[94].mxu0 }
0x67ec   :  { %v7788_v40 = vadd.f32 %v13139_v24, %v7787_v48  ;;  %v10932_v15 = vpop.f32.mrb[95].mxu0 }
0x67ee   :  { %v7791_v28 = vmul.f32 %v7788_v40, %v13395_v45  ;;  %v13559_v40 = vld [vmem:[%s13682_s6] ss:$0 sm:$0xff]  ;;  %s12185_s6 = smov [#allocation10]  }
0x67ef   :  { %s9171_s15 = sshll.u32 %s12185_s6, 4  ;;  %s9172_s15 = int_to_ptr.vmem [resolvable:$true] %s9171_s15 }
0x67f0   :  { %v7792_v17 = vadd.f32 %v7791_v28, %v7716_v19  ;;  %s12142_s7 = scalar_lea.vmem %s9172_s15, 512  ;;  %p12147_p5 = scmp.lt.s32.totalorder %s9172_s15, %s9172_s15 }
0x67f1   :  { %p12143_p4 = scmp.ne.s32.totalorder %s9172_s15, %s12142_s7  ;;  %p12148_p6 = scmp.lt.s32.totalorder %s12142_s7, %s12142_s7 }
0x67f2   :  { %12013 = vtanh.f32 %v7792_v17 }
0x67f3   :  { %p12149_p7 = por %p12148_p6, %p12147_p5 }
0x67f5   :  { %p12150_p8 = pnand %p12149_p7, %p12143_p4 }
0x67fc   :  { %v12014_v41 = vpop.eup %12013 }
0x67fd   :  { %10942 = vmatmul.mubr.msk.f32.vlgmr.msra.gmra.mrb[94].mxu1 %vm109_vm1, %v12014_v41 }
0x67fe   :  { %11704 = vmatpush3.bf16.msra.mxu1 %v12491_v49  ;;  %10963 = vmatprep.mubr.msk.f32.mxu1 %vm12179_vm0, %v12180_v1 }
0x67ff   :  { %11705 = vmatprep.subr.bf16.mxu1 %v12178_v0 }
0x6802   :  { %11707 = vmatpush3.bf16.msra.mxu1 %v12494_v25 }
0x6803   :  { %11714 = vmatprep.subr.bf16.mxu1 %v12178_v0 }
0x68d0   :  { %v7863_v37 = vpop.f32.mrb[94].mxu1 }
0x68d1   :  { %v7864_v18 = vadd.f32 %v13139_v24, %v7863_v37  ;;  %v10943_v22 = vpop.f32.mrb[95].mxu1 }
0x68d3   :  { %v7867_v16 = vmul.f32 %v7864_v18, %v13395_v45 }
0x68d5   :  { %v7868_v59 = vadd.f32 %v7867_v16, %v7716_v19 }
0x68d7   :  { %12015 = vtanh.f32 %v7868_v59 }
0x68e1   :  { %v12016_v29 = vpop.eup %12015 }
0x68e2   :  { %10953 = vmatmul.mubr.msk.f32.vlgmr.msra.gmra.mrb[96].mxu0 %vm109_vm1, %v12016_v29  ;;  %v7946_v27 = vadd.f32 %v12016_v29, %v12014_v41 }
0x68e3   :  { %11710 = vmatpush3.bf16.msra.mxu0 %v12317_v4  ;;  %10974 = vmatprep.mubr.msk.f32.mxu0 %vm12179_vm0, %v12180_v1 }
0x68e4   :  { %11711 = vmatprep.subr.bf16.mxu0 %v12178_v0  ;;  %v7947_v35 = vmul.f32 2.0, %v7946_v27 }
0x68e6   :  { %v7948_v4 = vadd.f32 %v12012_v12, %v7947_v35 }
0x68e7   :  { %11713 = vmatpush3.bf16.msra.mxu0 %v12320_v7 }
0x68e8   :  { %11720 = vmatprep.subr.bf16.mxu0 %v12178_v0 }
0x69b5   :  { %v7939_v30 = vpop.f32.mrb[96].mxu0 }
0x69b6   :  { %v7940_v31 = vadd.f32 %v13139_v24, %v7939_v30  ;;  %v10954_v45 = vpop.f32.mrb[97].mxu0 }
0x69b8   :  { %v7943_v33 = vmul.f32 %v7940_v31, %v13392_v52 }
0x69ba   :  { %v7944_v42 = vadd.f32 %v7943_v33, %v7716_v19 }
0x69bc   :  { %12017 = vtanh.f32 %v7944_v42 }
0x69c6   :  { %v12018_v38 = vpop.eup %12017 }
0x69c7   :  { %v7949_v39 = vadd.f32 %v12018_v38, %v7948_v4 }
0x69c9   :  { %v7950_v47 = vadd.f32 %v7949_v39, %v7637_v14 }
0x69cb   :  { %10964 = vmatmul.mubr.msk.f32.vlgmr.msra.gmra.mrb[96].mxu1 %vm109_vm1, %v7950_v47 }
0x69cc   :  { %11716 = vmatpush3.bf16.msra.mxu1 %v12344_v32  ;;  %10985 = vmatprep.mubr.msk.f32.mxu1 %vm12179_vm0, %v12180_v1 }
0x69cd   :  { %11717 = vmatprep.subr.bf16.mxu1 %v12178_v0 }
0x69d0   :  { %11719 = vmatpush3.bf16.msra.mxu1 %v12347_v34  ;;  %v9310_v34 = vld [vmem:[%s13676_s0 + $0x1c] sm:$0xf] }
0x69d1   :  { %11726 = vmatprep.subr.bf16.mxu1 %v12178_v0 }
0x6a9e   :  { %v8020_v7 = vpop.f32.mrb[96].mxu1 }
0x6a9f   :  { %v8021_v24 = vadd.f32 %v8020_v7, %v12512_v46  ;;  %v10965_v52 = vpop.f32.mrb[97].mxu1 }
0x6aa1   :  { %v8024_v43 = vmul.f32 %v8021_v24, %v13431_v20 }
0x6aa3   :  { %8026 = vrot.lane.b32.xlu0 %v8024_v43, %s12184_s2 }
0x6b15   :  { %v8027_v6 = vpop.permute.xlu0 %8026 }
0x6b16   :  { %v8029_v32 = vadd.f32 %v8027_v6, %v13365_v44 }
0x6b18   :  { %8031 = vrot.lane.b32.xlu1 %v8029_v32, %s12182_s16 }
0x6b8a   :  { %v8032_v56 = vpop.permute.xlu1 %8031 }
0x6b8b   :  { %8035 = vst.msk [vmem:[#allocation10 + $0x18] sm:$0xf] %vm1254_vm2, %v8032_v56  ;;  %10975 = vmatmul.mubr.msk.f32.vlgmr.msra.gmra.mrb[98].mxu0 %vm109_vm1, %v8032_v56 }
0x6b8c   :  { %11722 = vmatpush3.bf16.msra.mxu0 %v12323_v10  ;;  %10996 = vmatprep.mubr.msk.f32.mxu0 %vm12179_vm0, %v12180_v1 }
0x6b8d   :  { %11723 = vmatprep.subr.bf16.mxu0 %v12178_v0 }
0x6b90   :  { %11725 = vmatpush3.bf16.msra.mxu0 %v12328_v13 }
0x6b91   :  { %11732 = vmatprep.subr.bf16.mxu0 %v12178_v0 }
0x6c5e   :  { %v8106_v44 = vpop.f32.mrb[98].mxu0 }
0x6c5f   :  { %v8110_v20 = vadd.f32 %v9310_v34, %v8106_v44  ;;  %v10976_v5 = vpop.f32.mrb[99].mxu0 }
0x6c61   :  { %v9312_v9 = vmul.f32 -1.442695, %v8110_v20 }
0x6c63   :  { %12019 = vpow2.f32 %v9312_v9 }
0x6c6d   :  { %v12020_v51 = vpop.eup %12019 }
0x6c6e   :  { %v8114_v53 = vadd.f32 1.0, %v12020_v51 }
0x6c70   :  { %12021 = vrcp.f32 %v8114_v53 }
0x6c7a   :  { %v12022_v50 = vpop.eup %12021 }
0x6c7b   :  { %v8117_v26 = vmul.f32 2.0, %v12022_v50  ;;  %v8119_v60 = vmul.f32 %v12022_v50, %v13358_v36 }
0x6c7d   :  { %v9313_v55 = vadd.f32 -1.0, %v8117_v26 }
0x6c7f   :  { %8121 = vrot.lane.b32.xlu0 %v9313_v55, %s12181_s22 }
0x6cf1   :  { %v8122_v57 = vpop.permute.xlu0 %8121 }
0x6cf2   :  { %v8124_v58 = vmul.f32 %v12022_v50, %v8122_v57 }
0x6cf4   :  { %8126 = vrot.lane.b32.xlu1 %v8124_v58, %s12182_s16 }
0x6d66   :  { %v8127_v61 = vpop.permute.xlu1 %8126 }
0x6d67   :  { %v8129_v14 = vadd.f32 %v8127_v61, %v8119_v60 }
0x6d69   :  { %12023 = vtanh.f32 %v8129_v14 }
0x6d73   :  { %v12024_v23 = vpop.eup %12023 }
0x6d74   :  { %8132 = vrot.lane.b32.xlu0 %v12024_v23, %s12181_s22 }
0x6d78   :  { %8141 = vperm.xlu0 %11807, %v8138_v21  }
0x6de6   :  { %v8133_v63 = vpop.permute.xlu0 %8132 }
0x6de7   :  { %v13529_v2 = vmul.f32 %v12022_v50, %v8133_v63 }
0x6de9   :  { %8147 = vrot.lane.b32.xlu1 %v13529_v2, %s12182_s16 }
0x6df7   :  { %v13551_v12 = vpop.permute.xlu0 %8141 }
0x6df8   :  { %v13554_v48 = vmul.f32 0.5, %v13551_v12  ;;  %v13595_v56 = vmul.f32 0.16666667, %v13551_v12 }
0x6e5b   :  { %v8148_v3 = vpop.permute.xlu1 %8147 }
0x6e5c   :  { %10986 = vmatmul.mubr.msk.f32.vlgmr.msra.gmra.mrb[98].mxu1 %vm109_vm1, %v8148_v3 }
0x6e5d   :  { %11728 = vmatpush3.bf16.msra.mxu1 %v12323_v10  ;;  %11007 = vmatprep.mubr.msk.f32.mxu1 %vm12179_vm0, %v12180_v1 }
0x6e5e   :  { %11729 = vmatprep.subr.bf16.mxu1 %v12178_v0 }
0x6e61   :  { %11731 = vmatpush3.bf16.msra.mxu1 %v12328_v13 }
0x6e62   :  { %11738 = vmatprep.subr.bf16.mxu1 %v12178_v0 }
0x6f2f   :  { %v8217_v36 = vpop.f32.mrb[98].mxu1 }
0x6f30   :  { %v13541_v8 = vadd.f32 %v13379_v54, %v8217_v36  ;;  %v10987_v11 = vpop.f32.mrb[99].mxu1 }
0x6f32   :  { %12025 = vtanh.f32 %v13541_v8 }
0x6f3c   :  { %v12026_v19 = vpop.eup %12025 }
0x6f3d   :  { %10997 = vmatmul.mubr.msk.f32.vlgmr.msra.gmra.mrb[100].mxu0 %vm109_vm1, %v12026_v19 }
0x6f3e   :  { %11734 = vmatpush3.bf16.msra.mxu0 %v12323_v10  ;;  %11018 = vmatprep.mubr.msk.f32.mxu0 %vm12179_vm0, %v12180_v1 }
0x6f3f   :  { %11735 = vmatprep.subr.bf16.mxu0 %v12178_v0 }
0x6f42   :  { %11737 = vmatpush3.bf16.msra.mxu0 %v12328_v13 }
0x6f43   :  { %11744 = vmatprep.subr.bf16.mxu0 %v12178_v0 }
0x7010   :  { %v8291_v54 = vpop.f32.mrb[100].mxu0 }
0x7011   :  { %v8292_v15 = vadd.f32 %v13559_v40, %v8291_v54  ;;  %v10998_v28 = vpop.f32.mrb[101].mxu0 }
0x7013   :  { %v8295_v17 = vmul.f32 %v8292_v15, %v13554_v48 }
0x7015   :  { %v8296_v41 = vadd.f32 %v8295_v17, %v13541_v8 }
0x7017   :  { %12027 = vtanh.f32 %v8296_v41 }
0x7021   :  { %v12028_v37 = vpop.eup %12027 }
0x7022   :  { %11008 = vmatmul.mubr.msk.f32.vlgmr.msra.gmra.mrb[100].mxu1 %vm109_vm1, %v12028_v37 }
0x7023   :  { %11740 = vmatpush3.bf16.msra.mxu1 %v12323_v10  ;;  %11029 = vmatprep.mubr.msk.f32.mxu1 %vm12179_vm0, %v12180_v1 }
0x7024   :  { %11741 = vmatprep.subr.bf16.mxu1 %v12178_v0 }
0x7027   :  { %11743 = vmatpush3.bf16.msra.mxu1 %v12328_v13 }
0x7028   :  { %11750 = vmatprep.subr.bf16.mxu1 %v12178_v0 }
0x70f5   :  { %v8367_v18 = vpop.f32.mrb[100].mxu1 }
0x70f6   :  { %v8368_v22 = vadd.f32 %v13559_v40, %v8367_v18  ;;  %v11009_v16 = vpop.f32.mrb[101].mxu1 }
0x70f8   :  { %v8371_v59 = vmul.f32 %v8368_v22, %v13554_v48 }
0x70fa   :  { %v8372_v29 = vadd.f32 %v8371_v59, %v13541_v8 }
0x70fc   :  { %12029 = vtanh.f32 %v8372_v29 }
0x7106   :  { %v12030_v30 = vpop.eup %12029 }
0x7107   :  { %11019 = vmatmul.mubr.msk.f32.vlgmr.msra.gmra.mrb[102].mxu0 %vm109_vm1, %v12030_v30  ;;  %v8450_v35 = vadd.f32 %v12030_v30, %v12028_v37 }
0x7108   :  { %11746 = vmatpush3.bf16.msra.mxu0 %v12323_v10  ;;  %11040 = vmatprep.mubr.msk.f32.mxu0 %vm12179_vm0, %v12180_v1 }
0x7109   :  { %11747 = vmatprep.subr.bf16.mxu0 %v12178_v0  ;;  %v8451_v4 = vmul.f32 2.0, %v8450_v35 }
0x710b   :  { %v8452_v38 = vadd.f32 %v12026_v19, %v8451_v4 }
0x710c   :  { %11749 = vmatpush3.bf16.msra.mxu0 %v12328_v13 }
0x710d   :  { %11756 = vmatprep.subr.bf16.mxu0 %v12178_v0 }
0x71da   :  { %v8443_v31 = vpop.f32.mrb[102].mxu0 }
0x71db   :  { %v8444_v45 = vadd.f32 %v13559_v40, %v8443_v31  ;;  %v11020_v33 = vpop.f32.mrb[103].mxu0 }
0x71dd   :  { %v8447_v42 = vmul.f32 %v8444_v45, %v13551_v12  ;;  %v8528_v7 = vadd.f32 %v8444_v45, %v8368_v22 }
0x71df   :  { %v8448_v27 = vadd.f32 %v8447_v42, %v13541_v8  ;;  %v8529_v24 = vmul.f32 2.0, %v8528_v7 }
0x71e1   :  { %12031 = vtanh.f32 %v8448_v27  ;;  %v8530_v6 = vadd.f32 %v8529_v24, %v8292_v15 }
0x71eb   :  { %v12032_v39 = vpop.eup %12031 }
0x71ec   :  { %11030 = vmatmul.mubr.msk.f32.vlgmr.msra.gmra.mrb[102].mxu1 %vm109_vm1, %v12032_v39  ;;  %v13585_v47 = vadd.f32 %v12032_v39, %v8452_v38 }
0x71ed   :  { %11752 = vmatpush3.bf16.msra.mxu1 %v12323_v10  ;;  %11051 = vmatprep.mubr.msk.f32.mxu1 %vm12179_vm0, %v12180_v1 }
0x71ee   :  { %11753 = vmatprep.subr.bf16.mxu1 %v12178_v0 }
0x71f1   :  { %11755 = vmatpush3.bf16.msra.mxu1 %v12328_v13 }
0x71f2   :  { %11762 = vmatprep.subr.bf16.mxu1 %v12178_v0 }
0x72bf   :  { %v8524_v52 = vpop.f32.mrb[102].mxu1 }
0x72c0   :  { %v8525_v43 = vadd.f32 %v13559_v40, %v8524_v52  ;;  %v11031_v32 = vpop.f32.mrb[103].mxu1 }
0x72c2   :  { %v8531_v34 = vadd.f32 %v8530_v6, %v8525_v43 }
0x72c4   :  { %v8532_v44 = vmul.f32 %v8531_v34, %v13595_v56 }
0x72c6   :  { %v8533_v20 = vadd.f32 %v8532_v44, %v13541_v8 }
0x72c8   :  { %12033 = vtanh.f32 %v8533_v20 }
0x72d2   :  { %v12034_v5 = vpop.eup %12033 }
0x72d3   :  { %11041 = vmatmul.mubr.msk.f32.vlgmr.msra.gmra.mrb[104].mxu0 %vm109_vm1, %v12034_v5 }
0x72d4   :  { %11758 = vmatpush3.bf16.msra.mxu0 %v12323_v10  ;;  %11062 = vmatprep.mubr.msk.f32.mxu0 %vm12179_vm0, %v12180_v1 }
0x72d5   :  { %11759 = vmatprep.subr.bf16.mxu0 %v12178_v0 }
0x72d8   :  { %11761 = vmatpush3.bf16.msra.mxu0 %v12328_v13 }
0x72d9   :  { %11768 = vmatprep.subr.bf16.mxu0 %v12178_v0 }
0x73a6   :  { %v8604_v9 = vpop.f32.mrb[104].mxu0 }
0x73a7   :  { %v8605_v51 = vadd.f32 %v13559_v40, %v8604_v9  ;;  %v11042_v53 = vpop.f32.mrb[105].mxu0 }
0x73a9   :  { %v8608_v50 = vmul.f32 %v8605_v51, %v13554_v48 }
0x73ab   :  { %v8609_v26 = vadd.f32 %v8608_v50, %v8533_v20 }
0x73ad   :  { %12035 = vtanh.f32 %v8609_v26 }
0x73b7   :  { %v12036_v55 = vpop.eup %12035 }
0x73b8   :  { %11052 = vmatmul.mubr.msk.f32.vlgmr.msra.gmra.mrb[104].mxu1 %vm109_vm1, %v12036_v55 }
0x73b9   :  { %11764 = vmatpush3.bf16.msra.mxu1 %v12323_v10  ;;  %11073 = vmatprep.mubr.msk.f32.mxu1 %vm12179_vm0, %v12180_v1 }
0x73ba   :  { %11765 = vmatprep.subr.bf16.mxu1 %v12178_v0 }
0x73bd   :  { %11767 = vmatpush3.bf16.msra.mxu1 %v12328_v13 }
0x73be   :  { %11774 = vmatprep.subr.bf16.mxu1 %v12178_v0 }
0x748b   :  { %v8680_v57 = vpop.f32.mrb[104].mxu1 }
0x748c   :  { %v8681_v58 = vadd.f32 %v13559_v40, %v8680_v57  ;;  %v11053_v60 = vpop.f32.mrb[105].mxu1 }
0x748e   :  { %v8684_v61 = vmul.f32 %v8681_v58, %v13554_v48 }
0x7490   :  { %v8685_v14 = vadd.f32 %v8684_v61, %v8533_v20 }
0x7492   :  { %12037 = vtanh.f32 %v8685_v14 }
0x749c   :  { %v12038_v62 = vpop.eup %12037 }
0x749d   :  { %11063 = vmatmul.mubr.msk.f32.vlgmr.msra.gmra.mrb[106].mxu0 %vm109_vm1, %v12038_v62  ;;  %v8763_v8 = vadd.f32 %v12038_v62, %v12036_v55 }
0x749e   :  { %11770 = vmatpush3.bf16.msra.mxu0 %v12323_v10  ;;  %11084 = vmatprep.mubr.msk.f32.mxu0 %vm12179_vm0, %v12180_v1 }
0x749f   :  { %11771 = vmatprep.subr.bf16.mxu0 %v12178_v0  ;;  %v8764_v11 = vmul.f32 2.0, %v8763_v8 }
0x74a1   :  { %v8765_v19 = vadd.f32 %v12034_v5, %v8764_v11 }
0x74a2   :  { %11773 = vmatpush3.bf16.msra.mxu0 %v12328_v13 }
0x74a3   :  { %11780 = vmatprep.subr.bf16.mxu0 %v12178_v0 }
0x7570   :  { %v8756_v23 = vpop.f32.mrb[106].mxu0 }
0x7571   :  { %v8757_v21 = vadd.f32 %v13559_v40, %v8756_v23  ;;  %v11064_v63 = vpop.f32.mrb[107].mxu0 }
0x7573   :  { %v8760_v3 = vmul.f32 %v8757_v21, %v13551_v12  ;;  %v8841_v17 = vadd.f32 %v8757_v21, %v8681_v58 }
0x7575   :  { %v8761_v36 = vadd.f32 %v8760_v3, %v8533_v20  ;;  %v8842_v41 = vmul.f32 2.0, %v8841_v17 }
0x7577   :  { %12039 = vtanh.f32 %v8761_v36  ;;  %v8843_v22 = vadd.f32 %v8842_v41, %v8605_v51 }
0x7581   :  { %v12040_v54 = vpop.eup %12039 }
0x7582   :  { %11074 = vmatmul.mubr.msk.f32.vlgmr.msra.gmra.mrb[106].mxu1 %vm109_vm1, %v12040_v54  ;;  %v8766_v15 = vadd.f32 %v12040_v54, %v8765_v19 }
0x7583   :  { %11776 = vmatpush3.bf16.msra.mxu1 %v12323_v10  ;;  %11095 = vmatprep.mubr.msk.f32.mxu1 %vm12179_vm0, %v12180_v1 }
0x7584   :  { %11777 = vmatprep.subr.bf16.mxu1 %v12178_v0  ;;  %v8767_v28 = vadd.f32 %v8766_v15, %v13585_v47 }
0x7587   :  { %11779 = vmatpush3.bf16.msra.mxu1 %v12328_v13 }
0x7588   :  { %11786 = vmatprep.subr.bf16.mxu1 %v12178_v0 }
0x7655   :  { %v8837_v37 = vpop.f32.mrb[106].mxu1 }
0x7656   :  { %v8838_v18 = vadd.f32 %v13559_v40, %v8837_v37  ;;  %v11075_v16 = vpop.f32.mrb[107].mxu1 }
0x7658   :  { %v8844_v59 = vadd.f32 %v8843_v22, %v8838_v18 }
0x765a   :  { %v8845_v29 = vmul.f32 %v8844_v59, %v13595_v56 }
0x765c   :  { %v8846_v30 = vadd.f32 %v8845_v29, %v8533_v20 }
0x765e   :  { %12041 = vtanh.f32 %v8846_v30 }
0x7668   :  { %v12042_v31 = vpop.eup %12041 }
0x7669   :  { %11085 = vmatmul.mubr.msk.f32.vlgmr.msra.gmra.mrb[108].mxu0 %vm109_vm1, %v12042_v31 }
0x766a   :  { %11782 = vmatpush3.bf16.msra.mxu0 %v12323_v10  ;;  %11106 = vmatprep.mubr.msk.f32.mxu0 %vm12179_vm0, %v12180_v1 }
0x766b   :  { %11783 = vmatprep.subr.bf16.mxu0 %v12178_v0 }
0x766e   :  { %11785 = vmatpush3.bf16.msra.mxu0 %v12328_v13 }
0x773c   :  { %v8917_v45 = vpop.f32.mrb[108].mxu0 }
0x773d   :  { %v8918_v33 = vadd.f32 %v13559_v40, %v8917_v45  ;;  %v11086_v42 = vpop.f32.mrb[109].mxu0 }
0x773f   :  { %v8921_v27 = vmul.f32 %v8918_v33, %v13554_v48 }
0x7741   :  { %v8922_v35 = vadd.f32 %v8921_v27, %v8846_v30 }
0x7743   :  { %12043 = vtanh.f32 %v8922_v35 }
0x774d   :  { %v12044_v4 = vpop.eup %12043 }
0x774e   :  { %11096 = vmatmul.mubr.msk.f32.vlgmr.msra.gmra.mrb[108].mxu1 %vm109_vm1, %v12044_v4 }
0x774f   :  { %11788 = vmatpush3.bf16.msra.mxu1 %v12491_v49  ;;  %11117 = vmatprep.mubr.msk.f32.mxu1 %vm12179_vm0, %v12180_v1 }
0x7750   :  { %11789 = vmatprep.subr.bf16.mxu1 %v12178_v0 }
0x7753   :  { %11791 = vmatpush3.bf16.msra.mxu1 %v12494_v25 }
0x7821   :  { %v8993_v10 = vpop.f32.mrb[108].mxu1 }
0x7822   :  { %v8994_v13 = vadd.f32 %v13559_v40, %v8993_v10  ;;  %v11097_v38 = vpop.f32.mrb[109].mxu1 }
0x7824   :  { %v8997_v39 = vmul.f32 %v8994_v13, %v13554_v48 }
0x7826   :  { %v8998_v47 = vadd.f32 %v8997_v39, %v8846_v30 }
0x7828   :  { %12045 = vtanh.f32 %v8998_v47 }
0x7832   :  { %v12046_v7 = vpop.eup %12045 }
0x7833   :  { %11107 = vmatmul.mubr.msk.f32.vlgmr.msra.gmra.mrb[110].mxu0 %vm109_vm1, %v12046_v7  ;;  %v9076_v25 = vadd.f32 %v12046_v7, %v12044_v4 }
0x7835   :  { %v9077_v43 = vmul.f32 2.0, %v9076_v25 }
0x7837   :  { %v9078_v6 = vadd.f32 %v12042_v31, %v9077_v43 }
0x7906   :  { %v9069_v24 = vpop.f32.mrb[110].mxu0 }
0x7907   :  { %v9070_v49 = vadd.f32 %v13559_v40, %v9069_v24  ;;  %v11108_v52 = vpop.f32.mrb[111].mxu0 }
0x7909   :  { %v9073_v1 = vmul.f32 %v9070_v49, %v13551_v12 }
0x790b   :  { %v9074_v0 = vadd.f32 %v9073_v1, %v8846_v30 }
0x790d   :  { %12047 = vtanh.f32 %v9074_v0 }
0x7917   :  { %v12048_v32 = vpop.eup %12047 }
0x7918   :  { %v9079_v34 = vadd.f32 %v12048_v32, %v9078_v6 }
0x791a   :  { %v9080_v44 = vadd.f32 %v9079_v34, %v8767_v28 }
0x791c   :  { %11118 = vmatmul.mubr.msk.f32.vlgmr.msra.gmra.mrb[110].mxu1 %vm109_vm1, %v9080_v44 }
0x79ef   :  { %v9150_v48 = vpop.f32.mrb[110].mxu1 }
0x79f0   :  { %v9151_v20 = vadd.f32 %v9150_v48, %v12512_v46  ;;  %v11119_v5 = vpop.f32.mrb[111].mxu1 }
0x79f2   :  { %v9154_v9 = vmul.f32 %v9151_v20, %v13595_v56 }
0x79f4   :  { %9156 = vrot.lane.b32.xlu1 %v9154_v9, %s12184_s2 }
0x7a66   :  { %v9157_v40 = vpop.permute.xlu1 %9156 }
0x7a67   :  { %v9159_v12 = vadd.f32 %v9157_v40, %v13529_v2 }
0x7a69   :  { %9161 = vrot.lane.b32.xlu0 %v9159_v12, %s12182_s16 }
0x7adb   :  { %v9162_v51 = vpop.permute.xlu0 %9161 }
0x7adc   :  { %9165 = vst.msk [vmem:[#allocation10 + $0x1c] sm:$0xf] %vm1254_vm2, %v9162_v51 }
0x7add   :  { %12153 = shalt.err (!%p12150_p8)
}
0x7ade   :  { %s12154_s17 = scalar_lea.hbm %s13685_s9, 512 }
0x7adf   :  { %p12155_p9 = scmp.ne.s32.totalorder %s13685_s9, %s12154_s17  ;;  %p12158_p10 = scmp.lt.u32.totalorder %s12154_s17, %s13685_s9 }
0x7ae1   :  { %p12160_p11 = pnand %p12158_p10, %p12155_p9 }
0x7ae3   :  { %12163 = shalt.err (!%p12160_p11)
}
0x7ae4   :  { %s12186_s23 = smov 4  }
0x7ae5   :  { %9177 = dma.vmem_to_hbm [thread:$0]  %s9172_s15, 512, %s13685_s9, [#allocation4], %s12181_s22, %s12181_s22, %s12186_s23  }
0x7ae6   :  { %12170 = dma.done.wait [#allocation4], 512  }
0x7ae7   :  { %12171 = vsyncadd [#allocation4], 4294966784 }
0x7ae8   :  { %9181 = vsyncpa [#allocation3], 1 }
0x7ae9   :  { %9182 = vsyncpa [#allocation6], 1 }
0x7aea   :  { %9183 = vsyncpa [#allocation9], 1 }
0x7aeb   :  { %9184 = vsyncpa [#allocation4], 1 }

</bundles_post_ra>
